<compile_context>
chip_gen: v7x
topology: tpu7x:2x2x1
jax: 0.10.0
libtpu: 0.0.40
codegen_flags: <defaults>
</compile_context>

<pallas_src>
import functools

import jax
import jax.numpy as jnp
from jax import lax
from jax.experimental import pallas as pl
from jax.experimental.pallas import tpu as pltpu


# ---------------------------------------------------------------------------
# Pallas kernel: mean L1 / L2 distance between two equally shaped tensors.
# ---------------------------------------------------------------------------

LANES = 128
MAX_TILE_ROWS = 2048      # (2048, 128) f32 block = 1 MiB
NUM_CORE_SPLITS = 2       # leading "parallel" grid axis (v7x has 2 TensorCores)


def _dist_sum_kernel(p_ref, x_ref, o_ref, acc_ref, *,
                     tile_rows, steps_per_split, rows, full_blocks,
                     n_elements, use_l1, needs_mask):
    c = pl.program_id(0)          # parallel split (one per TensorCore on v7x)
    i = pl.program_id(1)          # streaming reduction step within the split

    @pl.when(i == 0)
    def _init():
        acc_ref[...] = jnp.zeros_like(acc_ref)

    d = p_ref[...].astype(jnp.float32) - x_ref[...].astype(jnp.float32)
    v = jnp.abs(d) if use_l1 else d * d

    if needs_mask:
        blk = c * steps_per_split + i        # logical (unclamped) block index

        @pl.when(blk < full_blocks)          # interior blocks: no masking cost
        def _accum_clean():
            acc_ref[...] += v

        @pl.when(blk >= full_blocks)         # tail / duplicated (clamped) block
        def _accum_masked():
            row = blk * tile_rows + lax.broadcasted_iota(jnp.int32, v.shape, 0)
            acc_ref[...] += jnp.where(row < rows, v, 0.0)
    else:
        acc_ref[...] += v

    @pl.when(i == steps_per_split - 1)
    def _finalize():
        partial = jnp.sum(acc_ref[...]) / jnp.float32(n_elements)
        # Lane-dense (1, 8, 128) output block; the wrapper reads [c, 0, 0].
        o_ref[...] = jnp.zeros(o_ref.shape, jnp.float32) + partial


def distance_mean_pallas(prediction, target, *, use_l1=True):
    """mean(|p - x|) (L1) or mean((p - x)^2) (L2) — nn.L1Loss / nn.MSELoss."""
    assert prediction.shape == target.shape, "shape mismatch"
    n_elements = prediction.size

    p = prediction.reshape(-1)
    x = target.reshape(-1)

    # Lane-dense (rows, 128) view.  VGG feature maps always have a multiple of
    # 128 elements, so this reshape is free; the pad below is a rare fallback
    # for odd shapes only (costs an HBM copy, adds < 128 zero elements).
    rem = p.size % LANES
    if rem:
        p = jnp.pad(p, (0, LANES - rem))
        x = jnp.pad(x, (0, LANES - rem))
    rows = p.size // LANES
    p2d = p.reshape(rows, LANES)
    x2d = x.reshape(rows, LANES)

    tile_rows = min(MAX_TILE_ROWS, rows)
    if tile_rows < rows:
        tile_rows = max(8, (tile_rows // 8) * 8)   # (8,128) block divisibility
    nblocks = pl.cdiv(rows, tile_rows)
    steps_per_split = pl.cdiv(nblocks, NUM_CORE_SPLITS)
    full_blocks = rows // tile_rows
    needs_mask = (NUM_CORE_SPLITS * steps_per_split * tile_rows) != rows

    def in_index_map(c, i):
        # Clamp so the DMA never walks past the array; out-of-range logical
        # blocks re-read the last real block and are zero-masked in-kernel.
        blk = c * steps_per_split + i
        return (jnp.minimum(blk, nblocks - 1), 0)

    kernel = functools.partial(
        _dist_sum_kernel,
        tile_rows=tile_rows, steps_per_split=steps_per_split, rows=rows,
        full_blocks=full_blocks, n_elements=n_elements, use_l1=use_l1,
        needs_mask=needs_mask)

    partials = pl.pallas_call(
        kernel,
        out_shape=jax.ShapeDtypeStruct((NUM_CORE_SPLITS, 8, LANES), jnp.float32),
        grid_spec=pltpu.PrefetchScalarGridSpec(
            num_scalar_prefetch=0,
            grid=(NUM_CORE_SPLITS, steps_per_split),
            in_specs=[
                pl.BlockSpec((tile_rows, LANES), in_index_map),
                pl.BlockSpec((tile_rows, LANES), in_index_map),
            ],
            out_specs=pl.BlockSpec((1, 8, LANES), lambda c, i: (c, 0, 0)),
            scratch_shapes=[pltpu.VMEM((tile_rows, LANES), jnp.float32)],
        ),
        compiler_params=pltpu.CompilerParams(
            dimension_semantics=("parallel", "arbitrary"),
        ),
    )(p2d, x2d)

    return jnp.sum(partials[:, 0, 0])


# ---------------------------------------------------------------------------
# VGG-19 feature extractor (torchvision vgg19().features layer indexing).
# ---------------------------------------------------------------------------

VGG19_CFG = [64, 64, 'M', 128, 128, 'M', 256, 256, 256, 256, 'M',
             512, 512, 512, 512, 'M', 512, 512, 512, 512, 'M']


def _build_vgg19_layer_list():
    layers = []
    in_ch = 3
    for v in VGG19_CFG:
        if v == 'M':
            layers.append(('maxpool', None))
        else:
            layers.append(('conv', (in_ch, v)))
            layers.append(('relu', None))
            in_ch = v
    return layers


def init_vgg19_features(key, last_layer):
    """Build layer list + params for vgg19.features[: last_layer + 1]."""
    # TODO(synk): pretrained ImageNet weights are not loadable here; He-normal
    # deterministic init preserves the forward structure/semantics.
    layers = _build_vgg19_layer_list()[: last_layer + 1]
    params = []
    for kind, cfg in layers:
        if kind == 'conv':
            in_ch, out_ch = cfg
            key, wk = jax.random.split(key)
            std = (2.0 / (in_ch * 9)) ** 0.5
            w = std * jax.random.normal(wk, (out_ch, in_ch, 3, 3), jnp.float32)
            b = jnp.zeros((out_ch,), jnp.float32)
            params.append((w, b))
        else:
            params.append(None)
    return layers, params


def vgg19_extract_features(layers, params, image, layers_to_extract):
    outputs = []
    value = image
    for idx, ((kind, _), p) in enumerate(zip(layers, params)):
        if kind == 'conv':
            w, b = p
            value = lax.conv_general_dilated(
                value, w, window_strides=(1, 1), padding=((1, 1), (1, 1)),
                dimension_numbers=('NCHW', 'OIHW', 'NCHW'))
            value = value + b[None, :, None, None]
        elif kind == 'relu':
            value = jnp.maximum(value, 0.0)
        else:  # 2x2 max-pool, stride 2
            value = lax.reduce_window(
                value, jnp.array(-jnp.inf, value.dtype), lax.max,
                window_dimensions=(1, 1, 2, 2), window_strides=(1, 1, 2, 2),
                padding='VALID')
        if idx in layers_to_extract:
            outputs.append(value)
    return outputs


# ---------------------------------------------------------------------------
# PerceptualVggLoss.forward
# ---------------------------------------------------------------------------

def perceptual_vgg_loss_forward(vgg_layers, vgg_params, layers_to_extract,
                                weights, pred_image_reconstr, image,
                                distance='L1', **_):
    if distance not in ('L1', 'L2'):
        raise NotImplementedError(f'PerceptualVggLoss(distance={distance})')
    use_l1 = distance == 'L1'

    features_a = vgg19_extract_features(vgg_layers, vgg_params,
                                        pred_image_reconstr, layers_to_extract)
    features_b = vgg19_extract_features(vgg_layers, vgg_params,
                                        lax.stop_gradient(image),
                                        layers_to_extract)
    loss = jnp.float32(0.0)
    for w, fa, fb in zip(weights, features_a, features_b):
        loss = loss + w * distance_mean_pallas(fa, fb, use_l1=use_l1)
    return dict(loss=loss)


if __name__ == "__main__":
    key = jax.random.PRNGKey(0)
    k_params, k_pred, k_img = jax.random.split(key, 3)

    # Module config: default extraction layers (relu1_1 ... relu5_1) + weights.
    layers = [1, 6, 11, 20, 29]
    weights = [1.0, 0.75, 0.5, 0.25, 0.125]
    layers_set = set(layers)
    last_layer = max(layers)

    vgg_layers, vgg_params = init_vgg19_features(k_params, last_layer)

    # Small NCHW images (32x32 so all four pools before layer 29 are valid).
    B, C, H, W = 2, 3, 32, 32
    pred_image = jax.random.normal(k_pred, (B, C, H, W), jnp.float32)
    image = jax.random.normal(k_img, (B, C, H, W), jnp.float32)

    out = perceptual_vgg_loss_forward(vgg_layers, vgg_params, layers_set,
                                      weights, pred_image, image,
                                      distance='L1')
    loss = jax.block_until_ready(out['loss'])

    # Pure-JAX reference of the same forward pass.
    feats_a = vgg19_extract_features(vgg_layers, vgg_params, pred_image,
                                     layers_set)
    feats_b = vgg19_extract_features(vgg_layers, vgg_params, image, layers_set)
    ref = sum(w * jnp.mean(jnp.abs(fa - fb))
              for w, fa, fb in zip(weights, feats_a, feats_b))
    assert jnp.allclose(loss, ref, rtol=1e-4, atol=1e-6), (loss, ref)

    print("KERNEL_OK")
</pallas_src>

<mosaic_0001>
module attributes {stable_mosaic.version = 11 : i64} {
  func.func @_dist_sum_kernel(%arg0: i32, %arg1: i32, %arg2: memref<1024x128xf32, #tpu.memory_space<vmem>>, %arg3: memref<1024x128xf32, #tpu.memory_space<vmem>>, %arg4: memref<1x8x128xf32, #tpu.memory_space<vmem>>, %arg5: memref<1024x128xf32, #tpu.memory_space<vmem>>) attributes {dimension_semantics = [#tpu.dimension_semantics<parallel>, #tpu.dimension_semantics<arbitrary>], iteration_bounds = array<i64: 2, 1>, scalar_prefetch = 0 : i64, scratch_operands = 1 : i64, tpu.core_type = #tpu.core_type<tc>, window_params = [{transform_indices = @transform_0, window_bounds = array<i64: 1024, 128>}, {transform_indices = @transform_1, window_bounds = array<i64: 1024, 128>}, {transform_indices = @transform_2, window_bounds = array<i64: 1, 8, 128>}]} {
    %c0_i32 = arith.constant 0 : i32
    %0 = arith.cmpi eq, %arg1, %c0_i32 : i32
    %1 = arith.extui %0 : i1 to i32
    %c0_i32_0 = arith.constant 0 : i32
    %2 = arith.cmpi ne, %1, %c0_i32_0 : i32
    scf.if %2 {
      %cst = arith.constant 0.000000e+00 : f32
      %18 = vector.broadcast %cst : f32 to vector<1024x128xf32>
      %c0_10 = arith.constant 0 : index
      %c0_11 = arith.constant 0 : index
      %19 = vector.load %arg5[%c0_10, %c0_11] : memref<1024x128xf32, #tpu.memory_space<vmem>>, vector<1024x128xf32>
      tpu.vector_store %arg5[%c0_10, %c0_11], %18 {strides = array<i32>} : memref<1024x128xf32, #tpu.memory_space<vmem>>, vector<1024x128xf32>,
    } else {
    }
    %c0 = arith.constant 0 : index
    %c0_1 = arith.constant 0 : index
    %3 = vector.load %arg2[%c0, %c0_1] : memref<1024x128xf32, #tpu.memory_space<vmem>>, vector<1024x128xf32>
    %c0_2 = arith.constant 0 : index
    %c0_3 = arith.constant 0 : index
    %4 = vector.load %arg3[%c0_2, %c0_3] : memref<1024x128xf32, #tpu.memory_space<vmem>>, vector<1024x128xf32>
    %5 = arith.subf %3, %4 : vector<1024x128xf32>
    %6 = math.absf %5 : vector<1024x128xf32>
    %c1_i32 = arith.constant 1 : i32
    %7 = arith.muli %arg0, %c1_i32 : i32
    %8 = arith.addi %7, %arg1 : i32
    %c1_i32_4 = arith.constant 1 : i32
    %9 = arith.cmpi slt, %8, %c1_i32_4 : i32
    %10 = arith.extui %9 : i1 to i32
    %c0_i32_5 = arith.constant 0 : i32
    %11 = arith.cmpi ne, %10, %c0_i32_5 : i32
    scf.if %11 {
      %c0_10 = arith.constant 0 : index
      %c0_11 = arith.constant 0 : index
      %18 = vector.load %arg5[%c0_10, %c0_11] : memref<1024x128xf32, #tpu.memory_space<vmem>>, vector<1024x128xf32>
      %19 = arith.addf %18, %6 : vector<1024x128xf32>
      %c0_12 = arith.constant 0 : index
      %c0_13 = arith.constant 0 : index
      %20 = vector.load %arg5[%c0_12, %c0_13] : memref<1024x128xf32, #tpu.memory_space<vmem>>, vector<1024x128xf32>
      tpu.vector_store %arg5[%c0_12, %c0_13], %19 {strides = array<i32>} : memref<1024x128xf32, #tpu.memory_space<vmem>>, vector<1024x128xf32>,
    } else {
    }
    %c1_i32_6 = arith.constant 1 : i32
    %12 = arith.cmpi sge, %8, %c1_i32_6 : i32
    %13 = arith.extui %12 : i1 to i32
    %c0_i32_7 = arith.constant 0 : i32
    %14 = arith.cmpi ne, %13, %c0_i32_7 : i32
    scf.if %14 {
      %c1024_i32 = arith.constant 1024 : i32
      %18 = arith.muli %8, %c1024_i32 : i32
      %19 = tpu.iota {dimensions = array<i32: 0>} : vector<1024x128xi32>
      %20 = vector.broadcast %18 : i32 to vector<1024x128xi32>
      %21 = arith.addi %20, %19 : vector<1024x128xi32>
      %c0_10 = arith.constant 0 : index
      %c0_11 = arith.constant 0 : index
      %22 = vector.load %arg5[%c0_10, %c0_11] : memref<1024x128xf32, #tpu.memory_space<vmem>>, vector<1024x128xf32>
      %c1024_i32_12 = arith.constant 1024 : i32
      %23 = vector.broadcast %c1024_i32_12 : i32 to vector<1024x128xi32>
      %24 = arith.cmpi slt, %21, %23 : vector<1024x128xi32>
      %cst = arith.constant 0.000000e+00 : f32
      %25 = vector.broadcast %cst : f32 to vector<1024x128xf32>
      %26 = arith.select %24, %6, %25 : vector<1024x128xi1>, vector<1024x128xf32>
      %27 = arith.addf %22, %26 : vector<1024x128xf32>
      %c0_13 = arith.constant 0 : index
      %c0_14 = arith.constant 0 : index
      %28 = vector.load %arg5[%c0_13, %c0_14] : memref<1024x128xf32, #tpu.memory_space<vmem>>, vector<1024x128xf32>
      tpu.vector_store %arg5[%c0_13, %c0_14], %27 {strides = array<i32>} : memref<1024x128xf32, #tpu.memory_space<vmem>>, vector<1024x128xf32>,
    } else {
    }
    %c0_i32_8 = arith.constant 0 : i32
    %15 = arith.cmpi eq, %arg1, %c0_i32_8 : i32
    %16 = arith.extui %15 : i1 to i32
    %c0_i32_9 = arith.constant 0 : i32
    %17 = arith.cmpi ne, %16, %c0_i32_9 : i32
    scf.if %17 {
      %c0_10 = arith.constant 0 : index
      %c0_11 = arith.constant 0 : index
      %18 = vector.load %arg5[%c0_10, %c0_11] : memref<1024x128xf32, #tpu.memory_space<vmem>>, vector<1024x128xf32>
      %19 = vector.shape_cast %18 : vector<1024x128xf32> to vector<1x1024x128xf32>
      %cst = arith.constant dense<0.000000e+00> : vector<1xf32>
      %20 = vector.multi_reduction <add>, %19, %cst [1, 2] : vector<1x1024x128xf32> to vector<1xf32>
      %21 = vector.shape_cast %20 : vector<1xf32> to vector<1x1x1xf32>
      %22 = vector.extract %21[0, 0, 0] : f32 from vector<1x1x1xf32>
      %cst_12 = arith.constant 1.310720e+05 : f32
      %23 = arith.divf %22, %cst_12 : f32
      %cst_13 = arith.constant 0.000000e+00 : f32
      %24 = vector.broadcast %cst_13 : f32 to vector<1x8x128xf32>
      %25 = vector.broadcast %23 : f32 to vector<1x8x128xf32>
      %26 = arith.addf %24, %25 : vector<1x8x128xf32>
      %c0_14 = arith.constant 0 : index
      %c0_15 = arith.constant 0 : index
      %c0_16 = arith.constant 0 : index
      %27 = vector.load %arg4[%c0_14, %c0_15, %c0_16] : memref<1x8x128xf32, #tpu.memory_space<vmem>>, vector<1x8x128xf32>
      tpu.vector_store %arg4[%c0_14, %c0_15, %c0_16], %26 {strides = array<i32>} : memref<1x8x128xf32, #tpu.memory_space<vmem>>, vector<1x8x128xf32>,
    } else {
    }
    return
  }
  func.func @transform_0(%arg0: i32, %arg1: i32) -> (i32, i32) {
    %c1_i32 = arith.constant 1 : i32
    %0 = arith.muli %arg0, %c1_i32 : i32
    %1 = arith.addi %0, %arg1 : i32
    %c0_i32 = arith.constant 0 : i32
    %2 = arith.minsi %1, %c0_i32 : i32
    %c0_i32_0 = arith.constant 0 : i32
    %c0_i32_1 = arith.constant 0 : i32
    return %2, %c0_i32_0 : i32, i32
  }
  func.func @transform_1(%arg0: i32, %arg1: i32) -> (i32, i32) {
    %c1_i32 = arith.constant 1 : i32
    %0 = arith.muli %arg0, %c1_i32 : i32
    %1 = arith.addi %0, %arg1 : i32
    %c0_i32 = arith.constant 0 : i32
    %2 = arith.minsi %1, %c0_i32 : i32
    %c0_i32_0 = arith.constant 0 : i32
    %c0_i32_1 = arith.constant 0 : i32
    return %2, %c0_i32_0 : i32, i32
  }
  func.func @transform_2(%arg0: i32, %arg1: i32) -> (i32, i32, i32) {
    %c0_i32 = arith.constant 0 : i32
    %c0_i32_0 = arith.constant 0 : i32
    %c0_i32_1 = arith.constant 0 : i32
    return %arg0, %c0_i32, %c0_i32_0 : i32, i32, i32
  }
}

</mosaic_0001>

<bundles_post_ra>
// kernel: tpu_custom_call.1
= control target key start
LH: loop header
LB: loop body
LE: loop exit
PB: predicated region body
PF: predicated region fallthrough
CT: control target
= control target key end

     0   :  { %7 = vsyncpa [#allocation4], 0  ;;  %s5189_s0 = inlined_call_operand.hbm [shape: f32[1024,128], index: 0, kind: input, shape index: {}]   ;;  %s5190_s1 = inlined_call_operand.hbm [shape: f32[1024,128], index: 1, kind: input, shape index: {}]   ;;  %s5191_s2 = inlined_call_operand.hbm [shape: f32[2,8,128], index: 2, kind: output, shape index: {}]  }
   0x1   :  { %9 = vsyncpa [#allocation4 + $0x1], 0 }
   0x2   :  { %10 = vsyncpa [#allocation7], 0 }
   0x3   :  { %12 = vsyncpa [#allocation7 + $0x1], 0 }
   0x4   :  { %13 = vsyncpa [#allocation5], 0 }
   0x5   :  { %15 = vsyncpa [#allocation5 + $0x1], 0  ;;  %s2873_s9 = smov 0   ;;  %s2875_s10 = smov 0  }
   0x6   :  { %s2877_s11 = smov 0   ;;  %s2879_s12 = smov 0  }
   0x7   :  { %s2881_s13 = smov 0   ;;  %s2883_s14 = smov 0  }
   0x8   :  { %s2885_s15 = smov 0   ;;  %s2887_s16 = smov 0  }
   0x9 LB: > { %s2564_s17 = sadd.s32 4294967295, %s2850_s16   ;;  %s2565_s18 = sadd.s32 4294967294, %s2850_s16   ;;  %s2850_s16 = sphi %s2887_s16, %s21_s16   ;;  %s2846_s15 = sphi %s2885_s15, %s5904_s15   ;;  %s2842_s14 = sphi %s2883_s14, %s5903_s14   ;;  %s2838_s13 = sphi %s2881_s13, %s5179_s13   ;;  %s2834_s12 = sphi %s2879_s12, %s5902_s12   ;;  %s2830_s11 = sphi %s2877_s11, %s5901_s11   ;;  %s2826_s10 = sphi %s2875_s10, %s5900_s10   ;;  %s2822_s9 = sphi %s2873_s9, %s5899_s9  }
   0xa   : > { %s33_s19 = sadd.s32 1, %s2846_s15  ;;  %p2819_p1 = scmp.ne.s32.totalorder %s2838_s13, 0 }
   0xb   : > { %p35_p0 = scmp.ge.s32.totalorder %s33_s19, 2  ;;  %p54_p2 = scmp.eq.s32.totalorder %s2850_s16, 0 }
   0xc   : > { %p59_p3 = scmp.ne.s32.totalorder %s2838_s13, %s2834_s12  ;;  %p60_p5 = scmp.eq.s32.totalorder %s2564_s17, 0 }
   0xd   : > { %s5906_s19 = smov (%p35_p0, %s33_s19), 0  ;;  %p2919_p4 = por %p2819_p1, %p54_p2 }
   0xe   : > { %p2923_p6 = por %p60_p5, %p59_p3  ;;  %s101_s22 = ssub.s32 %s2846_s15, %s5906_s19 }
   0xf   : > { %p102_p7 = scmp.eq.s32.totalorder %s101_s22, 0  ;;  %s104_s23 = sadd.s32 1, %s2830_s11 }
  0x10   : > { %s5306_s21 = scalar_select %p2923_p6, 1, 0 }
  0x11   : > { %s2931_s24 = scalar_select %p102_p7, %s2830_s11, %s104_s23  }
  0x12   : > { %p114_p8 = scmp.ne.s32.totalorder %s2830_s11, %s2826_s10  ;;  %p115_p9 = scmp.eq.s32.totalorder %s2564_s17, 1 }
  0x13   : > { %p120_p10 = scmp.ne.s32.totalorder %s2826_s10, %s2822_s9  ;;  %p121_p11 = scmp.eq.s32.totalorder %s2565_s18, 1 }
  0x14   : > { %p2937_p12 = por %p115_p9, %p114_p8  ;;  %p2606_p1 = scmp.lt.s32.totalorder %s2850_s16, 2 }
  0x15   : > { %p2942_p0 = por %p121_p11, %p120_p10  ;;  %s2852_s27 = smov [#allocation3]  }
  0x16   : > { %s5307_s25 = scalar_select %p2937_p12, 1, 0 }
  0x17   : > { %s5308_s26 = scalar_select %p2942_p0, 1, 0 }
  0x18   : > { %s155_s28 = sshll.u32 %s2852_s27, 4  ;;  %p2949_p2 = pnand %p2606_p1, %p2919_p4  ;;  %s156_s28 = int_to_ptr.vmem [resolvable:$true] %s155_s28 }
  0x19   : > { %s2683_s4 = scalar_lea.hbm %s5189_s0, 16384 }
  0x1a   : > { %p2684_p3 = scmp.ne.s32.totalorder %s5189_s0, %s2683_s4  ;;  %p2685_p5 = pneg %p2949_p2 }
  0x1b   : > { %p2690_p8 = scmp.lt.u32.totalorder %s2683_s4, %s2683_s4  ;;  %p2692_p9 = scmp.lt.u32.totalorder %s2683_s4, %s5189_s0 }
  0x1c   : > { %p2686_p7 = pnand %p2685_p5, %p2684_p3 }
  0x1d   : > { %p2693_p10 = por %p2692_p9, %p2690_p8 }
  0x1e   : > { %p2687_p4 = pneg %p2686_p7 }
  0x20   : > { %p2694_p11 = pnand %p2693_p10, %p2687_p4 }
  0x22   : > { %2697 = shalt.err (!%p2694_p11)
}
  0x23   : > { %s2698_s12 = scalar_lea.vmem %s156_s28, 16384  ;;  %s2705_s17 = scalar_lea.vmem %s156_s28, 32768 }
  0x24   : > { %p2699_p1 = scmp.ne.s32.totalorder %s156_s28, %s2698_s12  ;;  %p2706_p12 = scmp.lt.s32.totalorder %s156_s28, %s156_s28 }
  0x25   : > { %p2707_p6 = scmp.lt.s32.totalorder %s2705_s17, %s2698_s12 }
  0x26   : > { %p2701_p13 = pnand %p2699_p1, %p2685_p5 }
  0x27   : > { %p2708_p3 = por %p2707_p6, %p2706_p12 }
  0x28   : > { %p2702_p0 = pneg %p2701_p13 }
  0x2a   : > { %p2709_p7 = pnand %p2708_p3, %p2702_p0 }
  0x2c   : > { %2712 = shalt.err (!%p2709_p7)
}
  0x2d   : > { %s2853_s18 = smov 128   ;;  %s2854_s20 = smov 8  }
  0x2e   : > { %2598 = dma.hbm_to_vmem [thread:$0]  (!%p2949_p2), %s5189_s0, 16384, %s156_s28, [#allocation4], %s2853_s18, %s2853_s18, %s2854_s20  }
  0x2f   : > { %p2574_p13 = scmp.ge.s32.totalorder %s2850_s16, 1  ;;  %p187_p4 = scmp.lt.s32.totalorder %s2850_s16, 3 }
  0x30   : > { %s2855_s30 = smov [#allocation6]   ;;  %s2713_s6 = scalar_lea.hbm %s5190_s1, 16384 }
  0x31   : > { %p2980_p8 = pnand %p2574_p13, %p187_p4  ;;  %s179_s3 = sshll.u32 %s2855_s30, 4  ;;  %s180_s3 = int_to_ptr.vmem [resolvable:$true] %s179_s3 }
  0x32   : > { %p2714_p6 = scmp.ne.s32.totalorder %s5190_s1, %s2713_s6  ;;  %p2720_p9 = scmp.lt.u32.totalorder %s2713_s6, %s2713_s6 }
  0x33   : > { %s5310_s27 = scalar_select %p2980_p8, 1, 0 }
  0x34   : > { %p2716_p12 = pnand %p2714_p6, %p2685_p5  ;;  %p2722_p10 = scmp.lt.u32.totalorder %s2713_s6, %s5190_s1 }
  0x36   : > { %p2717_p0 = pneg %p2716_p12  ;;  %p2723_p11 = por %p2722_p10, %p2720_p9 }
  0x38   : > { %p2724_p1 = pnand %p2723_p11, %p2717_p0 }
  0x3a   : > { %2727 = shalt.err (!%p2724_p1)
}
  0x3b   : > { %s2728_s17 = scalar_lea.vmem %s180_s3, 16384  ;;  %s2735_s22 = scalar_lea.vmem %s180_s3, 32768 }
  0x3c   : > { %p2729_p3 = scmp.ne.s32.totalorder %s180_s3, %s2728_s17  ;;  %p2736_p4 = scmp.lt.s32.totalorder %s180_s3, %s180_s3 }
  0x3d   : > { %p2737_p8 = scmp.lt.s32.totalorder %s2735_s22, %s2728_s17 }
  0x3e   : > { %p2731_p7 = pnand %p2729_p3, %p2685_p5 }
  0x3f   : > { %p2738_p6 = por %p2737_p8, %p2736_p4 }
  0x40   : > { %p2732_p13 = pneg %p2731_p7 }
  0x42   : > { %p2739_p12 = pnand %p2738_p6, %p2732_p13 }
  0x44   : > { %2742 = shalt.err (!%p2739_p12)
}
  0x45   : > { %2601 = dma.hbm_to_vmem [thread:$0]  (!%p2949_p2), %s5190_s1, 16384, %s180_s3, [#allocation7], %s2853_s18, %s2853_s18, %s2854_s20  }
  0x46   : > { %p5311_p0 = scmp.ne.s32.totalorder %s5310_s27, 0 }
  0x48   : > { %191 = sbr.rel (%p5311_p0) target bundleno = 1040 (0x410), region = 28 }
  0x4f   : > { %s193_s4 = sand.u32 1, %s2838_s13   ;;  %p5312_p5 = scmp.ne.s32.totalorder %s5306_s21, 0 }
  0x50   : > { %s2575_s5 = sshll.u32 %s193_s4, 10  ;;  %s194_s6 = scalar_lea.sflag [#allocation4], %s193_s4 }
  0x51   : > { %s3010_s7 = scalar_lea.vmem [#allocation3], %s2575_s5 }
  0x52   : > { %2808 = dma.done.wait (%p5312_p5), %s194_s6, 16384  }
  0x53   : > { %2810 = vsyncadd (%p5312_p5), %s194_s6, 4294950912  ;;  %s203_s29 = scalar_lea.sflag [#allocation7], %s193_s4  ;;  %s3016_s8 = scalar_lea.vmem [#allocation6], %s2575_s5 }
  0x54   : > { %2812 = dma.done.wait (%p5312_p5), %s203_s29, 16384  }
  0x55   : > { %2814 = vsyncadd (%p5312_p5), %s203_s29, 4294950912  ;;  %s229_s18 = sand.u32 1, %s2826_s10   ;;  %v2856_v0 = vmov 0.0   ;;  %v372_v1 = vld [vmem:[%s3010_s7] sm:$0xff]  ;;  %v373_v2 = vld [vmem:[%s3010_s7 + $0x8] sm:$0xff]  ;;  %p2578_p2 = scmp.ge.s32.totalorder %s2842_s14, 1 }
  0x56   : > { %s3025_s20 = sshll.u32 %s229_s18, 3  ;;  %244 = vst [vmem:[#allocation2] sm:$0xff] %v2856_v0  ;;  %245 = vst [vmem:[#allocation2 + $0x8] sm:$0xff] %v2856_v0  ;;  %v374_v3 = vld [vmem:[%s3010_s7 + $0x10] sm:$0xff]  ;;  %v375_v4 = vld [vmem:[%s3010_s7 + $0x18] sm:$0xff] }
  0x57   : > { %246 = vst [vmem:[#allocation2 + $0x10] sm:$0xff] %v2856_v0  ;;  %247 = vst [vmem:[#allocation2 + $0x18] sm:$0xff] %v2856_v0  ;;  %v376_v5 = vld [vmem:[%s3010_s7 + $0x20] sm:$0xff]  ;;  %v377_v6 = vld [vmem:[%s3010_s7 + $0x28] sm:$0xff]  ;;  %s231_s21 = scalar_lea.vmem [#allocation8], %s3025_s20 }
  0x58   : > { %248 = vst [vmem:[#allocation2 + $0x20] sm:$0xff] %v2856_v0  ;;  %249 = vst [vmem:[#allocation2 + $0x28] sm:$0xff] %v2856_v0  ;;  %v378_v7 = vld [vmem:[%s3010_s7 + $0x30] sm:$0xff]  ;;  %v500_v8 = vld [vmem:[%s3016_s8] sm:$0xff] }
  0x59   : > { %250 = vst [vmem:[#allocation2 + $0x30] sm:$0xff] %v2856_v0  ;;  %251 = vst [vmem:[#allocation2 + $0x38] sm:$0xff] %v2856_v0  ;;  %v501_v9 = vld [vmem:[%s3016_s8 + $0x8] sm:$0xff]  ;;  %v502_v10 = vld [vmem:[%s3016_s8 + $0x10] sm:$0xff]  ;;  %v628_v12 = vsub.f32 %v372_v1, %v500_v8 }
  0x5a   : > { %252 = vst [vmem:[#allocation2 + $0x40] sm:$0xff] %v2856_v0  ;;  %253 = vst [vmem:[#allocation2 + $0x48] sm:$0xff] %v2856_v0  ;;  %v503_v11 = vld [vmem:[%s3016_s8 + $0x18] sm:$0xff]  ;;  %v504_v13 = vld [vmem:[%s3016_s8 + $0x20] sm:$0xff]  ;;  %v629_v16 = vsub.f32 %v373_v2, %v501_v9  ;;  %v630_v17 = vsub.f32 %v374_v3, %v502_v10 }
  0x5b   : > { %254 = vst [vmem:[#allocation2 + $0x50] sm:$0xff] %v2856_v0  ;;  %255 = vst [vmem:[#allocation2 + $0x58] sm:$0xff] %v2856_v0  ;;  %v505_v14 = vld [vmem:[%s3016_s8 + $0x28] sm:$0xff]  ;;  %v506_v15 = vld [vmem:[%s3016_s8 + $0x30] sm:$0xff]  ;;  %v631_v18 = vsub.f32 %v375_v4, %v503_v11  ;;  %v632_v21 = vsub.f32 %v376_v5, %v504_v13  ;;  %v3171_v22 = vand.u32 2147483647, %v628_v12 }
  0x5c   : > { %256 = vst [vmem:[#allocation2 + $0x60] sm:$0xff] %v2856_v0  ;;  %257 = vst [vmem:[#allocation2 + $0x68] sm:$0xff] %v2856_v0  ;;  %v379_v19 = vld [vmem:[%s3010_s7 + $0x38] sm:$0xff]  ;;  %v380_v23 = vld [vmem:[%s3010_s7 + $0x40] sm:$0xff]  ;;  %v633_v25 = vsub.f32 %v377_v6, %v505_v14  ;;  %v3175_v26 = vand.u32 2147483647, %v629_v16  ;;  %v634_v29 = vsub.f32 %v378_v7, %v506_v15 }
  0x5d   : > { %258 = vst [vmem:[#allocation2 + $0x70] sm:$0xff] %v2856_v0  ;;  %259 = vst [vmem:[#allocation2 + $0x78] sm:$0xff] %v2856_v0  ;;  %v507_v20 = vld [vmem:[%s3016_s8 + $0x38] sm:$0xff]  ;;  %v508_v24 = vld [vmem:[%s3016_s8 + $0x40] sm:$0xff]  ;;  %v3179_v30 = vand.u32 2147483647, %v630_v17 }
  0x5e   : > { %260 = vst [vmem:[#allocation2 + $0x80] sm:$0xff] %v2856_v0  ;;  %261 = vst [vmem:[#allocation2 + $0x88] sm:$0xff] %v2856_v0  ;;  %v381_v27 = vld [vmem:[%s3010_s7 + $0x48] sm:$0xff]  ;;  %v382_v31 = vld [vmem:[%s3010_s7 + $0x50] sm:$0xff]  ;;  %v635_v33 = vsub.f32 %v379_v19, %v507_v20  ;;  %v3183_v34 = vand.u32 2147483647, %v631_v18  ;;  %v636_v37 = vsub.f32 %v380_v23, %v508_v24 }
  0x5f   : > { %262 = vst [vmem:[#allocation2 + $0x90] sm:$0xff] %v2856_v0  ;;  %263 = vst [vmem:[#allocation2 + $0x98] sm:$0xff] %v2856_v0  ;;  %v509_v28 = vld [vmem:[%s3016_s8 + $0x48] sm:$0xff]  ;;  %v510_v32 = vld [vmem:[%s3016_s8 + $0x50] sm:$0xff]  ;;  %v3187_v38 = vand.u32 2147483647, %v632_v21 }
  0x60   : > { %264 = vst [vmem:[#allocation2 + $0xa0] sm:$0xff] %v2856_v0  ;;  %265 = vst [vmem:[#allocation2 + $0xa8] sm:$0xff] %v2856_v0  ;;  %v383_v35 = vld [vmem:[%s3010_s7 + $0x58] sm:$0xff]  ;;  %v384_v39 = vld [vmem:[%s3010_s7 + $0x60] sm:$0xff]  ;;  %v637_v42 = vsub.f32 %v381_v27, %v509_v28  ;;  %v3194_v43 = vand.u32 2147483647, %v633_v25  ;;  %v638_v47 = vsub.f32 %v382_v31, %v510_v32 }
  0x61   : > { %266 = vst [vmem:[#allocation2 + $0xb0] sm:$0xff] %v2856_v0  ;;  %267 = vst [vmem:[#allocation2 + $0xb8] sm:$0xff] %v2856_v0  ;;  %v511_v36 = vld [vmem:[%s3016_s8 + $0x58] sm:$0xff]  ;;  %v3191_v40 = vld [vmem:[%s3010_s7 + $0x68] sm:$0xff]  ;;  %v3203_v48 = vand.u32 2147483647, %v634_v29 }
  0x62   : > { %268 = vst [vmem:[#allocation2 + $0xc0] sm:$0xff] %v2856_v0  ;;  %269 = vst [vmem:[#allocation2 + $0xc8] sm:$0xff] %v2856_v0  ;;  %v512_v41 = vld [vmem:[%s3016_s8 + $0x60] sm:$0xff]  ;;  %v3197_v44 = vld [vmem:[%s3010_s7 + $0x70] sm:$0xff]  ;;  %v639_v53 = vsub.f32 %v383_v35, %v511_v36  ;;  %v3215_v54 = vand.u32 2147483647, %v635_v33 }
  0x63   : > { %270 = vst [vmem:[#allocation2 + $0xd0] sm:$0xff] %v2856_v0  ;;  %271 = vst [vmem:[#allocation2 + $0xd8] sm:$0xff] %v2856_v0  ;;  %v3200_v45 = vld [vmem:[%s3010_s7 + $0x78] sm:$0xff]  ;;  %v513_v46 = vld [vmem:[%s3016_s8 + $0x68] sm:$0xff]  ;;  %v640_v59 = vsub.f32 %v384_v39, %v512_v41  ;;  %v3229_v60 = vand.u32 2147483647, %v636_v37 }
  0x64   : > { %272 = vst [vmem:[#allocation2 + $0xe0] sm:$0xff] %v2856_v0  ;;  %273 = vst [vmem:[#allocation2 + $0xe8] sm:$0xff] %v2856_v0  ;;  %v3206_v49 = vld [vmem:[%s3010_s7 + $0x80] sm:$0xff]  ;;  %v3209_v50 = vld [vmem:[%s3010_s7 + $0x88] sm:$0xff]  ;;  %v641_v3 = vsub.f32 %v3191_v40, %v513_v46  ;;  %v3250_v4 = vand.u32 2147483647, %v637_v42 }
  0x65   : > { %274 = vst [vmem:[#allocation2 + $0xf0] sm:$0xff] %v2856_v0  ;;  %275 = vst [vmem:[#allocation2 + $0xf8] sm:$0xff] %v2856_v0  ;;  %v3212_v51 = vld [vmem:[%s3010_s7 + $0x90] sm:$0xff]  ;;  %v3218_v55 = vld [vmem:[%s3010_s7 + $0x98] sm:$0xff]  ;;  %v3271_v12 = vand.u32 2147483647, %v638_v47 }
  0x66   : > { %276 = vst [vmem:[#allocation2 + $0x100] sm:$0xff] %v2856_v0  ;;  %277 = vst [vmem:[#allocation2 + $0x108] sm:$0xff] %v2856_v0  ;;  %v514_v52 = vld [vmem:[%s3016_s8 + $0x70] sm:$0xff]  ;;  %v3221_v56 = vld [vmem:[%s3010_s7 + $0xa0] sm:$0xff]  ;;  %v3293_v20 = vand.u32 2147483647, %v639_v53 }
  0x67   : > { %278 = vst [vmem:[#allocation2 + $0x110] sm:$0xff] %v2856_v0  ;;  %279 = vst [vmem:[#allocation2 + $0x118] sm:$0xff] %v2856_v0  ;;  %v3224_v57 = vld [vmem:[%s3010_s7 + $0xa8] sm:$0xff]  ;;  %v3227_v58 = vld [vmem:[%s3016_s8 + $0x78] sm:$0xff]  ;;  %v642_v11 = vsub.f32 %v3197_v44, %v514_v52  ;;  %v3319_v33 = vand.u32 2147483647, %v640_v59 }
  0x68   : > { %280 = vst [vmem:[#allocation2 + $0x120] sm:$0xff] %v2856_v0  ;;  %281 = vst [vmem:[#allocation2 + $0x128] sm:$0xff] %v2856_v0  ;;  %v3232_v61 = vld [vmem:[%s3010_s7 + $0xb0] sm:$0xff]  ;;  %v3235_v62 = vld [vmem:[%s3010_s7 + $0xb8] sm:$0xff]  ;;  %v643_v19 = vsub.f32 %v3200_v45, %v3227_v58  ;;  %v3345_v46 = vand.u32 2147483647, %v641_v3 }
  0x69   : > { %282 = vst [vmem:[#allocation2 + $0x130] sm:$0xff] %v2856_v0  ;;  %283 = vst [vmem:[#allocation2 + $0x138] sm:$0xff] %v2856_v0  ;;  %v3238_v63 = vld [vmem:[%s3010_s7 + $0xc0] sm:$0xff]  ;;  %v3244_v1 = vld [vmem:[%s3016_s8 + $0x88] sm:$0xff] }
  0x6a   : > { %284 = vst [vmem:[#allocation2 + $0x140] sm:$0xff] %v2856_v0  ;;  %285 = vst [vmem:[#allocation2 + $0x148] sm:$0xff] %v2856_v0  ;;  %v3247_v2 = vld [vmem:[%s3016_s8 + $0x90] sm:$0xff]  ;;  %v3253_v5 = vld [vmem:[%s3010_s7 + $0xc8] sm:$0xff]  ;;  %v645_v31 = vsub.f32 %v3209_v50, %v3244_v1  ;;  %v3371_v1 = vand.u32 2147483647, %v642_v11 }
  0x6b   : > { %286 = vst [vmem:[#allocation2 + $0x150] sm:$0xff] %v2856_v0  ;;  %287 = vst [vmem:[#allocation2 + $0x158] sm:$0xff] %v2856_v0  ;;  %v3256_v6 = vld [vmem:[%s3010_s7 + $0xd0] sm:$0xff]  ;;  %v3259_v7 = vld [vmem:[%s3010_s7 + $0xd8] sm:$0xff]  ;;  %v646_v32 = vsub.f32 %v3212_v51, %v3247_v2 }
  0x6c   : > { %288 = vst [vmem:[#allocation2 + $0x160] sm:$0xff] %v2856_v0  ;;  %289 = vst [vmem:[#allocation2 + $0x168] sm:$0xff] %v2856_v0  ;;  %v3262_v8 = vld [vmem:[%s3016_s8 + $0x98] sm:$0xff]  ;;  %v3265_v9 = vld [vmem:[%s3016_s8 + $0xa0] sm:$0xff] }
  0x6d   : > { %290 = vst [vmem:[#allocation2 + $0x170] sm:$0xff] %v2856_v0  ;;  %291 = vst [vmem:[#allocation2 + $0x178] sm:$0xff] %v2856_v0  ;;  %v3268_v10 = vld [vmem:[%s3016_s8 + $0xa8] sm:$0xff]  ;;  %v3274_v13 = vld [vmem:[%s3010_s7 + $0xe0] sm:$0xff] }
  0x6e   : > { %292 = vst [vmem:[#allocation2 + $0x180] sm:$0xff] %v2856_v0  ;;  %293 = vst [vmem:[#allocation2 + $0x188] sm:$0xff] %v2856_v0  ;;  %v3277_v14 = vld [vmem:[%s3010_s7 + $0xe8] sm:$0xff]  ;;  %v3280_v15 = vld [vmem:[%s3010_s7 + $0xf0] sm:$0xff] }
  0x6f   : > { %294 = vst [vmem:[#allocation2 + $0x190] sm:$0xff] %v2856_v0  ;;  %295 = vst [vmem:[#allocation2 + $0x198] sm:$0xff] %v2856_v0  ;;  %v3283_v16 = vld [vmem:[%s3016_s8 + $0xb0] sm:$0xff]  ;;  %v3286_v17 = vld [vmem:[%s3016_s8 + $0xb8] sm:$0xff] }
  0x70   : > { %296 = vst [vmem:[#allocation2 + $0x1a0] sm:$0xff] %v2856_v0  ;;  %297 = vst [vmem:[#allocation2 + $0x1a8] sm:$0xff] %v2856_v0  ;;  %v3289_v18 = vld [vmem:[%s3016_s8 + $0xc0] sm:$0xff]  ;;  %v3296_v21 = vld [vmem:[%s3010_s7 + $0xf8] sm:$0xff] }
  0x71   : > { %298 = vst [vmem:[#allocation2 + $0x1b0] sm:$0xff] %v2856_v0  ;;  %299 = vst [vmem:[#allocation2 + $0x1b8] sm:$0xff] %v2856_v0  ;;  %v3299_v23 = vld [vmem:[%s3010_s7 + $0x100] sm:$0xff]  ;;  %v3302_v24 = vld [vmem:[%s3010_s7 + $0x108] sm:$0xff] }
  0x72   : > { %300 = vst [vmem:[#allocation2 + $0x1c0] sm:$0xff] %v2856_v0  ;;  %301 = vst [vmem:[#allocation2 + $0x1c8] sm:$0xff] %v2856_v0  ;;  %v3305_v25 = vld [vmem:[%s3016_s8 + $0xc8] sm:$0xff]  ;;  %v3308_v27 = vld [vmem:[%s3016_s8 + $0xd0] sm:$0xff] }
  0x73   : > { %302 = vst [vmem:[#allocation2 + $0x1d0] sm:$0xff] %v2856_v0  ;;  %303 = vst [vmem:[#allocation2 + $0x1d8] sm:$0xff] %v2856_v0  ;;  %v3311_v28 = vld [vmem:[%s3016_s8 + $0xd8] sm:$0xff]  ;;  %v3322_v35 = vld [vmem:[%s3010_s7 + $0x110] sm:$0xff] }
  0x74   : > { %304 = vst [vmem:[#allocation2 + $0x1e0] sm:$0xff] %v2856_v0  ;;  %305 = vst [vmem:[#allocation2 + $0x1e8] sm:$0xff] %v2856_v0  ;;  %v3325_v36 = vld [vmem:[%s3010_s7 + $0x118] sm:$0xff]  ;;  %v3328_v37 = vld [vmem:[%s3010_s7 + $0x120] sm:$0xff] }
  0x75   : > { %306 = vst [vmem:[#allocation2 + $0x1f0] sm:$0xff] %v2856_v0  ;;  %307 = vst [vmem:[#allocation2 + $0x1f8] sm:$0xff] %v2856_v0  ;;  %v3331_v39 = vld [vmem:[%s3016_s8 + $0xe0] sm:$0xff]  ;;  %v3334_v40 = vld [vmem:[%s3016_s8 + $0xe8] sm:$0xff] }
  0x76   : > { %308 = vst [vmem:[#allocation2 + $0x200] sm:$0xff] %v2856_v0  ;;  %309 = vst [vmem:[#allocation2 + $0x208] sm:$0xff] %v2856_v0  ;;  %v3337_v41 = vld [vmem:[%s3016_s8 + $0xf0] sm:$0xff]  ;;  %v3348_v47 = vld [vmem:[%s3010_s7 + $0x128] sm:$0xff] }
  0x77   : > { %310 = vst [vmem:[#allocation2 + $0x210] sm:$0xff] %v2856_v0  ;;  %311 = vst [vmem:[#allocation2 + $0x218] sm:$0xff] %v2856_v0  ;;  %v3354_v50 = vld [vmem:[%s3010_s7 + $0x138] sm:$0xff]  ;;  %v3360_v52 = vld [vmem:[%s3016_s8 + $0x100] sm:$0xff] }
  0x78   : > { %312 = vst [vmem:[#allocation2 + $0x220] sm:$0xff] %v2856_v0  ;;  %313 = vst [vmem:[#allocation2 + $0x228] sm:$0xff] %v2856_v0  ;;  %v3357_v51 = vld [vmem:[%s3016_s8 + $0xf8] sm:$0xff]  ;;  %v3363_v53 = vld [vmem:[%s3016_s8 + $0x108] sm:$0xff] }
  0x79   : > { %314 = vst [vmem:[#allocation2 + $0x230] sm:$0xff] %v2856_v0  ;;  %315 = vst [vmem:[#allocation2 + $0x238] sm:$0xff] %v2856_v0  ;;  %v3374_v2 = vld [vmem:[%s3010_s7 + $0x140] sm:$0xff]  ;;  %v3377_v3 = vld [vmem:[%s3010_s7 + $0x148] sm:$0xff] }
  0x7a   : > { %316 = vst [vmem:[#allocation2 + $0x240] sm:$0xff] %v2856_v0  ;;  %317 = vst [vmem:[#allocation2 + $0x248] sm:$0xff] %v2856_v0  ;;  %v3380_v45 = vld [vmem:[%s3010_s7 + $0x150] sm:$0xff]  ;;  %v3386_v58 = vld [vmem:[%s3016_s8 + $0x118] sm:$0xff] }
  0x7b   : > { %318 = vst [vmem:[#allocation2 + $0x250] sm:$0xff] %v2856_v0  ;;  %319 = vst [vmem:[#allocation2 + $0x258] sm:$0xff] %v2856_v0  ;;  %v3383_v44 = vld [vmem:[%s3016_s8 + $0x110] sm:$0xff]  ;;  %v3389_v59 = vld [vmem:[%s3016_s8 + $0x120] sm:$0xff] }
  0x7c   : > { %320 = vst [vmem:[#allocation2 + $0x260] sm:$0xff] %v2856_v0  ;;  %321 = vst [vmem:[#allocation2 + $0x268] sm:$0xff] %v2856_v0  ;;  %v3415_v11 = vld [vmem:[%s3016_s8 + $0x138] sm:$0xff]  ;;  %v3438_v42 = vld [vmem:[%s3016_s8 + $0x148] sm:$0xff] }
  0x7d   : > { %322 = vst [vmem:[#allocation2 + $0x270] sm:$0xff] %v2856_v0  ;;  %323 = vst [vmem:[#allocation2 + $0x278] sm:$0xff] %v2856_v0 }
  0x7e   : > { %324 = vst [vmem:[#allocation2 + $0x280] sm:$0xff] %v2856_v0  ;;  %325 = vst [vmem:[#allocation2 + $0x288] sm:$0xff] %v2856_v0 }
  0x7f   : > { %326 = vst [vmem:[#allocation2 + $0x290] sm:$0xff] %v2856_v0  ;;  %327 = vst [vmem:[#allocation2 + $0x298] sm:$0xff] %v2856_v0 }
  0x80   : > { %328 = vst [vmem:[#allocation2 + $0x2a0] sm:$0xff] %v2856_v0  ;;  %329 = vst [vmem:[#allocation2 + $0x2a8] sm:$0xff] %v2856_v0 }
  0x81   : > { %330 = vst [vmem:[#allocation2 + $0x2b0] sm:$0xff] %v2856_v0  ;;  %331 = vst [vmem:[#allocation2 + $0x2b8] sm:$0xff] %v2856_v0 }
  0x82   : > { %332 = vst [vmem:[#allocation2 + $0x2c0] sm:$0xff] %v2856_v0  ;;  %333 = vst [vmem:[#allocation2 + $0x2c8] sm:$0xff] %v2856_v0 }
  0x83   : > { %334 = vst [vmem:[#allocation2 + $0x2d0] sm:$0xff] %v2856_v0  ;;  %335 = vst [vmem:[#allocation2 + $0x2d8] sm:$0xff] %v2856_v0 }
  0x84   : > { %336 = vst [vmem:[#allocation2 + $0x2e0] sm:$0xff] %v2856_v0  ;;  %337 = vst [vmem:[#allocation2 + $0x2e8] sm:$0xff] %v2856_v0 }
  0x85   : > { %338 = vst [vmem:[#allocation2 + $0x2f0] sm:$0xff] %v2856_v0  ;;  %339 = vst [vmem:[#allocation2 + $0x2f8] sm:$0xff] %v2856_v0 }
  0x86   : > { %340 = vst [vmem:[#allocation2 + $0x300] sm:$0xff] %v2856_v0  ;;  %341 = vst [vmem:[#allocation2 + $0x308] sm:$0xff] %v2856_v0 }
  0x87   : > { %342 = vst [vmem:[#allocation2 + $0x310] sm:$0xff] %v2856_v0  ;;  %343 = vst [vmem:[#allocation2 + $0x318] sm:$0xff] %v2856_v0 }
  0x88   : > { %344 = vst [vmem:[#allocation2 + $0x320] sm:$0xff] %v2856_v0  ;;  %345 = vst [vmem:[#allocation2 + $0x328] sm:$0xff] %v2856_v0 }
  0x89   : > { %346 = vst [vmem:[#allocation2 + $0x330] sm:$0xff] %v2856_v0  ;;  %347 = vst [vmem:[#allocation2 + $0x338] sm:$0xff] %v2856_v0 }
  0x8a   : > { %348 = vst [vmem:[#allocation2 + $0x340] sm:$0xff] %v2856_v0  ;;  %349 = vst [vmem:[#allocation2 + $0x348] sm:$0xff] %v2856_v0 }
  0x8b   : > { %350 = vst [vmem:[#allocation2 + $0x350] sm:$0xff] %v2856_v0  ;;  %351 = vst [vmem:[#allocation2 + $0x358] sm:$0xff] %v2856_v0 }
  0x8c   : > { %352 = vst [vmem:[#allocation2 + $0x360] sm:$0xff] %v2856_v0  ;;  %353 = vst [vmem:[#allocation2 + $0x368] sm:$0xff] %v2856_v0 }
  0x8d   : > { %354 = vst [vmem:[#allocation2 + $0x370] sm:$0xff] %v2856_v0  ;;  %355 = vst [vmem:[#allocation2 + $0x378] sm:$0xff] %v2856_v0 }
  0x8e   : > { %356 = vst [vmem:[#allocation2 + $0x380] sm:$0xff] %v2856_v0  ;;  %357 = vst [vmem:[#allocation2 + $0x388] sm:$0xff] %v2856_v0 }
  0x8f   : > { %358 = vst [vmem:[#allocation2 + $0x390] sm:$0xff] %v2856_v0  ;;  %359 = vst [vmem:[#allocation2 + $0x398] sm:$0xff] %v2856_v0 }
  0x90   : > { %360 = vst [vmem:[#allocation2 + $0x3a0] sm:$0xff] %v2856_v0  ;;  %361 = vst [vmem:[#allocation2 + $0x3a8] sm:$0xff] %v2856_v0 }
  0x91   : > { %362 = vst [vmem:[#allocation2 + $0x3b0] sm:$0xff] %v2856_v0  ;;  %363 = vst [vmem:[#allocation2 + $0x3b8] sm:$0xff] %v2856_v0 }
  0x92   : > { %364 = vst [vmem:[#allocation2 + $0x3c0] sm:$0xff] %v2856_v0  ;;  %365 = vst [vmem:[#allocation2 + $0x3c8] sm:$0xff] %v2856_v0 }
  0x93   : > { %366 = vst [vmem:[#allocation2 + $0x3d0] sm:$0xff] %v2856_v0  ;;  %367 = vst [vmem:[#allocation2 + $0x3d8] sm:$0xff] %v2856_v0 }
  0x94   : > { %368 = vst [vmem:[#allocation2 + $0x3e0] sm:$0xff] %v2856_v0  ;;  %369 = vst [vmem:[#allocation2 + $0x3e8] sm:$0xff] %v2856_v0 }
  0x95   : > { %370 = vst [vmem:[#allocation2 + $0x3f0] sm:$0xff] %v2856_v0  ;;  %371 = vst [vmem:[#allocation2 + $0x3f8] sm:$0xff] %v2856_v0  ;;  %v3241_v0 = vld [vmem:[%s3016_s8 + $0x80] sm:$0xff] }
  0x96   : > { %5313 = vst [vmem:[#allocation12_spill] sm:$0xff] %v3171_v22  ;;  %5314 = vst [vmem:[#allocation13_spill] sm:$0xff] %v3175_v26  ;;  %v644_v29 = vsub.f32 %v3206_v49, %v3241_v0  ;;  %v3351_v49 = vld [vmem:[%s3010_s7 + $0x130] sm:$0xff]  ;;  %v3458_v26 = vld [vmem:[%s3010_s7 + $0x198] sm:$0xff] }
  0x97   : > { %5315 = vst [vmem:[#allocation14_spill] sm:$0xff] %v3179_v30  ;;  %5316 = vst [vmem:[#allocation15_spill] sm:$0xff] %v3183_v34  ;;  %v3412_v0 = vld [vmem:[%s3016_s8 + $0x130] sm:$0xff]  ;;  %v3452_v34 = vld [vmem:[%s3010_s7 + $0x188] sm:$0xff] }
  0x98   : > { %5317 = vst [vmem:[#allocation16_spill] sm:$0xff] %v3187_v38  ;;  %5318 = vst [vmem:[#allocation17_spill] sm:$0xff] %v3194_v43  ;;  %v3435_v43 = vld [vmem:[%s3016_s8 + $0x140] sm:$0xff]  ;;  %v3449_v38 = vand.u32 2147483647, %v645_v31  ;;  %v3455_v30 = vld [vmem:[%s3010_s7 + $0x190] sm:$0xff] }
  0x99   : > { %5319 = vst [vmem:[#allocation18_spill] sm:$0xff] %v3203_v48  ;;  %5320 = vst [vmem:[#allocation19_spill] sm:$0xff] %v3215_v54  ;;  %v3429_v54 = vld [vmem:[%s3010_s7 + $0x178] sm:$0xff]  ;;  %v3432_v48 = vld [vmem:[%s3010_s7 + $0x180] sm:$0xff] }
  0x9a   : > { %5321 = vst [vmem:[#allocation20_spill] sm:$0xff] %v3229_v60  ;;  %5322 = vst [vmem:[#allocation21_spill] sm:$0xff] %v3250_v4  ;;  %v3423_v4 = vand.u32 2147483647, %v644_v29  ;;  %v3426_v60 = vld [vmem:[%s3010_s7 + $0x170] sm:$0xff]  ;;  %v3461_v22 = vld [vmem:[%s3016_s8 + $0x158] sm:$0xff] }
  0x9b   : > { %5323 = vst [vmem:[#allocation22_spill] sm:$0xff] %v3271_v12  ;;  %5324 = vst [vmem:[#allocation23_spill] sm:$0xff] %v3293_v20  ;;  %v3406_v20 = vld [vmem:[%s3010_s7 + $0x168] sm:$0xff]  ;;  %v3493_v31 = vld [vmem:[%s3016_s8 + $0x180] sm:$0xff] }
  0x9c   : > { %5325 = vst [vmem:[#allocation24_spill] sm:$0xff] %v3299_v23  ;;  %5326 = vst [vmem:[#allocation25_spill] sm:$0xff] %v3302_v24  ;;  %v3409_v12 = vld [vmem:[%s3016_s8 + $0x128] sm:$0xff]  ;;  %v3478_v24 = vld [vmem:[%s3010_s7 + $0x1a0] sm:$0xff] }
  0x9d   : > { %5327 = vst [vmem:[#allocation26_spill] sm:$0xff] %v3319_v33  ;;  %5328 = vst [vmem:[#allocation27_spill] sm:$0xff] %v3325_v36  ;;  %v3403_v33 = vld [vmem:[%s3010_s7 + $0x160] sm:$0xff]  ;;  %v3467_v29 = vld [vmem:[%s3016_s8 + $0x168] sm:$0xff] }
  0x9e   : > { %5329 = vst [vmem:[#allocation28_spill] sm:$0xff] %v3328_v37  ;;  %5330 = vst [vmem:[#allocation29_spill] sm:$0xff] %v3345_v46  ;;  %v3400_v46 = vld [vmem:[%s3010_s7 + $0x158] sm:$0xff]  ;;  %v3484_v23 = vld [vmem:[%s3010_s7 + $0x1b0] sm:$0xff] }
  0x9f   : > { %5331 = vst [vmem:[#allocation30_spill] sm:$0xff] %v3354_v50  ;;  %5332 = vst [vmem:[#allocation31_spill] sm:$0xff] %v3357_v51  ;;  %v3487_v51 = vld [vmem:[%s3016_s8 + $0x170] sm:$0xff]  ;;  %v3510_v36 = vld [vmem:[%s3010_s7 + $0x1c0] sm:$0xff] }
  0xa0   : > { %5333 = vst [vmem:[#allocation32_spill] sm:$0xff] %v3360_v52  ;;  %5334 = vst [vmem:[#allocation33_spill] sm:$0xff] %v3363_v53  ;;  %v3475_v53 = vand.u32 2147483647, %v646_v32  ;;  %v3481_v52 = vld [vmem:[%s3010_s7 + $0x1a8] sm:$0xff]  ;;  %v3519_v32 = vld [vmem:[%s3016_s8 + $0x190] sm:$0xff] }
  0xa1   : > { %5335 = vst [vmem:[#allocation34_spill] sm:$0xff] %v3371_v1  ;;  %5336 = vst [vmem:[#allocation35_spill] sm:$0xff] %v3380_v45  ;;  %v3397_v1 = vand.u32 2147483647, %v643_v19  ;;  %v3441_v19 = vld [vmem:[%s3016_s8 + $0x150] sm:$0xff]  ;;  %v3539_v50 = vld [vmem:[%s3010_s7 + $0x1d8] sm:$0xff] }
  0xa2   : > { %5337 = vst [vmem:[#allocation36_spill] sm:$0xff] %v3386_v58  ;;  %5338 = vst [vmem:[#allocation37_spill] sm:$0xff] %v3389_v59  ;;  %v5359_v59 = vsub.f32 %v3218_v55, %v3262_v8  ;;  %v3507_v58 = vld [vmem:[%s3010_s7 + $0x1b8] sm:$0xff]  ;;  %v3542_v55 = vld [vmem:[%s3010_s7 + $0x1e0] sm:$0xff] }
  0xa3   : > { %5339 = vst [vmem:[#allocation38_spill] sm:$0xff] %v3397_v1  ;;  %5340 = vst [vmem:[#allocation39_spill] sm:$0xff] %v3406_v20  ;;  %v3464_v1 = vld [vmem:[%s3016_s8 + $0x160] sm:$0xff]  ;;  %v3548_v8 = vld [vmem:[%s3016_s8 + $0x1a8] sm:$0xff] }
  0xa4   : > { %5341 = vst [vmem:[#allocation40_spill] sm:$0xff] %v3409_v12  ;;  %5342 = vst [vmem:[#allocation41_spill] sm:$0xff] %v3412_v0  ;;  %v3504_v37 = vand.u32 2147483647, %v5359_v59  ;;  %v3516_v12 = vld [vmem:[%s3016_s8 + $0x188] sm:$0xff]  ;;  %v3522_v0 = vld [vmem:[%s3016_s8 + $0x198] sm:$0xff]  ;;  %v5371_v59 = vsub.f32 %v3224_v57, %v3268_v10 }
  0xa5   : > { %5343 = vst [vmem:[#allocation42_spill] sm:$0xff] %v3415_v11  ;;  %5344 = vst [vmem:[#allocation43_spill] sm:$0xff] %v3423_v4  ;;  %v3490_v4 = vld [vmem:[%s3016_s8 + $0x178] sm:$0xff]  ;;  %v3536_v11 = vld [vmem:[%s3010_s7 + $0x1d0] sm:$0xff] }
  0xa6   : > { %5345 = vst [vmem:[#allocation44_spill] sm:$0xff] %v3432_v48  ;;  %5346 = vst [vmem:[#allocation45_spill] sm:$0xff] %v3435_v43  ;;  %v3545_v43 = vld [vmem:[%s3016_s8 + $0x1a0] sm:$0xff]  ;;  %v3568_v45 = vld [vmem:[%s3010_s7 + $0x1f0] sm:$0xff] }
  0xa7   : > { %5347 = vst [vmem:[#allocation46_spill] sm:$0xff] %v3438_v42  ;;  %5348 = vst [vmem:[#allocation47_spill] sm:$0xff] %v3441_v19  ;;  %v3551_v42 = vld [vmem:[%s3016_s8 + $0x1b0] sm:$0xff]  ;;  %v3565_v19 = vld [vmem:[%s3010_s7 + $0x1e8] sm:$0xff] }
  0xa8   : > { %5349 = vst [vmem:[#allocation48_spill] sm:$0xff] %v3449_v38  ;;  %5350 = vst [vmem:[#allocation49_spill] sm:$0xff] %v3458_v26  ;;  %v3513_v38 = vld [vmem:[%s3010_s7 + $0x1c8] sm:$0xff]  ;;  %v3600_v57 = vld [vmem:[%s3010_s7 + $0x210] sm:$0xff] }
  0xa9   : > { %5351 = vst [vmem:[#allocation50_spill] sm:$0xff] %v3461_v22  ;;  %5352 = vst [vmem:[#allocation51_spill] sm:$0xff] %v3464_v1  ;;  %v3574_v22 = vld [vmem:[%s3016_s8 + $0x1b8] sm:$0xff]  ;;  %v3580_v1 = vld [vmem:[%s3016_s8 + $0x1c8] sm:$0xff] }
  0xaa   : > { %5353 = vst [vmem:[#allocation52_spill] sm:$0xff] %v3467_v29  ;;  %5354 = vst [vmem:[#allocation53_spill] sm:$0xff] %v3475_v53  ;;  %v5365_v53 = vsub.f32 %v3221_v56, %v3265_v9  ;;  %v3571_v56 = vld [vmem:[%s3010_s7 + $0x1f8] sm:$0xff]  ;;  %v3577_v9 = vld [vmem:[%s3016_s8 + $0x1c0] sm:$0xff] }
  0xab   : > { %5355 = vst [vmem:[#allocation54_spill] sm:$0xff] %v3484_v23  ;;  %5356 = vst [vmem:[#allocation55_spill] sm:$0xff] %v3487_v51  ;;  %v3594_v29 = vld [vmem:[%s3010_s7 + $0x200] sm:$0xff]  ;;  %v3597_v20 = vld [vmem:[%s3010_s7 + $0x208] sm:$0xff] }
  0xac   : > { %5357 = vst [vmem:[#allocation56_spill] sm:$0xff] %v3490_v4  ;;  %5358 = vst [vmem:[#allocation57_spill] sm:$0xff] %v3493_v31  ;;  %v3603_v51 = vld [vmem:[%s3016_s8 + $0x1d0] sm:$0xff]  ;;  %v3606_v10 = vld [vmem:[%s3016_s8 + $0x1d8] sm:$0xff] }
  0xad   : > { %5360 = vst [vmem:[#allocation58_spill] sm:$0xff] %v3504_v37  ;;  %5361 = vst [vmem:[#allocation59_spill] sm:$0xff] %v3513_v38  ;;  %v3533_v37 = vand.u32 2147483647, %v5365_v53  ;;  %v5377_v53 = vsub.f32 %v3232_v61, %v3283_v16  ;;  %v3609_v4 = vld [vmem:[%s3016_s8 + $0x1e0] sm:$0xff]  ;;  %v3623_v31 = vld [vmem:[%s3010_s7 + $0x218] sm:$0xff] }
  0xae   : > { %5362 = vst [vmem:[#allocation60_spill] sm:$0xff] %v3516_v12  ;;  %5363 = vst [vmem:[#allocation61_spill] sm:$0xff] %v3519_v32  ;;  %v3626_v48 = vld [vmem:[%s3010_s7 + $0x220] sm:$0xff]  ;;  %v3629_v61 = vld [vmem:[%s3010_s7 + $0x228] sm:$0xff] }
  0xaf   : > { %5364 = vst [vmem:[#allocation62_spill] sm:$0xff] %v3522_v0  ;;  %5366 = vst [vmem:[#allocation63_spill] sm:$0xff] %v3533_v37  ;;  %v3562_v37 = vand.u32 2147483647, %v5371_v59  ;;  %v5383_v59 = vsub.f32 %v3235_v62, %v3286_v17  ;;  %v3632_v12 = vld [vmem:[%s3016_s8 + $0x1e8] sm:$0xff]  ;;  %v3635_v16 = vld [vmem:[%s3016_s8 + $0x1f0] sm:$0xff] }
  0xb0   : > { %5367 = vst [vmem:[#allocation64_spill] sm:$0xff] %v3542_v55  ;;  %5368 = vst [vmem:[#allocation65_spill] sm:$0xff] %v3545_v43  ;;  %v3638_v32 = vld [vmem:[%s3016_s8 + $0x1f8] sm:$0xff]  ;;  %v3652_v0 = vld [vmem:[%s3010_s7 + $0x230] sm:$0xff] }
  0xb1   : > { %5369 = vst [vmem:[#allocation66_spill] sm:$0xff] %v3548_v8  ;;  %5370 = vst [vmem:[#allocation67_spill] sm:$0xff] %v3551_v42  ;;  %v3655_v26 = vld [vmem:[%s3010_s7 + $0x238] sm:$0xff]  ;;  %v3658_v62 = vld [vmem:[%s3010_s7 + $0x240] sm:$0xff] }
  0xb2   : > { %5372 = vst [vmem:[#allocation68_spill] sm:$0xff] %v3562_v37  ;;  %5373 = vst [vmem:[#allocation69_spill] sm:$0xff] %v3571_v56  ;;  %v3591_v37 = vand.u32 2147483647, %v5377_v53  ;;  %v5389_v53 = vsub.f32 %v3238_v63, %v3289_v18  ;;  %v3661_v43 = vld [vmem:[%s3016_s8 + $0x200] sm:$0xff]  ;;  %v3664_v17 = vld [vmem:[%s3016_s8 + $0x208] sm:$0xff] }
  0xb3   : > { %5374 = vst [vmem:[#allocation70_spill] sm:$0xff] %v3574_v22  ;;  %5375 = vst [vmem:[#allocation71_spill] sm:$0xff] %v3577_v9  ;;  %v3667_v8 = vld [vmem:[%s3016_s8 + $0x210] sm:$0xff]  ;;  %v3681_v42 = vld [vmem:[%s3010_s7 + $0x248] sm:$0xff] }
  0xb4   : > { %5376 = vst [vmem:[#allocation72_spill] sm:$0xff] %v3580_v1  ;;  %5378 = vst [vmem:[#allocation73_spill] sm:$0xff] %v3591_v37  ;;  %v3620_v37 = vand.u32 2147483647, %v5383_v59  ;;  %v5396_v59 = vsub.f32 %v3253_v5, %v3305_v25  ;;  %v3684_v23 = vld [vmem:[%s3010_s7 + $0x250] sm:$0xff]  ;;  %v3687_v63 = vld [vmem:[%s3010_s7 + $0x258] sm:$0xff] }
  0xb5   : > { %5379 = vst [vmem:[#allocation74_spill] sm:$0xff] %v3600_v57  ;;  %5380 = vst [vmem:[#allocation75_spill] sm:$0xff] %v3603_v51  ;;  %v3690_v22 = vld [vmem:[%s3016_s8 + $0x218] sm:$0xff]  ;;  %v3693_v18 = vld [vmem:[%s3016_s8 + $0x220] sm:$0xff] }
  0xb6   : > { %5381 = vst [vmem:[#allocation76_spill] sm:$0xff] %v3606_v10  ;;  %5382 = vst [vmem:[#allocation77_spill] sm:$0xff] %v3609_v4  ;;  %v3696_v9 = vld [vmem:[%s3016_s8 + $0x228] sm:$0xff]  ;;  %v3710_v1 = vld [vmem:[%s3010_s7 + $0x260] sm:$0xff] }
  0xb7   : > { %5384 = vst [vmem:[#allocation78_spill] sm:$0xff] %v3620_v37  ;;  %5385 = vst [vmem:[#allocation79_spill] sm:$0xff] %v3629_v61  ;;  %v3649_v37 = vand.u32 2147483647, %v5389_v53  ;;  %v5404_v53 = vsub.f32 %v3256_v6, %v3308_v27  ;;  %v3713_v38 = vld [vmem:[%s3010_s7 + $0x268] sm:$0xff]  ;;  %v3716_v5 = vld [vmem:[%s3010_s7 + $0x270] sm:$0xff] }
  0xb8   : > { %5386 = vst [vmem:[#allocation80_spill] sm:$0xff] %v3632_v12  ;;  %5387 = vst [vmem:[#allocation81_spill] sm:$0xff] %v3635_v16  ;;  %v3719_v51 = vld [vmem:[%s3016_s8 + $0x230] sm:$0xff]  ;;  %v3722_v25 = vld [vmem:[%s3016_s8 + $0x238] sm:$0xff] }
  0xb9   : > { %5388 = vst [vmem:[#allocation82_spill] sm:$0xff] %v3638_v32  ;;  %5390 = vst [vmem:[#allocation83_spill] sm:$0xff] %v3649_v37  ;;  %v3678_v37 = vand.u32 2147483647, %v5396_v59  ;;  %v3725_v10 = vld [vmem:[%s3016_s8 + $0x240] sm:$0xff]  ;;  %v5412_v59 = vsub.f32 %v3259_v7, %v3311_v28  ;;  %v3739_v4 = vld [vmem:[%s3010_s7 + $0x278] sm:$0xff] }
  0xba   : > { %5391 = vst [vmem:[#allocation84_spill] sm:$0xff] %v3655_v26  ;;  %5392 = vst [vmem:[#allocation85_spill] sm:$0xff] %v3658_v62  ;;  %v3742_v55 = vld [vmem:[%s3010_s7 + $0x280] sm:$0xff]  ;;  %v3745_v6 = vld [vmem:[%s3010_s7 + $0x288] sm:$0xff] }
  0xbb   : > { %5393 = vst [vmem:[#allocation86_spill] sm:$0xff] %v3661_v43  ;;  %5394 = vst [vmem:[#allocation87_spill] sm:$0xff] %v3664_v17  ;;  %v3748_v12 = vld [vmem:[%s3016_s8 + $0x248] sm:$0xff]  ;;  %v3751_v27 = vld [vmem:[%s3016_s8 + $0x250] sm:$0xff] }
  0xbc   : > { %5395 = vst [vmem:[#allocation88_spill] sm:$0xff] %v3667_v8  ;;  %5397 = vst [vmem:[#allocation89_spill] sm:$0xff] %v3678_v37  ;;  %v3707_v37 = vand.u32 2147483647, %v5404_v53  ;;  %v3754_v16 = vld [vmem:[%s3016_s8 + $0x258] sm:$0xff]  ;;  %v5419_v53 = vsub.f32 %v3274_v13, %v3331_v39  ;;  %v3768_v32 = vld [vmem:[%s3010_s7 + $0x290] sm:$0xff] }
  0xbd   : > { %5398 = vst [vmem:[#allocation90_spill] sm:$0xff] %v3681_v42  ;;  %5399 = vst [vmem:[#allocation91_spill] sm:$0xff] %v3684_v23  ;;  %v3771_v56 = vld [vmem:[%s3010_s7 + $0x298] sm:$0xff]  ;;  %v3774_v7 = vld [vmem:[%s3010_s7 + $0x2a0] sm:$0xff] }
  0xbe   : > { %5400 = vst [vmem:[#allocation92_spill] sm:$0xff] %v3687_v63  ;;  %5401 = vst [vmem:[#allocation93_spill] sm:$0xff] %v3690_v22  ;;  %v3777_v43 = vld [vmem:[%s3016_s8 + $0x260] sm:$0xff]  ;;  %v3780_v28 = vld [vmem:[%s3016_s8 + $0x268] sm:$0xff] }
  0xbf   : > { %5402 = vst [vmem:[#allocation94_spill] sm:$0xff] %v3693_v18  ;;  %5403 = vst [vmem:[#allocation95_spill] sm:$0xff] %v3696_v9  ;;  %v3783_v17 = vld [vmem:[%s3016_s8 + $0x270] sm:$0xff]  ;;  %v3797_v8 = vld [vmem:[%s3010_s7 + $0x2a8] sm:$0xff] }
  0xc0   : > { %5405 = vst [vmem:[#allocation96_spill] sm:$0xff] %v3707_v37  ;;  %5406 = vst [vmem:[#allocation97_spill] sm:$0xff] %v3710_v1  ;;  %v3736_v37 = vand.u32 2147483647, %v5412_v59  ;;  %v5427_v59 = vsub.f32 %v3277_v14, %v3334_v40  ;;  %v3800_v57 = vld [vmem:[%s3010_s7 + $0x2b0] sm:$0xff]  ;;  %v3803_v13 = vld [vmem:[%s3010_s7 + $0x2b8] sm:$0xff] }
  0xc1   : > { %5407 = vst [vmem:[#allocation98_spill] sm:$0xff] %v3713_v38  ;;  %5408 = vst [vmem:[#allocation99_spill] sm:$0xff] %v3716_v5  ;;  %v3806_v22 = vld [vmem:[%s3016_s8 + $0x278] sm:$0xff]  ;;  %v3809_v39 = vld [vmem:[%s3016_s8 + $0x280] sm:$0xff] }
  0xc2   : > { %5409 = vst [vmem:[#allocation100_spill] sm:$0xff] %v3719_v51  ;;  %5410 = vst [vmem:[#allocation101_spill] sm:$0xff] %v3722_v25  ;;  %v3812_v18 = vld [vmem:[%s3016_s8 + $0x288] sm:$0xff]  ;;  %v3826_v9 = vld [vmem:[%s3010_s7 + $0x2c0] sm:$0xff] }
  0xc3   : > { %5411 = vst [vmem:[#allocation102_spill] sm:$0xff] %v3725_v10  ;;  %5413 = vst [vmem:[#allocation103_spill] sm:$0xff] %v3736_v37  ;;  %v3765_v37 = vand.u32 2147483647, %v5419_v53  ;;  %v5433_v53 = vsub.f32 %v3280_v15, %v3337_v41  ;;  %v3829_v61 = vld [vmem:[%s3010_s7 + $0x2c8] sm:$0xff]  ;;  %v3832_v14 = vld [vmem:[%s3010_s7 + $0x2d0] sm:$0xff] }
  0xc4   : > { %5414 = vst [vmem:[#allocation104_spill] sm:$0xff] %v3742_v55  ;;  %5415 = vst [vmem:[#allocation105_spill] sm:$0xff] %v3745_v6  ;;  %v3835_v51 = vld [vmem:[%s3016_s8 + $0x290] sm:$0xff]  ;;  %v3838_v40 = vld [vmem:[%s3016_s8 + $0x298] sm:$0xff] }
  0xc5   : > { %5416 = vst [vmem:[#allocation106_spill] sm:$0xff] %v3748_v12  ;;  %5417 = vst [vmem:[#allocation107_spill] sm:$0xff] %v3751_v27  ;;  %v3841_v25 = vld [vmem:[%s3016_s8 + $0x2a0] sm:$0xff]  ;;  %v3855_v62 = vld [vmem:[%s3010_s7 + $0x2d8] sm:$0xff] }
  0xc6   : > { %5418 = vst [vmem:[#allocation108_spill] sm:$0xff] %v3754_v16  ;;  %5420 = vst [vmem:[#allocation109_spill] sm:$0xff] %v3765_v37  ;;  %v3794_v37 = vand.u32 2147483647, %v5427_v59  ;;  %v5438_v59 = vld [vmem:[#allocation31_spill] sm:$0xff]  ;;  %v3858_v26 = vld [vmem:[%s3010_s7 + $0x2e0] sm:$0xff] }
  0xc7   : > { %5421 = vst [vmem:[#allocation110_spill] sm:$0xff] %v3768_v32  ;;  %5422 = vst [vmem:[#allocation111_spill] sm:$0xff] %v3771_v56  ;;  %v3861_v15 = vld [vmem:[%s3010_s7 + $0x2e8] sm:$0xff]  ;;  %v3867_v41 = vld [vmem:[%s3016_s8 + $0x2b0] sm:$0xff] }
  0xc8   : > { %5423 = vst [vmem:[#allocation112_spill] sm:$0xff] %v3774_v7  ;;  %5424 = vst [vmem:[#allocation113_spill] sm:$0xff] %v3777_v43  ;;  %v3864_v12 = vld [vmem:[%s3016_s8 + $0x2a8] sm:$0xff]  ;;  %v3870_v27 = vld [vmem:[%s3016_s8 + $0x2b8] sm:$0xff] }
  0xc9   : > { %5425 = vst [vmem:[#allocation114_spill] sm:$0xff] %v3780_v28  ;;  %5426 = vst [vmem:[#allocation115_spill] sm:$0xff] %v3783_v17  ;;  %v3884_v23 = vld [vmem:[%s3010_s7 + $0x2f0] sm:$0xff]  ;;  %v3887_v42 = vld [vmem:[%s3010_s7 + $0x2f8] sm:$0xff] }
  0xca   : > { %5428 = vst [vmem:[#allocation116_spill] sm:$0xff] %v3794_v37  ;;  %5429 = vst [vmem:[#allocation117_spill] sm:$0xff] %v3803_v13  ;;  %v3823_v37 = vand.u32 2147483647, %v5433_v53  ;;  %v5444_v53 = vld [vmem:[#allocation24_spill] sm:$0xff]  ;;  %v3893_v43 = vld [vmem:[%s3016_s8 + $0x2c0] sm:$0xff] }
  0xcb   : > { %5430 = vst [vmem:[#allocation118_spill] sm:$0xff] %v3806_v22  ;;  %5431 = vst [vmem:[#allocation119_spill] sm:$0xff] %v3809_v39  ;;  %v3899_v28 = vld [vmem:[%s3016_s8 + $0x2d0] sm:$0xff]  ;;  %v3913_v38 = vld [vmem:[%s3010_s7 + $0x308] sm:$0xff] }
  0xcc   : > { %5432 = vst [vmem:[#allocation120_spill] sm:$0xff] %v3812_v18  ;;  %5434 = vst [vmem:[#allocation121_spill] sm:$0xff] %v3823_v37  ;;  %v5439_v37 = vsub.f32 %v3296_v21, %v5438_v59  ;;  %v3890_v21 = vld [vmem:[%s3010_s7 + $0x300] sm:$0xff]  ;;  %v5450_v59 = vld [vmem:[#allocation25_spill] sm:$0xff] }
  0xcd   : > { %5435 = vst [vmem:[#allocation122_spill] sm:$0xff] %v3835_v51  ;;  %5436 = vst [vmem:[#allocation123_spill] sm:$0xff] %v3838_v40  ;;  %v3916_v1 = vld [vmem:[%s3010_s7 + $0x310] sm:$0xff]  ;;  %v3922_v22 = vld [vmem:[%s3016_s8 + $0x2d8] sm:$0xff] }
  0xce   : > { %5437 = vst [vmem:[#allocation124_spill] sm:$0xff] %v3841_v25  ;;  %v3852_v10 = vand.u32 2147483647, %v5439_v37  ;;  %5441 = vst [vmem:[#allocation125_spill] sm:$0xff] %v3861_v15  ;;  %v3896_v37 = vld [vmem:[%s3016_s8 + $0x2c8] sm:$0xff]  ;;  %v3942_v18 = vld [vmem:[%s3010_s7 + $0x320] sm:$0xff] }
  0xcf   : > { %5442 = vst [vmem:[#allocation126_spill] sm:$0xff] %v3867_v41  ;;  %5443 = vst [vmem:[#allocation127_spill] sm:$0xff] %v3870_v27  ;;  %v3928_v39 = vld [vmem:[%s3016_s8 + $0x2e8] sm:$0xff]  ;;  %v3948_v55 = vld [vmem:[%s3010_s7 + $0x330] sm:$0xff] }
  0xd0   : > { %5440 = vst [vmem:[#allocation31_spill] sm:$0xff] %v3852_v10  ;;  %v5445_v10 = vld [vmem:[#allocation32_spill] sm:$0xff]  ;;  %5449 = vst [vmem:[#allocation128_spill] sm:$0xff] %v3899_v28  ;;  %v3945_v6 = vld [vmem:[%s3010_s7 + $0x328] sm:$0xff] }
  0xd1   : > { %v5446_v16 = vsub.f32 %v5444_v53, %v5445_v10  ;;  %5448 = vst [vmem:[#allocation32_spill] sm:$0xff] %v3890_v21  ;;  %v3919_v10 = vld [vmem:[%s3010_s7 + $0x318] sm:$0xff]  ;;  %5456 = vst [vmem:[#allocation130_spill] sm:$0xff] %v3928_v39  ;;  %v5457_v53 = vsub.f32 %v3322_v35, %v3383_v44  ;;  %v3957_v40 = vld [vmem:[%s3016_s8 + $0x300] sm:$0xff] }
  0xd2   : > { %5459 = vst [vmem:[#allocation132_spill] sm:$0xff] %v3942_v18  ;;  %5460 = vst [vmem:[#allocation133_spill] sm:$0xff] %v3948_v55  ;;  %v3971_v56 = vld [vmem:[%s3016_s8 + $0x308] sm:$0xff]  ;;  %v3974_v51 = vld [vmem:[%s3016_s8 + $0x310] sm:$0xff] }
  0xd3   : > { %v3881_v63 = vand.u32 2147483647, %v5446_v16  ;;  %v3925_v16 = vld [vmem:[%s3016_s8 + $0x2e0] sm:$0xff]  ;;  %5462 = vst [vmem:[#allocation135_spill] sm:$0xff] %v3957_v40  ;;  %v3977_v32 = vld [vmem:[%s3016_s8 + $0x318] sm:$0xff]  ;;  %v3994_v13 = vld [vmem:[%s3016_s8 + $0x328] sm:$0xff] }
  0xd4   : > { %5455 = vst [vmem:[#allocation129_spill] sm:$0xff] %v3925_v16  ;;  %v3991_v27 = vld [vmem:[%s3016_s8 + $0x320] sm:$0xff]  ;;  %5473 = vst [vmem:[#allocation136_spill] sm:$0xff] %v3994_v13  ;;  %v3997_v41 = vld [vmem:[%s3016_s8 + $0x330] sm:$0xff] }
  0xd5   : > { %5447 = vst [vmem:[#allocation24_spill] sm:$0xff] %v3881_v63  ;;  %v5451_v63 = vld [vmem:[#allocation33_spill] sm:$0xff]  ;;  %5474 = vst [vmem:[#allocation137_spill] sm:$0xff] %v3997_v41  ;;  %v4014_v28 = vld [vmem:[%s3010_s7 + $0x340] sm:$0xff] }
  0xd6   : > { %v5452_v17 = vsub.f32 %v5450_v59, %v5451_v63  ;;  %5454 = vst [vmem:[#allocation33_spill] sm:$0xff] %v3919_v10  ;;  %v3951_v63 = vld [vmem:[%s3016_s8 + $0x2f0] sm:$0xff]  ;;  %v5463_v59 = vld [vmem:[#allocation27_spill] sm:$0xff]  ;;  %v4037_v16 = vld [vmem:[%s3016_s8 + $0x340] sm:$0xff] }
  0xd7   : > { %v4031_v39 = vld [vmem:[%s3010_s7 + $0x348] sm:$0xff]  ;;  %v4034_v15 = vld [vmem:[%s3010_s7 + $0x350] sm:$0xff]  ;;  %v4051_v40 = vld [vmem:[%s3010_s7 + $0x358] sm:$0xff] }
  0xd8   : > { %v3910_v5 = vand.u32 2147483647, %v5452_v17  ;;  %v3954_v17 = vld [vmem:[%s3016_s8 + $0x2f8] sm:$0xff]  ;;  %v4054_v21 = vld [vmem:[%s3016_s8 + $0x348] sm:$0xff]  ;;  %v4077_v10 = vld [vmem:[%s3016_s8 + $0x360] sm:$0xff] }
  0xd9   : > { %5461 = vst [vmem:[#allocation134_spill] sm:$0xff] %v3954_v17  ;;  %v4057_v17 = vld [vmem:[%s3016_s8 + $0x350] sm:$0xff]  ;;  %v5491_v13 = vld [vmem:[#allocation35_spill] sm:$0xff] }
  0xda   : > { %5453 = vst [vmem:[#allocation25_spill] sm:$0xff] %v3910_v5  ;;  %v3939_v5 = vand.u32 2147483647, %v5457_v53  ;;  %v4017_v53 = vld [vmem:[%s3016_s8 + $0x338] sm:$0xff]  ;;  %v4097_v55 = vld [vmem:[%s3010_s7 + $0x368] sm:$0xff] }
  0xdc   : > { %5458 = vst [vmem:[#allocation131_spill] sm:$0xff] %v3939_v5  ;;  %v5464_v5 = vld [vmem:[#allocation36_spill] sm:$0xff] }
  0xdd   : > { %v5465_v25 = vsub.f32 %v5463_v59, %v5464_v5  ;;  %5467 = vst [vmem:[#allocation36_spill] sm:$0xff] %v3977_v32  ;;  %v5468_v59 = vld [vmem:[#allocation28_spill] sm:$0xff]  ;;  %v4060_v5 = vld [vmem:[%s3016_s8 + $0x358] sm:$0xff]  ;;  %v4074_v32 = vld [vmem:[%s3010_s7 + $0x360] sm:$0xff] }
  0xdf   : > { %v3968_v7 = vand.u32 2147483647, %v5465_v25  ;;  %v5469_v25 = vld [vmem:[#allocation37_spill] sm:$0xff] }
  0xe0   : > { %v5470_v35 = vsub.f32 %v5468_v59, %v5469_v25  ;;  %5472 = vst [vmem:[#allocation37_spill] sm:$0xff] %v3991_v27  ;;  %v5488_v27 = vld [vmem:[#allocation46_spill] sm:$0xff]  ;;  %v4100_v59 = vld [vmem:[%s3016_s8 + $0x368] sm:$0xff] }
  0xe1   : > { %5466 = vst [vmem:[#allocation27_spill] sm:$0xff] %v3968_v7  ;;  %v5489_v18 = vsub.f32 %v3377_v3, %v5488_v27  ;;  %v4123_v3 = vld [vmem:[%s3016_s8 + $0x370] sm:$0xff] }
  0xe2   : > { %v3988_v7 = vand.u32 2147483647, %v5470_v35  ;;  %v5475_v35 = vld [vmem:[#allocation40_spill] sm:$0xff] }
  0xe3   : > { %v5476_v25 = vsub.f32 %v3348_v47, %v5475_v35  ;;  %v5478_v35 = vld [vmem:[#allocation41_spill] sm:$0xff]  ;;  %v4084_v47 = vand.u32 2147483647, %v5489_v18  ;;  %v5498_v18 = vld [vmem:[#allocation51_spill] sm:$0xff] }
  0xe4   : > { %5471 = vst [vmem:[#allocation28_spill] sm:$0xff] %v3988_v7  ;;  %v4011_v7 = vld [vmem:[%s3010_s7 + $0x338] sm:$0xff]  ;;  %v5499_v27 = vsub.f32 %v3403_v33, %v5498_v18  ;;  %v5508_v18 = vld [vmem:[#allocation56_spill] sm:$0xff] }
  0xe5   : > { %v4008_v44 = vand.u32 2147483647, %v5476_v25  ;;  %v5479_v25 = vsub.f32 %v3351_v49, %v5478_v35  ;;  %v5481_v49 = vld [vmem:[#allocation30_spill] sm:$0xff]  ;;  %v4146_v33 = vld [vmem:[%s3016_s8 + $0x378] sm:$0xff] }
  0xe6   : > { %v5482_v35 = vld [vmem:[#allocation42_spill] sm:$0xff] }
  0xe7   : > { %5477 = vst [vmem:[#allocation40_spill] sm:$0xff] %v4008_v44  ;;  %v4028_v44 = vand.u32 2147483647, %v5479_v25  ;;  %v5483_v25 = vsub.f32 %v5481_v49, %v5482_v35  ;;  %v5485_v35 = vld [vmem:[#allocation45_spill] sm:$0xff]  ;;  %v5492_v49 = vld [vmem:[#allocation47_spill] sm:$0xff] }
  0xe8   : > { %5490 = vst [vmem:[#allocation45_spill] sm:$0xff] %v4084_v47  ;;  %v5493_v41 = vsub.f32 %v5491_v13, %v5492_v49  ;;  %v4107_v13 = vand.u32 2147483647, %v5499_v27  ;;  %v5502_v49 = vld [vmem:[#allocation52_spill] sm:$0xff]  ;;  %v5509_v27 = vsub.f32 %v3429_v54, %v5508_v18  ;;  %v5518_v18 = vld [vmem:[#allocation61_spill] sm:$0xff]  ;;  %v4169_v54 = vld [vmem:[%s3016_s8 + $0x380] sm:$0xff] }
  0xe9   : > { %5480 = vst [vmem:[#allocation41_spill] sm:$0xff] %v4028_v44  ;;  %v4048_v44 = vand.u32 2147483647, %v5483_v25  ;;  %v5486_v25 = vsub.f32 %v3374_v2, %v5485_v35  ;;  %v5495_v35 = vld [vmem:[#allocation50_spill] sm:$0xff]  ;;  %v4120_v47 = vld [vmem:[%s3010_s7 + $0x370] sm:$0xff]  ;;  %5529 = vst [vmem:[#allocation61_spill] sm:$0xff] %v4169_v54 }
  0xea   : > { %v4089_v2 = vand.u32 2147483647, %v5493_v41  ;;  %5500 = vst [vmem:[#allocation47_spill] sm:$0xff] %v4107_v13  ;;  %v5501_v41 = vld [vmem:[#allocation39_spill] sm:$0xff]  ;;  %v4143_v13 = vld [vmem:[%s3010_s7 + $0x378] sm:$0xff] }
  0xeb   : > { %5484 = vst [vmem:[#allocation30_spill] sm:$0xff] %v4048_v44  ;;  %v4071_v44 = vand.u32 2147483647, %v5486_v25  ;;  %v5496_v25 = vsub.f32 %v3400_v46, %v5495_v35  ;;  %v5505_v35 = vld [vmem:[#allocation55_spill] sm:$0xff] }
  0xec   : > { %5494 = vst [vmem:[#allocation46_spill] sm:$0xff] %v4089_v2  ;;  %v5503_v2 = vsub.f32 %v5501_v41, %v5502_v49  ;;  %v4130_v41 = vand.u32 2147483647, %v5509_v27  ;;  %v5512_v49 = vld [vmem:[#allocation57_spill] sm:$0xff]  ;;  %v5519_v27 = vsub.f32 %v3455_v30, %v5518_v18  ;;  %v5530_v18 = vld [vmem:[#allocation66_spill] sm:$0xff]  ;;  %v4192_v30 = vld [vmem:[%s3016_s8 + $0x388] sm:$0xff] }
  0xed   : > { %5487 = vst [vmem:[#allocation42_spill] sm:$0xff] %v4071_v44  ;;  %v4094_v44 = vand.u32 2147483647, %v5496_v25  ;;  %v5506_v25 = vsub.f32 %v3426_v60, %v5505_v35  ;;  %v5515_v35 = vld [vmem:[#allocation60_spill] sm:$0xff] }
  0xee   : > { %v4112_v46 = vand.u32 2147483647, %v5503_v2  ;;  %5510 = vst [vmem:[#allocation39_spill] sm:$0xff] %v4130_v41  ;;  %v5511_v2 = vld [vmem:[#allocation44_spill] sm:$0xff]  ;;  %v4166_v41 = vld [vmem:[%s3010_s7 + $0x380] sm:$0xff] }
  0xef   : > { %5497 = vst [vmem:[#allocation35_spill] sm:$0xff] %v4094_v44  ;;  %v4117_v44 = vand.u32 2147483647, %v5506_v25  ;;  %v5516_v25 = vsub.f32 %v3452_v34, %v5515_v35  ;;  %v5525_v35 = vld [vmem:[#allocation65_spill] sm:$0xff]  ;;  %5528 = vst [vmem:[#allocation60_spill] sm:$0xff] %v4166_v41 }
  0xf0   : > { %5504 = vst [vmem:[#allocation50_spill] sm:$0xff] %v4112_v46  ;;  %v5513_v46 = vsub.f32 %v5511_v2, %v5512_v49  ;;  %v4153_v2 = vand.u32 2147483647, %v5519_v27  ;;  %v5522_v49 = vld [vmem:[#allocation62_spill] sm:$0xff]  ;;  %v5531_v27 = vsub.f32 %v3481_v52, %v5530_v18  ;;  %v5542_v18 = vld [vmem:[#allocation71_spill] sm:$0xff]  ;;  %v4215_v52 = vld [vmem:[%s3016_s8 + $0x390] sm:$0xff] }
  0xf1   : > { %5507 = vst [vmem:[#allocation51_spill] sm:$0xff] %v4117_v44  ;;  %v4140_v44 = vand.u32 2147483647, %v5516_v25  ;;  %v5526_v25 = vsub.f32 %v3478_v24, %v5525_v35  ;;  %v5537_v35 = vld [vmem:[#allocation70_spill] sm:$0xff]  ;;  %v4327_v41 = vld [vmem:[%s3010_s7 + $0x3b8] sm:$0xff] }
  0xf2   : > { %v4135_v60 = vand.u32 2147483647, %v5513_v46  ;;  %5520 = vst [vmem:[#allocation56_spill] sm:$0xff] %v4153_v2  ;;  %v5521_v46 = vld [vmem:[#allocation49_spill] sm:$0xff]  ;;  %v4189_v2 = vld [vmem:[%s3010_s7 + $0x388] sm:$0xff] }
  0xf3   : > { %5517 = vst [vmem:[#allocation55_spill] sm:$0xff] %v4140_v44  ;;  %v4163_v44 = vand.u32 2147483647, %v5526_v25  ;;  %v5538_v25 = vsub.f32 %v3507_v58, %v5537_v35  ;;  %5540 = vst [vmem:[#allocation66_spill] sm:$0xff] %v4189_v2  ;;  %v5549_v35 = vld [vmem:[#allocation75_spill] sm:$0xff]  ;;  %v4350_v2 = vld [vmem:[%s3010_s7 + $0x3c0] sm:$0xff] }
  0xf4   : > { %5514 = vst [vmem:[#allocation52_spill] sm:$0xff] %v4135_v60  ;;  %v5523_v60 = vsub.f32 %v5521_v46, %v5522_v49  ;;  %v4176_v46 = vand.u32 2147483647, %v5531_v27  ;;  %v5534_v49 = vld [vmem:[#allocation67_spill] sm:$0xff]  ;;  %v5543_v27 = vsub.f32 %v3510_v36, %v5542_v18  ;;  %v5554_v18 = vld [vmem:[#allocation76_spill] sm:$0xff]  ;;  %v4238_v36 = vld [vmem:[%s3016_s8 + $0x398] sm:$0xff] }
  0xf5   : > { %5527 = vst [vmem:[#allocation57_spill] sm:$0xff] %v4163_v44  ;;  %v4186_v44 = vand.u32 2147483647, %v5538_v25  ;;  %v5550_v25 = vsub.f32 %v3536_v11, %v5549_v35  ;;  %v5561_v35 = vld [vmem:[#allocation80_spill] sm:$0xff] }
  0xf6   : > { %v4158_v34 = vand.u32 2147483647, %v5523_v60  ;;  %5532 = vst [vmem:[#allocation49_spill] sm:$0xff] %v4176_v46  ;;  %v5533_v60 = vld [vmem:[#allocation54_spill] sm:$0xff]  ;;  %v4212_v46 = vld [vmem:[%s3010_s7 + $0x390] sm:$0xff]  ;;  %5565 = vst [vmem:[#allocation80_spill] sm:$0xff] %v4238_v36 }
  0xf7   : > { %5539 = vst [vmem:[#allocation65_spill] sm:$0xff] %v4186_v44  ;;  %5541 = vst [vmem:[#allocation54_spill] sm:$0xff] %v4192_v30  ;;  %v4209_v44 = vand.u32 2147483647, %v5550_v25  ;;  %v5562_v25 = vsub.f32 %v3565_v19, %v5561_v35  ;;  %v5573_v35 = vld [vmem:[#allocation86_spill] sm:$0xff] }
  0xf8   : > { %5524 = vst [vmem:[#allocation44_spill] sm:$0xff] %v4158_v34  ;;  %v5535_v34 = vsub.f32 %v5533_v60, %v5534_v49  ;;  %v4199_v60 = vand.u32 2147483647, %v5543_v27  ;;  %v5546_v49 = vld [vmem:[#allocation72_spill] sm:$0xff]  ;;  %v5555_v27 = vsub.f32 %v3539_v50, %v5554_v18  ;;  %v5566_v18 = vld [vmem:[#allocation81_spill] sm:$0xff]  ;;  %v4261_v50 = vld [vmem:[%s3016_s8 + $0x3a0] sm:$0xff] }
  0xf9   : > { %5551 = vst [vmem:[#allocation71_spill] sm:$0xff] %v4209_v44  ;;  %5553 = vst [vmem:[#allocation72_spill] sm:$0xff] %v4215_v52  ;;  %v4232_v44 = vand.u32 2147483647, %v5562_v25  ;;  %v5574_v25 = vsub.f32 %v3594_v29, %v5573_v35  ;;  %v5583_v35 = vld [vmem:[#allocation93_spill] sm:$0xff]  ;;  %v4373_v52 = vld [vmem:[%s3010_s7 + $0x3c8] sm:$0xff] }
  0xfa   : > { %v4181_v24 = vand.u32 2147483647, %v5535_v34  ;;  %5544 = vst [vmem:[#allocation67_spill] sm:$0xff] %v4199_v60  ;;  %v5545_v34 = vld [vmem:[#allocation59_spill] sm:$0xff]  ;;  %v4235_v60 = vld [vmem:[%s3010_s7 + $0x398] sm:$0xff] }
  0xfb   : > { %5552 = vst [vmem:[#allocation59_spill] sm:$0xff] %v4212_v46  ;;  %v622_v46 = vld [vmem:[%s3016_s8 + $0x3d0] sm:$0xff] }
  0xfc   : > { %5536 = vst [vmem:[#allocation62_spill] sm:$0xff] %v4181_v24  ;;  %v5547_v24 = vsub.f32 %v5545_v34, %v5546_v49  ;;  %v4222_v34 = vand.u32 2147483647, %v5555_v27  ;;  %v5558_v49 = vld [vmem:[#allocation77_spill] sm:$0xff]  ;;  %v5567_v27 = vsub.f32 %v3568_v45, %v5566_v18  ;;  %v5576_v18 = vld [vmem:[#allocation87_spill] sm:$0xff] }
  0xfd   : > { %5564 = vst [vmem:[#allocation77_spill] sm:$0xff] %v4235_v60  ;;  %v4284_v45 = vld [vmem:[%s3016_s8 + $0x3a8] sm:$0xff]  ;;  %v494_v60 = vld [vmem:[%s3010_s7 + $0x3d0] sm:$0xff] }
  0xfe   : > { %v4204_v58 = vand.u32 2147483647, %v5547_v24  ;;  %5556 = vst [vmem:[#allocation75_spill] sm:$0xff] %v4222_v34  ;;  %v5557_v24 = vld [vmem:[#allocation64_spill] sm:$0xff]  ;;  %v4258_v34 = vld [vmem:[%s3010_s7 + $0x3a0] sm:$0xff] }
  0xff   : > { %5563 = vst [vmem:[#allocation64_spill] sm:$0xff] %v4232_v44  ;;  %v4255_v44 = vand.u32 2147483647, %v5574_v25  ;;  %v5584_v25 = vsub.f32 %v3623_v31, %v5583_v35  ;;  %v5593_v35 = vld [vmem:[#allocation100_spill] sm:$0xff] }
 0x100   : > { %5548 = vst [vmem:[#allocation70_spill] sm:$0xff] %v4204_v58  ;;  %v5559_v58 = vsub.f32 %v5557_v24, %v5558_v49  ;;  %v4245_v24 = vand.u32 2147483647, %v5567_v27  ;;  %v5570_v49 = vld [vmem:[#allocation82_spill] sm:$0xff]  ;;  %v5577_v27 = vsub.f32 %v3597_v20, %v5576_v18  ;;  %v4307_v20 = vld [vmem:[%s3016_s8 + $0x3b0] sm:$0xff] }
 0x101   : > { %5575 = vst [vmem:[#allocation82_spill] sm:$0xff] %v4255_v44  ;;  %v4278_v44 = vand.u32 2147483647, %v5584_v25  ;;  %v5586_v18 = vld [vmem:[#allocation94_spill] sm:$0xff]  ;;  %v5594_v25 = vsub.f32 %v3652_v0, %v5593_v35 }
 0x102   : > { %v4227_v11 = vand.u32 2147483647, %v5559_v58  ;;  %5568 = vst [vmem:[#allocation81_spill] sm:$0xff] %v4245_v24  ;;  %v5569_v58 = vld [vmem:[#allocation69_spill] sm:$0xff]  ;;  %v4281_v24 = vld [vmem:[%s3010_s7 + $0x3a8] sm:$0xff]  ;;  %v5604_v35 = vld [vmem:[#allocation90_spill] sm:$0xff] }
 0x104   : > { %5560 = vst [vmem:[#allocation76_spill] sm:$0xff] %v4227_v11  ;;  %v5571_v11 = vsub.f32 %v5569_v58, %v5570_v49  ;;  %v4268_v58 = vand.u32 2147483647, %v5577_v27  ;;  %v5580_v49 = vld [vmem:[#allocation88_spill] sm:$0xff]  ;;  %v5587_v27 = vsub.f32 %v3626_v48, %v5586_v18  ;;  %v4330_v48 = vld [vmem:[%s3016_s8 + $0x3b8] sm:$0xff] }
 0x105   : > { %v5596_v18 = vld [vmem:[#allocation84_spill] sm:$0xff] }
 0x106   : > { %v4250_v19 = vand.u32 2147483647, %v5571_v11  ;;  %5578 = vst [vmem:[#allocation86_spill] sm:$0xff] %v4268_v58  ;;  %v5579_v11 = vld [vmem:[#allocation74_spill] sm:$0xff]  ;;  %v4304_v58 = vld [vmem:[%s3010_s7 + $0x3b0] sm:$0xff] }
 0x107   : > { %5585 = vst [vmem:[#allocation74_spill] sm:$0xff] %v4278_v44  ;;  %v4301_v44 = vand.u32 2147483647, %v5594_v25  ;;  %v5605_v25 = vld [vmem:[#allocation106_spill] sm:$0xff] }
 0x108   : > { %5572 = vst [vmem:[#allocation69_spill] sm:$0xff] %v4250_v19  ;;  %v5581_v19 = vsub.f32 %v5579_v11, %v5580_v49  ;;  %v4291_v11 = vand.u32 2147483647, %v5587_v27  ;;  %v5590_v49 = vld [vmem:[#allocation95_spill] sm:$0xff]  ;;  %v5597_v27 = vld [vmem:[#allocation101_spill] sm:$0xff] }
 0x109   : > { %5595 = vst [vmem:[#allocation94_spill] sm:$0xff] %v4301_v44  ;;  %v5606_v44 = vsub.f32 %v5604_v35, %v5605_v25  ;;  %v5617_v25 = vld [vmem:[#allocation113_spill] sm:$0xff] }
 0x10a   : > { %v4273_v29 = vand.u32 2147483647, %v5581_v19  ;;  %5588 = vst [vmem:[#allocation88_spill] sm:$0xff] %v4291_v11  ;;  %v5589_v19 = vld [vmem:[#allocation79_spill] sm:$0xff]  ;;  %v5598_v11 = vsub.f32 %v5596_v18, %v5597_v27  ;;  %v4353_v18 = vld [vmem:[%s3016_s8 + $0x3c0] sm:$0xff] }
 0x10b   : > { %v4324_v54 = vand.u32 2147483647, %v5606_v44  ;;  %v5609_v27 = vld [vmem:[#allocation107_spill] sm:$0xff]  ;;  %v5616_v44 = vld [vmem:[#allocation97_spill] sm:$0xff] }
 0x10c   : > { %5582 = vst [vmem:[#allocation87_spill] sm:$0xff] %v4273_v29  ;;  %v5591_v29 = vsub.f32 %v5589_v19, %v5590_v49  ;;  %v4314_v19 = vand.u32 2147483647, %v5598_v11  ;;  %v5601_v49 = vld [vmem:[#allocation102_spill] sm:$0xff]  ;;  %v5608_v11 = vld [vmem:[#allocation91_spill] sm:$0xff] }
 0x10d   : > { %5607 = vst [vmem:[#allocation100_spill] sm:$0xff] %v4324_v54  ;;  %v5618_v54 = vsub.f32 %v5616_v44, %v5617_v25 }
 0x10e   : > { %v4296_v31 = vand.u32 2147483647, %v5591_v29  ;;  %5599 = vst [vmem:[#allocation79_spill] sm:$0xff] %v4314_v19  ;;  %v5600_v29 = vld [vmem:[#allocation85_spill] sm:$0xff]  ;;  %v5610_v19 = vsub.f32 %v5608_v11, %v5609_v27  ;;  %v5621_v27 = vld [vmem:[#allocation114_spill] sm:$0xff]  ;;  %v4376_v11 = vld [vmem:[%s3016_s8 + $0x3c8] sm:$0xff] }
 0x10f   : > { %v4347_v30 = vand.u32 2147483647, %v5618_v54  ;;  %v5628_v54 = vld [vmem:[#allocation118_spill] sm:$0xff] }
 0x110   : > { %5592 = vst [vmem:[#allocation93_spill] sm:$0xff] %v4296_v31  ;;  %v5602_v31 = vsub.f32 %v5600_v29, %v5601_v49  ;;  %v4337_v29 = vand.u32 2147483647, %v5610_v19  ;;  %v5613_v49 = vld [vmem:[#allocation108_spill] sm:$0xff]  ;;  %v5620_v19 = vld [vmem:[#allocation98_spill] sm:$0xff]  ;;  %v5629_v25 = vsub.f32 %v3739_v4, %v5628_v54 }
 0x111   : > { %5619 = vst [vmem:[#allocation85_spill] sm:$0xff] %v4347_v30  ;;  %v5638_v54 = vld [vmem:[#allocation110_spill] sm:$0xff] }
 0x112   : > { %v4319_v0 = vand.u32 2147483647, %v5602_v31  ;;  %5611 = vst [vmem:[#allocation84_spill] sm:$0xff] %v4337_v29  ;;  %v5612_v31 = vld [vmem:[#allocation92_spill] sm:$0xff]  ;;  %v5622_v29 = vsub.f32 %v5620_v19, %v5621_v27  ;;  %v4370_v30 = vand.u32 2147483647, %v5629_v25  ;;  %v744_v19 = vsub.f32 %v4258_v34, %v4261_v50 }
 0x113   : > { %v5632_v27 = vld [vmem:[#allocation119_spill] sm:$0xff]  ;;  %v5639_v25 = vld [vmem:[#allocation122_spill] sm:$0xff]  ;;  %v745_v34 = vsub.f32 %v4281_v24, %v4284_v45  ;;  %v746_v24 = vsub.f32 %v4304_v58, %v4307_v20  ;;  %v747_v58 = vsub.f32 %v4327_v41, %v4330_v48  ;;  %v748_v41 = vsub.f32 %v4350_v2, %v4353_v18 }
 0x114   : > { %5603 = vst [vmem:[#allocation95_spill] sm:$0xff] %v4319_v0  ;;  %v5614_v0 = vsub.f32 %v5612_v31, %v5613_v49  ;;  %v4360_v31 = vand.u32 2147483647, %v5622_v29  ;;  %v5625_v49 = vld [vmem:[#allocation115_spill] sm:$0xff]  ;;  %5630 = vst [vmem:[#allocation106_spill] sm:$0xff] %v4370_v30  ;;  %v5631_v29 = vld [vmem:[#allocation104_spill] sm:$0xff]  ;;  %v5640_v30 = vsub.f32 %v5638_v54, %v5639_v25  ;;  %v749_v2 = vsub.f32 %v4373_v52, %v4376_v11 }
 0x115   : > { %v5642_v50 = vld [vmem:[#allocation111_spill] sm:$0xff]  ;;  %v495_v25 = vld [vmem:[%s3010_s7 + $0x3d8] sm:$0xff]  ;;  %v5650_v45 = vld [vmem:[#allocation126_spill] sm:$0xff]  ;;  %v5676_v52 = vsub.f32 %v3916_v1, %v3974_v51 }
 0x116   : > { %v4342_v35 = vand.u32 2147483647, %v5614_v0  ;;  %5623 = vst [vmem:[#allocation102_spill] sm:$0xff] %v4360_v31  ;;  %v5624_v0 = vld [vmem:[#allocation99_spill] sm:$0xff]  ;;  %v5633_v31 = vsub.f32 %v5631_v29, %v5632_v27  ;;  %v4393_v36 = vand.u32 2147483647, %v5640_v30  ;;  %v5648_v30 = vsub.f32 %v3797_v8, %v3864_v12 }
 0x117   : > { %v5643_v29 = vld [vmem:[#allocation123_spill] sm:$0xff]  ;;  %v5655_v12 = vsub.f32 %v3826_v9, %v3893_v43  ;;  %v5659_v43 = vsub.f32 %v3855_v62, %v3922_v22  ;;  %v5666_v22 = vsub.f32 %v3884_v23, %v3951_v63  ;;  %v5668_v18 = vld [vmem:[#allocation134_spill] sm:$0xff]  ;;  %v5675_v23 = vsub.f32 %v3913_v38, %v3971_v56  ;;  %v5683_v56 = vld [vmem:[#allocation136_spill] sm:$0xff] }
 0x118   : > { %5615 = vst [vmem:[#allocation101_spill] sm:$0xff] %v4342_v35  ;;  %v5626_v35 = vsub.f32 %v5624_v0, %v5625_v49  ;;  %v4383_v0 = vand.u32 2147483647, %v5633_v31  ;;  %v5635_v49 = vld [vmem:[#allocation120_spill] sm:$0xff]  ;;  %5641 = vst [vmem:[#allocation107_spill] sm:$0xff] %v4393_v36  ;;  %v5644_v31 = vsub.f32 %v5642_v50, %v5643_v29  ;;  %v623_v36 = vld [vmem:[%s3016_s8 + $0x3d8] sm:$0xff]  ;;  %v5651_v50 = vsub.f32 %v3800_v57, %v5650_v45 }
 0x119   : > { %v4412_v54 = vand.u32 2147483647, %v5648_v30  ;;  %v4431_v8 = vand.u32 2147483647, %v5655_v12  ;;  %v496_v30 = vld [vmem:[%s3010_s7 + $0x3e0] sm:$0xff]  ;;  %v5656_v57 = vsub.f32 %v3829_v61, %v3896_v37  ;;  %v5657_v45 = vld [vmem:[#allocation128_spill] sm:$0xff]  ;;  %v751_v38 = vsub.f32 %v495_v25, %v623_v36 }
 0x11a   : > { %v4365_v44 = vand.u32 2147483647, %v5626_v35  ;;  %v5634_v35 = vld [vmem:[#allocation105_spill] sm:$0xff]  ;;  %v4402_v27 = vand.u32 2147483647, %v5644_v31 }
 0x11b   : > { %5649 = vst [vmem:[#allocation92_spill] sm:$0xff] %v4412_v54  ;;  %v4421_v29 = vand.u32 2147483647, %v5651_v50  ;;  %v5652_v31 = vld [vmem:[#allocation117_spill] sm:$0xff]  ;;  %v624_v54 = vld [vmem:[%s3016_s8 + $0x3e0] sm:$0xff]  ;;  %v5658_v50 = vsub.f32 %v3832_v14, %v5657_v45 }
 0x11c   : > { %5627 = vst [vmem:[#allocation90_spill] sm:$0xff] %v4365_v44  ;;  %v5636_v44 = vsub.f32 %v5634_v35, %v5635_v49  ;;  %v5645_v35 = vld [vmem:[#allocation112_spill] sm:$0xff]  ;;  %v4440_v20 = vand.u32 2147483647, %v5656_v57  ;;  %v4450_v9 = vand.u32 2147483647, %v5659_v43 }
 0x11d   : > { %v5646_v49 = vld [vmem:[#allocation124_spill] sm:$0xff]  ;;  %v5660_v61 = vld [vmem:[#allocation129_spill] sm:$0xff]  ;;  %v5664_v14 = vld [vmem:[#allocation130_spill] sm:$0xff]  ;;  %v4469_v62 = vand.u32 2147483647, %v5666_v22 }
 0x11e   : > { %v4388_v4 = vand.u32 2147483647, %v5636_v44  ;;  %v5647_v44 = vsub.f32 %v5645_v35, %v5646_v49  ;;  %v5653_v35 = vld [vmem:[#allocation127_spill] sm:$0xff]  ;;  %v5661_v37 = vsub.f32 %v3858_v26, %v5660_v61  ;;  %v5663_v12 = vld [vmem:[#allocation125_spill] sm:$0xff]  ;;  %v626_v43 = vld [vmem:[%s3016_s8 + $0x3f0] sm:$0xff]  ;;  %v5669_v26 = vsub.f32 %v3887_v42, %v5668_v18 }
 0x11f   : > { %v5654_v49 = vsub.f32 %v5652_v31, %v5653_v35  ;;  %v4445_v31 = vand.u32 2147483647, %v5658_v50  ;;  %v497_v35 = vld [vmem:[%s3010_s7 + $0x3e8] sm:$0xff]  ;;  %v5665_v57 = vsub.f32 %v5663_v12, %v5664_v14  ;;  %5667 = vst [vmem:[#allocation97_spill] sm:$0xff] %v4469_v62  ;;  %v498_v50 = vld [vmem:[%s3010_s7 + $0x3f0] sm:$0xff]  ;;  %v627_v22 = vld [vmem:[%s3016_s8 + $0x3f8] sm:$0xff]  ;;  %v750_v62 = vsub.f32 %v494_v60, %v622_v46 }
 0x120   : > { %5637 = vst [vmem:[#allocation91_spill] sm:$0xff] %v4388_v4  ;;  %v4407_v4 = vand.u32 2147483647, %v5647_v44  ;;  %v4459_v48 = vand.u32 2147483647, %v5661_v37  ;;  %v5671_v37 = vld [vmem:[#allocation32_spill] sm:$0xff] }
 0x121   : > { %v4426_v44 = vand.u32 2147483647, %v5654_v49  ;;  %v625_v49 = vld [vmem:[%s3016_s8 + $0x3e8] sm:$0xff]  ;;  %v4464_v45 = vand.u32 2147483647, %v5665_v57  ;;  %v499_v57 = vld [vmem:[%s3010_s7 + $0x3f8] sm:$0xff] }
 0x122   : > { %5662 = vst [vmem:[#allocation108_spill] sm:$0xff] %v4459_v48  ;;  %v4478_v61 = vand.u32 2147483647, %v5669_v26  ;;  %v5672_v48 = vld [vmem:[#allocation135_spill] sm:$0xff]  ;;  %v4488_v63 = vand.u32 2147483647, %v5675_v23  ;;  %v5684_v23 = vsub.f32 %v3945_v6, %v5683_v56  ;;  %v5690_v6 = vsub.f32 %v4031_v39, %v4054_v21 }
 0x123   : > { %v5673_v12 = vsub.f32 %v5671_v37, %v5672_v48  ;;  %v4495_v11 = vand.u32 2147483647, %v5676_v52  ;;  %v5677_v42 = vld [vmem:[#allocation33_spill] sm:$0xff]  ;;  %v5678_v18 = vld [vmem:[#allocation36_spill] sm:$0xff]  ;;  %v753_v56 = vsub.f32 %v497_v35, %v625_v49  ;;  %v5694_v39 = vsub.f32 %v4097_v55, %v4100_v59  ;;  %v5700_v55 = vld [vmem:[#allocation66_spill] sm:$0xff] }
 0x124   : > { %5670 = vst [vmem:[#allocation113_spill] sm:$0xff] %v4478_v61  ;;  %v5679_v26 = vsub.f32 %v5677_v42, %v5678_v18  ;;  %v5680_v48 = vld [vmem:[#allocation132_spill] sm:$0xff]  ;;  %v5681_v37 = vld [vmem:[#allocation37_spill] sm:$0xff]  ;;  %v4510_v46 = vand.u32 2147483647, %v5684_v23  ;;  %v5688_v42 = vsub.f32 %v4011_v7, %v4017_v53  ;;  %v5692_v7 = vsub.f32 %v4051_v40, %v4060_v5  ;;  %v5701_v59 = vld [vmem:[#allocation54_spill] sm:$0xff] }
 0x125   : > { %v4483_v14 = vand.u32 2147483647, %v5673_v12  ;;  %v5682_v12 = vsub.f32 %v5680_v48, %v5681_v37  ;;  %v5685_v60 = vld [vmem:[#allocation133_spill] sm:$0xff]  ;;  %v5689_v48 = vsub.f32 %v4014_v28, %v4037_v16  ;;  %v4530_v25 = vand.u32 2147483647, %v5690_v6 }
 0x126   : > { %v4500_v61 = vand.u32 2147483647, %v5679_v26  ;;  %v5686_v51 = vld [vmem:[#allocation137_spill] sm:$0xff]  ;;  %v4520_v18 = vand.u32 2147483647, %v5688_v42  ;;  %v752_v26 = vsub.f32 %v496_v30, %v624_v54  ;;  %v5691_v37 = vsub.f32 %v4034_v15, %v4057_v17  ;;  %v5697_v30 = vld [vmem:[#allocation60_spill] sm:$0xff] }
 0x127   : > { %5674 = vst [vmem:[#allocation98_spill] sm:$0xff] %v4483_v14  ;;  %v4505_v14 = vand.u32 2147483647, %v5682_v12  ;;  %v5687_v1 = vsub.f32 %v5685_v60, %v5686_v51  ;;  %v4525_v36 = vand.u32 2147483647, %v5689_v48  ;;  %v5693_v28 = vsub.f32 %v4074_v32, %v4077_v10  ;;  %v5698_v32 = vld [vmem:[#allocation61_spill] sm:$0xff] }
 0x128   : > { %v4535_v12 = vand.u32 2147483647, %v5691_v37  ;;  %v4540_v53 = vand.u32 2147483647, %v5692_v7  ;;  %v4550_v21 = vand.u32 2147483647, %v5694_v39  ;;  %v754_v54 = vsub.f32 %v498_v50, %v626_v43 }
 0x129   : > { %v4515_v52 = vand.u32 2147483647, %v5687_v1  ;;  %v4545_v16 = vand.u32 2147483647, %v5693_v28  ;;  %v5695_v15 = vsub.f32 %v4120_v47, %v4123_v3  ;;  %v5696_v40 = vsub.f32 %v4143_v13, %v4146_v33  ;;  %v5703_v47 = vld [vmem:[#allocation59_spill] sm:$0xff]  ;;  %v5704_v3 = vld [vmem:[#allocation72_spill] sm:$0xff] }
 0x12a   : > { %v5699_v10 = vsub.f32 %v5697_v30, %v5698_v32  ;;  %v755_v49 = vsub.f32 %v499_v57, %v627_v22  ;;  %v5702_v23 = vsub.f32 %v5700_v55, %v5701_v59  ;;  %v5705_v43 = vsub.f32 %v5703_v47, %v5704_v3  ;;  %v5706_v13 = vld [vmem:[#allocation77_spill] sm:$0xff]  ;;  %v5707_v33 = vld [vmem:[#allocation80_spill] sm:$0xff]  ;;  %v5717_v30 = vld [vmem:[#allocation14_spill] sm:$0xff] (!%p2578_p2) }
 0x12b   : > { %v4555_v17 = vand.u32 2147483647, %v5695_v15  ;;  %v4560_v5 = vand.u32 2147483647, %v5696_v40  ;;  %v5708_v51 = vsub.f32 %v5706_v13, %v5707_v33  ;;  %v4582_v42 = vand.u32 2147483647, %v744_v19 }
 0x12c   : > { %v4565_v35 = vand.u32 2147483647, %v5699_v10  ;;  %v4570_v50 = vand.u32 2147483647, %v5702_v23  ;;  %v4575_v60 = vand.u32 2147483647, %v5705_v43 }
 0x12d   : > { %v4580_v1 = vand.u32 2147483647, %v5708_v51  ;;  %v4584_v48 = vand.u32 2147483647, %v745_v34  ;;  %v4586_v57 = vand.u32 2147483647, %v746_v24 }
 0x12e   : > { %v4588_v22 = vand.u32 2147483647, %v747_v58  ;;  %v4590_v6 = vand.u32 2147483647, %v748_v41  ;;  %v4592_v37 = vand.u32 2147483647, %v749_v2 }
 0x12f   : > { %v4594_v7 = vand.u32 2147483647, %v750_v62  ;;  %v4596_v28 = vand.u32 2147483647, %v751_v38  ;;  %v4598_v39 = vand.u32 2147483647, %v752_v26 }
 0x130   : > { %v4600_v15 = vand.u32 2147483647, %v753_v56  ;;  %v4602_v19 = vand.u32 2147483647, %v754_v54  ;;  %v4604_v34 = vand.u32 2147483647, %v755_v49 }
 0x131   : > { %5709 = vst [vmem:[#allocation114_spill] sm:$0xff] %v4594_v7  ;;  %5710 = vst [vmem:[#allocation99_spill] sm:$0xff] %v4596_v28  ;;  %888 = sbr.rel (%p2578_p2) target bundleno = 395 (0x18b), region = 44  ;;  %v889_v24 = vld [vmem:[#allocation2] sm:$0xff] (!%p2578_p2)  ;;  %v890_v58 = vld [vmem:[#allocation2 + $0x8] sm:$0xff] (!%p2578_p2) }
 0x132   : > { %5711 = vst [vmem:[#allocation115_spill] sm:$0xff] %v4598_v39  ;;  %5712 = vst [vmem:[#allocation118_spill] sm:$0xff] %v4600_v15  ;;  %v891_v41 = vld [vmem:[#allocation2 + $0x10] sm:$0xff] (!%p2578_p2)  ;;  %v5716_v40 = vld [vmem:[#allocation13_spill] sm:$0xff] (!%p2578_p2) }
 0x133   : > { %5713 = vst [vmem:[#allocation104_spill] sm:$0xff] %v4602_v19  ;;  %5714 = vst [vmem:[#allocation119_spill] sm:$0xff] %v4604_v34  ;;  %v5715_v2 = vld [vmem:[#allocation12_spill] sm:$0xff] (!%p2578_p2)  ;;  %v1018_v38 = vadd.f32 (!%p2578_p2), %v890_v58, %v5716_v40  ;;  %v1019_v26 = vadd.f32 (!%p2578_p2), %v891_v41, %v5717_v30  ;;  %v892_v32 = vld [vmem:[#allocation2 + $0x18] sm:$0xff] (!%p2578_p2) }
 0x134   : > { %v1017_v62 = vadd.f32 (!%p2578_p2), %v889_v24, %v5715_v2  ;;  %v893_v56 = vld [vmem:[#allocation2 + $0x20] sm:$0xff] (!%p2578_p2)  ;;  %v894_v10 = vld [vmem:[#allocation2 + $0x28] sm:$0xff] (!%p2578_p2)  ;;  %v5719_v49 = vld [vmem:[#allocation16_spill] sm:$0xff] (!%p2578_p2) }
 0x135   : > { %v5718_v54 = vld [vmem:[#allocation15_spill] sm:$0xff] (!%p2578_p2)  ;;  %v1021_v59 = vadd.f32 (!%p2578_p2), %v893_v56, %v5719_v49  ;;  %v5720_v23 = vld [vmem:[#allocation17_spill] sm:$0xff] (!%p2578_p2)  ;;  %v895_v3 = vld [vmem:[#allocation2 + $0x30] sm:$0xff] (!%p2578_p2)  ;;  %1146 = vst [vmem:[#allocation2 + $0x8] sm:$0xff] (!%p2578_p2), %v1018_v38 }
 0x136   : > { %v1020_v55 = vadd.f32 (!%p2578_p2), %v892_v32, %v5718_v54  ;;  %v1022_v47 = vadd.f32 (!%p2578_p2), %v894_v10, %v5720_v23  ;;  %v896_v43 = vld [vmem:[#allocation2 + $0x38] sm:$0xff] (!%p2578_p2)  ;;  %v897_v13 = vld [vmem:[#allocation2 + $0x40] sm:$0xff] (!%p2578_p2)  ;;  %1145 = vst [vmem:[#allocation2] sm:$0xff] (!%p2578_p2), %v1017_v62  ;;  %1147 = vst [vmem:[#allocation2 + $0x10] sm:$0xff] (!%p2578_p2), %v1019_v26 }
 0x137   : > { %v5721_v33 = vld [vmem:[#allocation18_spill] sm:$0xff] (!%p2578_p2)  ;;  %v5722_v24 = vld [vmem:[#allocation19_spill] sm:$0xff] (!%p2578_p2)  ;;  %v5723_v41 = vld [vmem:[#allocation20_spill] sm:$0xff] (!%p2578_p2)  ;;  %1149 = vst [vmem:[#allocation2 + $0x20] sm:$0xff] (!%p2578_p2), %v1021_v59 }
 0x138   : > { %v1023_v51 = vadd.f32 %v895_v3, %v5721_v33  ;;  %v1024_v58 = vadd.f32 %v896_v43, %v5722_v24  ;;  %v1025_v2 = vadd.f32 %v897_v13, %v5723_v41  ;;  %v898_v40 = vld [vmem:[#allocation2 + $0x48] sm:$0xff]  ;;  %v899_v30 = vld [vmem:[#allocation2 + $0x50] sm:$0xff]  ;;  %v900_v34 = vld [vmem:[#allocation2 + $0x58] sm:$0xff]  ;;  %1148 = vst [vmem:[#allocation2 + $0x18] sm:$0xff] %v1020_v55 }
 0x139   : > { %1150 = vst [vmem:[#allocation2 + $0x28] sm:$0xff] %v1022_v47  ;;  %v5724_v32 = vld [vmem:[#allocation21_spill] sm:$0xff]  ;;  %v5725_v10 = vld [vmem:[#allocation22_spill] sm:$0xff]  ;;  %v5726_v49 = vld [vmem:[#allocation23_spill] sm:$0xff] }
 0x13a   : > { %v1026_v56 = vadd.f32 %v898_v40, %v5724_v32  ;;  %v1027_v54 = vadd.f32 %v899_v30, %v5725_v10  ;;  %v1028_v62 = vadd.f32 %v900_v34, %v5726_v49  ;;  %v901_v38 = vld [vmem:[#allocation2 + $0x60] sm:$0xff]  ;;  %v902_v26 = vld [vmem:[#allocation2 + $0x68] sm:$0xff]  ;;  %v903_v23 = vld [vmem:[#allocation2 + $0x70] sm:$0xff]  ;;  %1151 = vst [vmem:[#allocation2 + $0x30] sm:$0xff] %v1023_v51 }
 0x13b   : > { %1152 = vst [vmem:[#allocation2 + $0x38] sm:$0xff] %v1024_v58  ;;  %1153 = vst [vmem:[#allocation2 + $0x40] sm:$0xff] %v1025_v2  ;;  %v5727_v3 = vld [vmem:[#allocation26_spill] sm:$0xff]  ;;  %v5728_v13 = vld [vmem:[#allocation29_spill] sm:$0xff] }
 0x13c   : > { %v1029_v43 = vadd.f32 %v901_v38, %v5727_v3  ;;  %v1030_v33 = vadd.f32 %v902_v26, %v5728_v13  ;;  %v5729_v24 = vld [vmem:[#allocation34_spill] sm:$0xff]  ;;  %v904_v59 = vld [vmem:[#allocation2 + $0x78] sm:$0xff]  ;;  %v906_v41 = vld [vmem:[#allocation2 + $0x88] sm:$0xff]  ;;  %1154 = vst [vmem:[#allocation2 + $0x48] sm:$0xff] %v1026_v56 }
 0x13d   : > { %v1031_v55 = vadd.f32 %v903_v23, %v5729_v24  ;;  %v905_v47 = vld [vmem:[#allocation2 + $0x80] sm:$0xff]  ;;  %1155 = vst [vmem:[#allocation2 + $0x50] sm:$0xff] %v1027_v54  ;;  %1156 = vst [vmem:[#allocation2 + $0x58] sm:$0xff] %v1028_v62  ;;  %v5731_v30 = vld [vmem:[#allocation43_spill] sm:$0xff] }
 0x13e   : > { %v5730_v40 = vld [vmem:[#allocation38_spill] sm:$0xff]  ;;  %v1033_v32 = vadd.f32 %v905_v47, %v5731_v30  ;;  %v5732_v10 = vld [vmem:[#allocation48_spill] sm:$0xff]  ;;  %v908_v2 = vld [vmem:[#allocation2 + $0x98] sm:$0xff]  ;;  %1157 = vst [vmem:[#allocation2 + $0x60] sm:$0xff] %v1029_v43 }
 0x13f   : > { %v1032_v34 = vadd.f32 %v904_v59, %v5730_v40  ;;  %v1034_v51 = vadd.f32 %v906_v41, %v5732_v10  ;;  %v907_v58 = vld [vmem:[#allocation2 + $0x90] sm:$0xff]  ;;  %v909_v49 = vld [vmem:[#allocation2 + $0xa0] sm:$0xff]  ;;  %1158 = vst [vmem:[#allocation2 + $0x68] sm:$0xff] %v1030_v33  ;;  %1159 = vst [vmem:[#allocation2 + $0x70] sm:$0xff] %v1031_v55 }
 0x140   : > { %v5733_v38 = vld [vmem:[#allocation53_spill] sm:$0xff]  ;;  %v5734_v23 = vld [vmem:[#allocation58_spill] sm:$0xff]  ;;  %v5735_v13 = vld [vmem:[#allocation63_spill] sm:$0xff]  ;;  %1161 = vst [vmem:[#allocation2 + $0x80] sm:$0xff] %v1033_v32 }
 0x141   : > { %v1035_v26 = vadd.f32 %v907_v58, %v5733_v38  ;;  %v1036_v3 = vadd.f32 %v908_v2, %v5734_v23  ;;  %v1037_v56 = vadd.f32 %v909_v49, %v5735_v13  ;;  %v910_v54 = vld [vmem:[#allocation2 + $0xa8] sm:$0xff]  ;;  %v911_v62 = vld [vmem:[#allocation2 + $0xb0] sm:$0xff]  ;;  %v912_v24 = vld [vmem:[#allocation2 + $0xb8] sm:$0xff]  ;;  %1160 = vst [vmem:[#allocation2 + $0x78] sm:$0xff] %v1032_v34 }
 0x142   : > { %1162 = vst [vmem:[#allocation2 + $0x88] sm:$0xff] %v1034_v51  ;;  %v5736_v59 = vld [vmem:[#allocation68_spill] sm:$0xff]  ;;  %v5737_v41 = vld [vmem:[#allocation73_spill] sm:$0xff]  ;;  %v5738_v30 = vld [vmem:[#allocation78_spill] sm:$0xff] }
 0x143   : > { %v1038_v47 = vadd.f32 %v910_v54, %v5736_v59  ;;  %v1039_v40 = vadd.f32 %v911_v62, %v5737_v41  ;;  %v1040_v43 = vadd.f32 %v912_v24, %v5738_v30  ;;  %v913_v33 = vld [vmem:[#allocation2 + $0xc0] sm:$0xff]  ;;  %v914_v55 = vld [vmem:[#allocation2 + $0xc8] sm:$0xff]  ;;  %v915_v10 = vld [vmem:[#allocation2 + $0xd0] sm:$0xff]  ;;  %1163 = vst [vmem:[#allocation2 + $0x90] sm:$0xff] %v1035_v26 }
 0x144   : > { %1164 = vst [vmem:[#allocation2 + $0x98] sm:$0xff] %v1036_v3  ;;  %1165 = vst [vmem:[#allocation2 + $0xa0] sm:$0xff] %v1037_v56  ;;  %v5739_v58 = vld [vmem:[#allocation83_spill] sm:$0xff]  ;;  %v5740_v49 = vld [vmem:[#allocation89_spill] sm:$0xff] }
 0x145   : > { %v1041_v2 = vadd.f32 %v913_v33, %v5739_v58  ;;  %v1042_v38 = vadd.f32 %v914_v55, %v5740_v49  ;;  %v5741_v23 = vld [vmem:[#allocation96_spill] sm:$0xff]  ;;  %v916_v32 = vld [vmem:[#allocation2 + $0xd8] sm:$0xff]  ;;  %v917_v51 = vld [vmem:[#allocation2 + $0xe0] sm:$0xff]  ;;  %1166 = vst [vmem:[#allocation2 + $0xa8] sm:$0xff] %v1038_v47 }
 0x146   : > { %v1043_v34 = vadd.f32 %v915_v10, %v5741_v23  ;;  %v918_v13 = vld [vmem:[#allocation2 + $0xe8] sm:$0xff]  ;;  %1167 = vst [vmem:[#allocation2 + $0xb0] sm:$0xff] %v1039_v40  ;;  %1168 = vst [vmem:[#allocation2 + $0xb8] sm:$0xff] %v1040_v43  ;;  %v5743_v24 = vld [vmem:[#allocation109_spill] sm:$0xff] }
 0x147   : > { %v5742_v54 = vld [vmem:[#allocation103_spill] sm:$0xff]  ;;  %v1045_v59 = vadd.f32 %v917_v51, %v5743_v24  ;;  %v5744_v41 = vld [vmem:[#allocation116_spill] sm:$0xff]  ;;  %v920_v56 = vld [vmem:[#allocation2 + $0xf8] sm:$0xff]  ;;  %1169 = vst [vmem:[#allocation2 + $0xc0] sm:$0xff] %v1041_v2 }
 0x148   : > { %v1044_v62 = vadd.f32 %v916_v32, %v5742_v54  ;;  %v1046_v26 = vadd.f32 %v918_v13, %v5744_v41  ;;  %v919_v3 = vld [vmem:[#allocation2 + $0xf0] sm:$0xff]  ;;  %v921_v30 = vld [vmem:[#allocation2 + $0x100] sm:$0xff]  ;;  %1170 = vst [vmem:[#allocation2 + $0xc8] sm:$0xff] %v1042_v38  ;;  %1171 = vst [vmem:[#allocation2 + $0xd0] sm:$0xff] %v1043_v34 }
 0x149   : > { %v5745_v33 = vld [vmem:[#allocation121_spill] sm:$0xff]  ;;  %v5746_v10 = vld [vmem:[#allocation31_spill] sm:$0xff]  ;;  %v5747_v49 = vld [vmem:[#allocation24_spill] sm:$0xff]  ;;  %1173 = vst [vmem:[#allocation2 + $0xe0] sm:$0xff] %v1045_v59 }
 0x14a   : > { %v1047_v55 = vadd.f32 %v919_v3, %v5745_v33  ;;  %v1048_v58 = vadd.f32 %v920_v56, %v5746_v10  ;;  %v1049_v47 = vadd.f32 %v921_v30, %v5747_v49  ;;  %v922_v40 = vld [vmem:[#allocation2 + $0x108] sm:$0xff]  ;;  %v923_v43 = vld [vmem:[#allocation2 + $0x110] sm:$0xff]  ;;  %v924_v23 = vld [vmem:[#allocation2 + $0x118] sm:$0xff]  ;;  %1172 = vst [vmem:[#allocation2 + $0xd8] sm:$0xff] %v1044_v62 }
 0x14b   : > { %1174 = vst [vmem:[#allocation2 + $0xe8] sm:$0xff] %v1046_v26  ;;  %v5748_v32 = vld [vmem:[#allocation25_spill] sm:$0xff]  ;;  %v5749_v13 = vld [vmem:[#allocation131_spill] sm:$0xff]  ;;  %v925_v38 = vld [vmem:[#allocation2 + $0x120] sm:$0xff] }
 0x14c   : > { %v1050_v51 = vadd.f32 %v922_v40, %v5748_v32  ;;  %v1051_v54 = vadd.f32 %v923_v43, %v5749_v13  ;;  %v5750_v24 = vld [vmem:[#allocation27_spill] sm:$0xff]  ;;  %v927_v41 = vld [vmem:[#allocation2 + $0x130] sm:$0xff]  ;;  %1175 = vst [vmem:[#allocation2 + $0xf0] sm:$0xff] %v1047_v55  ;;  %1176 = vst [vmem:[#allocation2 + $0xf8] sm:$0xff] %v1048_v58 }
 0x14d   : > { %v1052_v2 = vadd.f32 %v924_v23, %v5750_v24  ;;  %v926_v34 = vld [vmem:[#allocation2 + $0x128] sm:$0xff]  ;;  %1177 = vst [vmem:[#allocation2 + $0x100] sm:$0xff] %v1049_v47  ;;  %v5751_v3 = vld [vmem:[#allocation28_spill] sm:$0xff]  ;;  %v5753_v10 = vld [vmem:[#allocation41_spill] sm:$0xff] }
 0x14e   : > { %v1053_v56 = vadd.f32 %v925_v38, %v5751_v3  ;;  %v5752_v30 = vld [vmem:[#allocation40_spill] sm:$0xff]  ;;  %v1055_v62 = vadd.f32 %v927_v41, %v5753_v10  ;;  %v928_v59 = vld [vmem:[#allocation2 + $0x138] sm:$0xff]  ;;  %v929_v26 = vld [vmem:[#allocation2 + $0x140] sm:$0xff]  ;;  %1178 = vst [vmem:[#allocation2 + $0x108] sm:$0xff] %v1050_v51 }
 0x14f   : > { %v1054_v33 = vadd.f32 %v926_v34, %v5752_v30  ;;  %v930_v49 = vld [vmem:[#allocation2 + $0x148] sm:$0xff]  ;;  %1179 = vst [vmem:[#allocation2 + $0x110] sm:$0xff] %v1051_v54  ;;  %1180 = vst [vmem:[#allocation2 + $0x118] sm:$0xff] %v1052_v2  ;;  %v5754_v40 = vld [vmem:[#allocation30_spill] sm:$0xff] }
 0x150   : > { %v1056_v43 = vadd.f32 %v928_v59, %v5754_v40  ;;  %v5755_v23 = vld [vmem:[#allocation42_spill] sm:$0xff]  ;;  %v5756_v13 = vld [vmem:[#allocation45_spill] sm:$0xff]  ;;  %v931_v58 = vld [vmem:[#allocation2 + $0x150] sm:$0xff]  ;;  %1181 = vst [vmem:[#allocation2 + $0x120] sm:$0xff] %v1053_v56 }
 0x151   : > { %v1057_v32 = vadd.f32 %v929_v26, %v5755_v23  ;;  %v1058_v55 = vadd.f32 %v930_v49, %v5756_v13  ;;  %v932_v47 = vld [vmem:[#allocation2 + $0x158] sm:$0xff]  ;;  %v933_v24 = vld [vmem:[#allocation2 + $0x160] sm:$0xff]  ;;  %1182 = vst [vmem:[#allocation2 + $0x128] sm:$0xff] %v1054_v33  ;;  %1183 = vst [vmem:[#allocation2 + $0x130] sm:$0xff] %v1055_v62 }
 0x152   : > { %v5757_v38 = vld [vmem:[#allocation46_spill] sm:$0xff]  ;;  %v5758_v41 = vld [vmem:[#allocation35_spill] sm:$0xff]  ;;  %v935_v2 = vld [vmem:[#allocation2 + $0x170] sm:$0xff]  ;;  %1184 = vst [vmem:[#allocation2 + $0x138] sm:$0xff] %v1056_v43 }
 0x153   : > { %v1059_v34 = vadd.f32 %v931_v58, %v5757_v38  ;;  %v1060_v3 = vadd.f32 %v932_v47, %v5758_v41  ;;  %v5759_v30 = vld [vmem:[#allocation47_spill] sm:$0xff]  ;;  %v936_v10 = vld [vmem:[#allocation2 + $0x178] sm:$0xff]  ;;  %1185 = vst [vmem:[#allocation2 + $0x140] sm:$0xff] %v1057_v32  ;;  %1186 = vst [vmem:[#allocation2 + $0x148] sm:$0xff] %v1058_v55 }
 0x154   : > { %v1061_v51 = vadd.f32 %v933_v24, %v5759_v30  ;;  %v934_v54 = vld [vmem:[#allocation2 + $0x168] sm:$0xff]  ;;  %v5760_v59 = vld [vmem:[#allocation50_spill] sm:$0xff]  ;;  %v939_v13 = vld [vmem:[#allocation2 + $0x190] sm:$0xff] }
 0x155   : > { %v1062_v26 = vadd.f32 %v934_v54, %v5760_v59  ;;  %v5761_v49 = vld [vmem:[#allocation51_spill] sm:$0xff]  ;;  %v937_v33 = vld [vmem:[#allocation2 + $0x180] sm:$0xff]  ;;  %1187 = vst [vmem:[#allocation2 + $0x150] sm:$0xff] %v1059_v34  ;;  %1188 = vst [vmem:[#allocation2 + $0x158] sm:$0xff] %v1060_v3 }
 0x156   : > { %v1063_v40 = vadd.f32 %v935_v2, %v5761_v49  ;;  %v5762_v23 = vld [vmem:[#allocation39_spill] sm:$0xff]  ;;  %1189 = vst [vmem:[#allocation2 + $0x160] sm:$0xff] %v1061_v51  ;;  %v5763_v58 = vld [vmem:[#allocation52_spill] sm:$0xff]  ;;  %v940_v32 = vld [vmem:[#allocation2 + $0x198] sm:$0xff] }
 0x157   : > { %v1064_v56 = vadd.f32 %v936_v10, %v5762_v23  ;;  %v938_v62 = vld [vmem:[#allocation2 + $0x188] sm:$0xff]  ;;  %v1065_v47 = vadd.f32 %v937_v33, %v5763_v58  ;;  %v5765_v41 = vld [vmem:[#allocation56_spill] sm:$0xff]  ;;  %v941_v55 = vld [vmem:[#allocation2 + $0x1a0] sm:$0xff]  ;;  %1190 = vst [vmem:[#allocation2 + $0x168] sm:$0xff] %v1062_v26 }
 0x158   : > { %v5764_v24 = vld [vmem:[#allocation55_spill] sm:$0xff]  ;;  %v1067_v43 = vadd.f32 %v939_v13, %v5765_v41  ;;  %1191 = vst [vmem:[#allocation2 + $0x170] sm:$0xff] %v1063_v40  ;;  %v5766_v54 = vld [vmem:[#allocation44_spill] sm:$0xff]  ;;  %v5767_v10 = vld [vmem:[#allocation57_spill] sm:$0xff] }
 0x159   : > { %v1066_v38 = vadd.f32 %v938_v62, %v5764_v24  ;;  %v942_v30 = vld [vmem:[#allocation2 + $0x1a8] sm:$0xff]  ;;  %1192 = vst [vmem:[#allocation2 + $0x178] sm:$0xff] %v1064_v56  ;;  %v1068_v2 = vadd.f32 %v940_v32, %v5766_v54  ;;  %v1069_v59 = vadd.f32 %v941_v55, %v5767_v10  ;;  %v5768_v49 = vld [vmem:[#allocation49_spill] sm:$0xff]  ;;  %v943_v3 = vld [vmem:[#allocation2 + $0x1b0] sm:$0xff] }
 0x15a   : > { %v1070_v34 = vadd.f32 %v942_v30, %v5768_v49  ;;  %v944_v51 = vld [vmem:[#allocation2 + $0x1b8] sm:$0xff]  ;;  %v945_v23 = vld [vmem:[#allocation2 + $0x1c0] sm:$0xff]  ;;  %1193 = vst [vmem:[#allocation2 + $0x180] sm:$0xff] %v1065_v47  ;;  %1195 = vst [vmem:[#allocation2 + $0x190] sm:$0xff] %v1067_v43 }
 0x15b   : > { %1194 = vst [vmem:[#allocation2 + $0x188] sm:$0xff] %v1066_v38  ;;  %v5769_v33 = vld [vmem:[#allocation62_spill] sm:$0xff]  ;;  %v5770_v13 = vld [vmem:[#allocation65_spill] sm:$0xff]  ;;  %v5771_v24 = vld [vmem:[#allocation67_spill] sm:$0xff] }
 0x15c   : > { %v1071_v62 = vadd.f32 %v943_v3, %v5769_v33  ;;  %v1072_v58 = vadd.f32 %v944_v51, %v5770_v13  ;;  %v1073_v26 = vadd.f32 %v945_v23, %v5771_v24  ;;  %v946_v40 = vld [vmem:[#allocation2 + $0x1c8] sm:$0xff]  ;;  %v947_v56 = vld [vmem:[#allocation2 + $0x1d0] sm:$0xff]  ;;  %v948_v41 = vld [vmem:[#allocation2 + $0x1d8] sm:$0xff]  ;;  %1196 = vst [vmem:[#allocation2 + $0x198] sm:$0xff] %v1068_v2 }
 0x15d   : > { %1197 = vst [vmem:[#allocation2 + $0x1a0] sm:$0xff] %v1069_v59  ;;  %1198 = vst [vmem:[#allocation2 + $0x1a8] sm:$0xff] %v1070_v34  ;;  %v5772_v32 = vld [vmem:[#allocation70_spill] sm:$0xff]  ;;  %v5773_v30 = vld [vmem:[#allocation71_spill] sm:$0xff] }
 0x15e   : > { %v1074_v55 = vadd.f32 %v946_v40, %v5772_v32  ;;  %v1075_v54 = vadd.f32 %v947_v56, %v5773_v30  ;;  %v5774_v10 = vld [vmem:[#allocation75_spill] sm:$0xff]  ;;  %v949_v38 = vld [vmem:[#allocation2 + $0x1e0] sm:$0xff]  ;;  %v951_v49 = vld [vmem:[#allocation2 + $0x1f0] sm:$0xff]  ;;  %1199 = vst [vmem:[#allocation2 + $0x1b0] sm:$0xff] %v1071_v62 }
 0x15f   : > { %v1076_v47 = vadd.f32 %v948_v41, %v5774_v10  ;;  %v950_v43 = vld [vmem:[#allocation2 + $0x1e8] sm:$0xff]  ;;  %1200 = vst [vmem:[#allocation2 + $0x1b8] sm:$0xff] %v1072_v58  ;;  %1201 = vst [vmem:[#allocation2 + $0x1c0] sm:$0xff] %v1073_v26  ;;  %v5775_v3 = vld [vmem:[#allocation76_spill] sm:$0xff] }
 0x160   : > { %v1077_v51 = vadd.f32 %v949_v38, %v5775_v3  ;;  %v5776_v23 = vld [vmem:[#allocation64_spill] sm:$0xff]  ;;  %v5777_v13 = vld [vmem:[#allocation81_spill] sm:$0xff]  ;;  %v953_v34 = vld [vmem:[#allocation2 + $0x200] sm:$0xff]  ;;  %1202 = vst [vmem:[#allocation2 + $0x1c8] sm:$0xff] %v1074_v55 }
 0x161   : > { %v1078_v33 = vadd.f32 %v950_v43, %v5776_v23  ;;  %v1079_v2 = vadd.f32 %v951_v49, %v5777_v13  ;;  %v952_v59 = vld [vmem:[#allocation2 + $0x1f8] sm:$0xff]  ;;  %v954_v24 = vld [vmem:[#allocation2 + $0x208] sm:$0xff]  ;;  %1203 = vst [vmem:[#allocation2 + $0x1d0] sm:$0xff] %v1075_v54  ;;  %1204 = vst [vmem:[#allocation2 + $0x1d8] sm:$0xff] %v1076_v47 }
 0x162   : > { %v5778_v40 = vld [vmem:[#allocation69_spill] sm:$0xff]  ;;  %v5779_v41 = vld [vmem:[#allocation82_spill] sm:$0xff]  ;;  %v955_v58 = vld [vmem:[#allocation2 + $0x210] sm:$0xff]  ;;  %1205 = vst [vmem:[#allocation2 + $0x1e0] sm:$0xff] %v1077_v51 }
 0x163   : > { %v1080_v56 = vadd.f32 %v952_v59, %v5778_v40  ;;  %v1081_v32 = vadd.f32 %v953_v34, %v5779_v41  ;;  %v5780_v30 = vld [vmem:[#allocation86_spill] sm:$0xff]  ;;  %v956_v26 = vld [vmem:[#allocation2 + $0x218] sm:$0xff]  ;;  %1206 = vst [vmem:[#allocation2 + $0x1e8] sm:$0xff] %v1078_v33  ;;  %1207 = vst [vmem:[#allocation2 + $0x1f0] sm:$0xff] %v1079_v2 }
 0x164   : > { %v1082_v62 = vadd.f32 %v954_v24, %v5780_v30  ;;  %v957_v10 = vld [vmem:[#allocation2 + $0x220] sm:$0xff]  ;;  %v5781_v38 = vld [vmem:[#allocation87_spill] sm:$0xff]  ;;  %v5783_v23 = vld [vmem:[#allocation88_spill] sm:$0xff] }
 0x165   : > { %v1083_v43 = vadd.f32 %v955_v58, %v5781_v38  ;;  %v5782_v49 = vld [vmem:[#allocation74_spill] sm:$0xff]  ;;  %v1085_v55 = vadd.f32 %v957_v10, %v5783_v23  ;;  %v958_v54 = vld [vmem:[#allocation2 + $0x228] sm:$0xff]  ;;  %v959_v47 = vld [vmem:[#allocation2 + $0x230] sm:$0xff]  ;;  %1208 = vst [vmem:[#allocation2 + $0x1f8] sm:$0xff] %v1080_v56 }
 0x166   : > { %v1084_v3 = vadd.f32 %v956_v26, %v5782_v49  ;;  %v960_v13 = vld [vmem:[#allocation2 + $0x238] sm:$0xff]  ;;  %1209 = vst [vmem:[#allocation2 + $0x200] sm:$0xff] %v1081_v32  ;;  %1210 = vst [vmem:[#allocation2 + $0x208] sm:$0xff] %v1082_v62  ;;  %v5785_v24 = vld [vmem:[#allocation94_spill] sm:$0xff] }
 0x167   : > { %v5784_v59 = vld [vmem:[#allocation93_spill] sm:$0xff]  ;;  %v1087_v40 = vadd.f32 %v959_v47, %v5785_v24  ;;  %v5786_v41 = vld [vmem:[#allocation79_spill] sm:$0xff]  ;;  %v961_v33 = vld [vmem:[#allocation2 + $0x240] sm:$0xff]  ;;  %1211 = vst [vmem:[#allocation2 + $0x210] sm:$0xff] %v1083_v43 }
 0x168   : > { %v1086_v34 = vadd.f32 %v958_v54, %v5784_v59  ;;  %v1088_v51 = vadd.f32 %v960_v13, %v5786_v41  ;;  %v962_v2 = vld [vmem:[#allocation2 + $0x248] sm:$0xff]  ;;  %v963_v30 = vld [vmem:[#allocation2 + $0x250] sm:$0xff]  ;;  %1212 = vst [vmem:[#allocation2 + $0x218] sm:$0xff] %v1084_v3  ;;  %1213 = vst [vmem:[#allocation2 + $0x220] sm:$0xff] %v1085_v55 }
 0x169   : > { %v5787_v58 = vld [vmem:[#allocation95_spill] sm:$0xff]  ;;  %v5788_v10 = vld [vmem:[#allocation100_spill] sm:$0xff]  ;;  %v964_v32 = vld [vmem:[#allocation2 + $0x258] sm:$0xff]  ;;  %1215 = vst [vmem:[#allocation2 + $0x230] sm:$0xff] %v1087_v40 }
 0x16a   : > { %v1089_v26 = vadd.f32 %v961_v33, %v5787_v58  ;;  %v1090_v38 = vadd.f32 %v962_v2, %v5788_v10  ;;  %v5789_v49 = vld [vmem:[#allocation84_spill] sm:$0xff]  ;;  %v965_v62 = vld [vmem:[#allocation2 + $0x260] sm:$0xff]  ;;  %v966_v23 = vld [vmem:[#allocation2 + $0x268] sm:$0xff]  ;;  %1214 = vst [vmem:[#allocation2 + $0x228] sm:$0xff] %v1086_v34 }
 0x16b   : > { %v1091_v56 = vadd.f32 %v963_v30, %v5789_v49  ;;  %1216 = vst [vmem:[#allocation2 + $0x238] sm:$0xff] %v1088_v51  ;;  %v5790_v54 = vld [vmem:[#allocation101_spill] sm:$0xff]  ;;  %v5792_v24 = vld [vmem:[#allocation102_spill] sm:$0xff]  ;;  %v967_v3 = vld [vmem:[#allocation2 + $0x270] sm:$0xff] }
 0x16c   : > { %v1092_v47 = vadd.f32 %v964_v32, %v5790_v54  ;;  %v5791_v13 = vld [vmem:[#allocation85_spill] sm:$0xff]  ;;  %v1094_v43 = vadd.f32 %v966_v23, %v5792_v24  ;;  %v969_v41 = vld [vmem:[#allocation2 + $0x280] sm:$0xff]  ;;  %1217 = vst [vmem:[#allocation2 + $0x240] sm:$0xff] %v1089_v26  ;;  %1218 = vst [vmem:[#allocation2 + $0x248] sm:$0xff] %v1090_v38 }
 0x16d   : > { %v1093_v59 = vadd.f32 %v965_v62, %v5791_v13  ;;  %v968_v55 = vld [vmem:[#allocation2 + $0x278] sm:$0xff]  ;;  %1219 = vst [vmem:[#allocation2 + $0x250] sm:$0xff] %v1091_v56  ;;  %v5793_v33 = vld [vmem:[#allocation90_spill] sm:$0xff]  ;;  %v1097_v34 = vadd.f32 %v969_v41, %v4383_v0  ;;  %v970_v40 = vld [vmem:[#allocation2 + $0x288] sm:$0xff] }
 0x16e   : > { %v1095_v2 = vadd.f32 %v967_v3, %v5793_v33  ;;  %v5794_v30 = vld [vmem:[#allocation106_spill] sm:$0xff]  ;;  %v971_v51 = vld [vmem:[#allocation2 + $0x290] sm:$0xff]  ;;  %v972_v10 = vld [vmem:[#allocation2 + $0x298] sm:$0xff]  ;;  %1220 = vst [vmem:[#allocation2 + $0x258] sm:$0xff] %v1092_v47 }
 0x16f   : > { %v1096_v58 = vadd.f32 %v968_v55, %v5794_v30  ;;  %1221 = vst [vmem:[#allocation2 + $0x260] sm:$0xff] %v1093_v59  ;;  %1222 = vst [vmem:[#allocation2 + $0x268] sm:$0xff] %v1094_v43  ;;  %v5795_v49 = vld [vmem:[#allocation91_spill] sm:$0xff]  ;;  %v1100_v26 = vadd.f32 %v972_v10, %v4402_v27  ;;  %v973_v38 = vld [vmem:[#allocation2 + $0x2a0] sm:$0xff] }
 0x170   : > { %v1098_v32 = vadd.f32 %v970_v40, %v5795_v49  ;;  %v5796_v62 = vld [vmem:[#allocation107_spill] sm:$0xff]  ;;  %v975_v54 = vld [vmem:[#allocation2 + $0x2b0] sm:$0xff]  ;;  %1223 = vst [vmem:[#allocation2 + $0x270] sm:$0xff] %v1095_v2  ;;  %1225 = vst [vmem:[#allocation2 + $0x280] sm:$0xff] %v1097_v34  ;;  %v1101_v13 = vadd.f32 %v973_v38, %v4407_v4 }
 0x171   : > { %v1099_v23 = vadd.f32 %v971_v51, %v5796_v62  ;;  %v974_v56 = vld [vmem:[#allocation2 + $0x2a8] sm:$0xff]  ;;  %1224 = vst [vmem:[#allocation2 + $0x278] sm:$0xff] %v1096_v58  ;;  %v5797_v24 = vld [vmem:[#allocation92_spill] sm:$0xff]  ;;  %v1103_v47 = vadd.f32 %v975_v54, %v4421_v29  ;;  %v976_v59 = vld [vmem:[#allocation2 + $0x2b8] sm:$0xff] }
 0x172   : > { %v1102_v3 = vadd.f32 %v974_v56, %v5797_v24  ;;  %v977_v43 = vld [vmem:[#allocation2 + $0x2c0] sm:$0xff]  ;;  %v978_v55 = vld [vmem:[#allocation2 + $0x2c8] sm:$0xff]  ;;  %1226 = vst [vmem:[#allocation2 + $0x288] sm:$0xff] %v1098_v32  ;;  %1228 = vst [vmem:[#allocation2 + $0x298] sm:$0xff] %v1100_v26  ;;  %v1104_v41 = vadd.f32 %v976_v59, %v4426_v44 }
 0x173   : > { %1227 = vst [vmem:[#allocation2 + $0x290] sm:$0xff] %v1099_v23  ;;  %v1105_v33 = vadd.f32 %v977_v43, %v4431_v8  ;;  %v1106_v2 = vadd.f32 %v978_v55, %v4440_v20  ;;  %v979_v30 = vld [vmem:[#allocation2 + $0x2d0] sm:$0xff]  ;;  %v980_v58 = vld [vmem:[#allocation2 + $0x2d8] sm:$0xff]  ;;  %v981_v34 = vld [vmem:[#allocation2 + $0x2e0] sm:$0xff] }
 0x174   : > { %1229 = vst [vmem:[#allocation2 + $0x2a0] sm:$0xff] %v1101_v13  ;;  %1230 = vst [vmem:[#allocation2 + $0x2a8] sm:$0xff] %v1102_v3  ;;  %v1107_v40 = vadd.f32 %v979_v30, %v4445_v31  ;;  %v1108_v51 = vadd.f32 %v980_v58, %v4450_v9  ;;  %v5798_v10 = vld [vmem:[#allocation108_spill] sm:$0xff]  ;;  %v982_v32 = vld [vmem:[#allocation2 + $0x2e8] sm:$0xff] }
 0x175   : > { %1231 = vst [vmem:[#allocation2 + $0x2b0] sm:$0xff] %v1103_v47  ;;  %v1109_v49 = vadd.f32 %v981_v34, %v5798_v10  ;;  %v983_v62 = vld [vmem:[#allocation2 + $0x2f0] sm:$0xff]  ;;  %v984_v23 = vld [vmem:[#allocation2 + $0x2f8] sm:$0xff]  ;;  %1232 = vst [vmem:[#allocation2 + $0x2b8] sm:$0xff] %v1104_v41  ;;  %v1110_v26 = vadd.f32 %v982_v32, %v4464_v45 }
 0x176   : > { %1233 = vst [vmem:[#allocation2 + $0x2c0] sm:$0xff] %v1105_v33  ;;  %1234 = vst [vmem:[#allocation2 + $0x2c8] sm:$0xff] %v1106_v2  ;;  %v5799_v38 = vld [vmem:[#allocation97_spill] sm:$0xff]  ;;  %v985_v24 = vld [vmem:[#allocation2 + $0x300] sm:$0xff] }
 0x177   : > { %v1111_v56 = vadd.f32 %v983_v62, %v5799_v38  ;;  %v5800_v54 = vld [vmem:[#allocation113_spill] sm:$0xff]  ;;  %v986_v3 = vld [vmem:[#allocation2 + $0x308] sm:$0xff]  ;;  %v987_v47 = vld [vmem:[#allocation2 + $0x310] sm:$0xff]  ;;  %1235 = vst [vmem:[#allocation2 + $0x2d0] sm:$0xff] %v1107_v40 }
 0x178   : > { %v1112_v13 = vadd.f32 %v984_v23, %v5800_v54  ;;  %1236 = vst [vmem:[#allocation2 + $0x2d8] sm:$0xff] %v1108_v51  ;;  %1237 = vst [vmem:[#allocation2 + $0x2e0] sm:$0xff] %v1109_v49  ;;  %v5801_v59 = vld [vmem:[#allocation98_spill] sm:$0xff]  ;;  %v1114_v55 = vadd.f32 %v986_v3, %v4488_v63  ;;  %v1115_v41 = vadd.f32 %v987_v47, %v4495_v11  ;;  %v988_v33 = vld [vmem:[#allocation2 + $0x318] sm:$0xff] }
 0x179   : > { %v1113_v43 = vadd.f32 %v985_v24, %v5801_v59  ;;  %v989_v2 = vld [vmem:[#allocation2 + $0x320] sm:$0xff]  ;;  %v990_v30 = vld [vmem:[#allocation2 + $0x328] sm:$0xff]  ;;  %1238 = vst [vmem:[#allocation2 + $0x2e8] sm:$0xff] %v1110_v26  ;;  %1239 = vst [vmem:[#allocation2 + $0x2f0] sm:$0xff] %v1111_v56  ;;  %v1116_v58 = vadd.f32 %v988_v33, %v4500_v61 }
 0x17a   : > { %1240 = vst [vmem:[#allocation2 + $0x2f8] sm:$0xff] %v1112_v13  ;;  %v1117_v34 = vadd.f32 %v989_v2, %v4505_v14  ;;  %v1118_v40 = vadd.f32 %v990_v30, %v4510_v46  ;;  %v991_v51 = vld [vmem:[#allocation2 + $0x330] sm:$0xff]  ;;  %v992_v10 = vld [vmem:[#allocation2 + $0x338] sm:$0xff]  ;;  %v993_v49 = vld [vmem:[#allocation2 + $0x340] sm:$0xff] }
 0x17b   : > { %1241 = vst [vmem:[#allocation2 + $0x300] sm:$0xff] %v1113_v43  ;;  %1242 = vst [vmem:[#allocation2 + $0x308] sm:$0xff] %v1114_v55  ;;  %v1119_v32 = vadd.f32 %v991_v51, %v4515_v52  ;;  %v1120_v62 = vadd.f32 %v992_v10, %v4520_v18  ;;  %v1121_v23 = vadd.f32 %v993_v49, %v4525_v36  ;;  %v994_v26 = vld [vmem:[#allocation2 + $0x348] sm:$0xff]  ;;  %v995_v38 = vld [vmem:[#allocation2 + $0x350] sm:$0xff] }
 0x17c   : > { %1243 = vst [vmem:[#allocation2 + $0x310] sm:$0xff] %v1115_v41  ;;  %v996_v56 = vld [vmem:[#allocation2 + $0x358] sm:$0xff]  ;;  %1244 = vst [vmem:[#allocation2 + $0x318] sm:$0xff] %v1116_v58  ;;  %v1122_v54 = vadd.f32 %v994_v26, %v4530_v25  ;;  %v1123_v13 = vadd.f32 %v995_v38, %v4535_v12  ;;  %v997_v3 = vld [vmem:[#allocation2 + $0x360] sm:$0xff] }
 0x17d   : > { %1245 = vst [vmem:[#allocation2 + $0x320] sm:$0xff] %v1117_v34  ;;  %1246 = vst [vmem:[#allocation2 + $0x328] sm:$0xff] %v1118_v40  ;;  %v1124_v24 = vadd.f32 %v996_v56, %v4540_v53  ;;  %v998_v47 = vld [vmem:[#allocation2 + $0x368] sm:$0xff]  ;;  %v999_v59 = vld [vmem:[#allocation2 + $0x370] sm:$0xff]  ;;  %v1125_v43 = vadd.f32 %v997_v3, %v4545_v16 }
 0x17e   : > { %1247 = vst [vmem:[#allocation2 + $0x330] sm:$0xff] %v1119_v32  ;;  %1248 = vst [vmem:[#allocation2 + $0x338] sm:$0xff] %v1120_v62  ;;  %v1126_v55 = vadd.f32 %v998_v47, %v4550_v21  ;;  %v1127_v41 = vadd.f32 %v999_v59, %v4555_v17  ;;  %v1000_v33 = vld [vmem:[#allocation2 + $0x378] sm:$0xff]  ;;  %v1001_v2 = vld [vmem:[#allocation2 + $0x380] sm:$0xff] }
 0x17f   : > { %1249 = vst [vmem:[#allocation2 + $0x340] sm:$0xff] %v1121_v23  ;;  %v1002_v30 = vld [vmem:[#allocation2 + $0x388] sm:$0xff]  ;;  %1250 = vst [vmem:[#allocation2 + $0x348] sm:$0xff] %v1122_v54  ;;  %v1128_v58 = vadd.f32 %v1000_v33, %v4560_v5  ;;  %v1129_v34 = vadd.f32 %v1001_v2, %v4565_v35  ;;  %v1003_v51 = vld [vmem:[#allocation2 + $0x390] sm:$0xff] }
 0x180   : > { %1251 = vst [vmem:[#allocation2 + $0x350] sm:$0xff] %v1123_v13  ;;  %1252 = vst [vmem:[#allocation2 + $0x358] sm:$0xff] %v1124_v24  ;;  %v1130_v40 = vadd.f32 %v1002_v30, %v4570_v50  ;;  %v1004_v10 = vld [vmem:[#allocation2 + $0x398] sm:$0xff]  ;;  %v1005_v49 = vld [vmem:[#allocation2 + $0x3a0] sm:$0xff]  ;;  %v1131_v32 = vadd.f32 %v1003_v51, %v4575_v60 }
 0x181   : > { %1253 = vst [vmem:[#allocation2 + $0x360] sm:$0xff] %v1125_v43  ;;  %1254 = vst [vmem:[#allocation2 + $0x368] sm:$0xff] %v1126_v55  ;;  %v1132_v62 = vadd.f32 %v1004_v10, %v4580_v1  ;;  %v1133_v23 = vadd.f32 %v1005_v49, %v4582_v42  ;;  %v1006_v26 = vld [vmem:[#allocation2 + $0x3a8] sm:$0xff]  ;;  %v1007_v38 = vld [vmem:[#allocation2 + $0x3b0] sm:$0xff] }
 0x182   : > { %1255 = vst [vmem:[#allocation2 + $0x370] sm:$0xff] %v1127_v41  ;;  %v1008_v56 = vld [vmem:[#allocation2 + $0x3b8] sm:$0xff]  ;;  %1256 = vst [vmem:[#allocation2 + $0x378] sm:$0xff] %v1128_v58  ;;  %v1134_v54 = vadd.f32 %v1006_v26, %v4584_v48  ;;  %v1135_v13 = vadd.f32 %v1007_v38, %v4586_v57  ;;  %v1009_v3 = vld [vmem:[#allocation2 + $0x3c0] sm:$0xff] }
 0x183   : > { %1257 = vst [vmem:[#allocation2 + $0x380] sm:$0xff] %v1129_v34  ;;  %1258 = vst [vmem:[#allocation2 + $0x388] sm:$0xff] %v1130_v40  ;;  %v1136_v24 = vadd.f32 %v1008_v56, %v4588_v22  ;;  %v1010_v47 = vld [vmem:[#allocation2 + $0x3c8] sm:$0xff]  ;;  %v1011_v59 = vld [vmem:[#allocation2 + $0x3d0] sm:$0xff]  ;;  %v1137_v43 = vadd.f32 %v1009_v3, %v4590_v6 }
 0x184   : > { %1259 = vst [vmem:[#allocation2 + $0x390] sm:$0xff] %v1131_v32  ;;  %1260 = vst [vmem:[#allocation2 + $0x398] sm:$0xff] %v1132_v62  ;;  %v1138_v55 = vadd.f32 %v1010_v47, %v4592_v37  ;;  %v1139_v41 = vadd.f32 %v1011_v59, %v4594_v7  ;;  %v1012_v33 = vld [vmem:[#allocation2 + $0x3d8] sm:$0xff]  ;;  %v1013_v2 = vld [vmem:[#allocation2 + $0x3e0] sm:$0xff] }
 0x185   : > { %1261 = vst [vmem:[#allocation2 + $0x3a0] sm:$0xff] %v1133_v23  ;;  %v1014_v30 = vld [vmem:[#allocation2 + $0x3e8] sm:$0xff]  ;;  %1262 = vst [vmem:[#allocation2 + $0x3a8] sm:$0xff] %v1134_v54  ;;  %v1140_v58 = vadd.f32 %v1012_v33, %v4596_v28  ;;  %v1141_v34 = vadd.f32 %v1013_v2, %v4598_v39  ;;  %v1015_v51 = vld [vmem:[#allocation2 + $0x3f0] sm:$0xff] }
 0x186   : > { %1263 = vst [vmem:[#allocation2 + $0x3b0] sm:$0xff] %v1135_v13  ;;  %1264 = vst [vmem:[#allocation2 + $0x3b8] sm:$0xff] %v1136_v24  ;;  %v1142_v40 = vadd.f32 %v1014_v30, %v4600_v15  ;;  %v1016_v10 = vld [vmem:[#allocation2 + $0x3f8] sm:$0xff]  ;;  %v1143_v49 = vadd.f32 %v1015_v51, %v4602_v19  ;;  %v5802_v32 = vld [vmem:[#allocation119_spill] sm:$0xff] }
 0x187   : > { %1265 = vst [vmem:[#allocation2 + $0x3c0] sm:$0xff] %v1137_v43  ;;  %1266 = vst [vmem:[#allocation2 + $0x3c8] sm:$0xff] %v1138_v55  ;;  %v1144_v62 = vadd.f32 %v1016_v10, %v5802_v32 }
 0x188   : > { %1267 = vst [vmem:[#allocation2 + $0x3d0] sm:$0xff] %v1139_v41  ;;  %1268 = vst [vmem:[#allocation2 + $0x3d8] sm:$0xff] %v1140_v58 }
 0x189   : > { %1269 = vst [vmem:[#allocation2 + $0x3e0] sm:$0xff] %v1141_v34  ;;  %1270 = vst [vmem:[#allocation2 + $0x3e8] sm:$0xff] %v1142_v40 }
 0x18a   : > { %1271 = vst [vmem:[#allocation2 + $0x3f0] sm:$0xff] %v1143_v49  ;;  %1272 = vst [vmem:[#allocation2 + $0x3f8] sm:$0xff] %v1144_v62 }
 0x18b PF: > { %p2579_p8 = scmp.lt.s32.totalorder %s2842_s14, 1 }
 0x18c   : > { %s2580_s27 = sshll.u32 (!%p2579_p8), %s2842_s14, 10  ;;  %v1278_v23 = vlaneseq (!%p2579_p8)  ;;  %v5803_v30 = vld [vmem:[#allocation12_spill] sm:$0xff] (!%p2579_p8)  ;;  %v5806_v19 = vld [vmem:[#allocation15_spill] sm:$0xff] (!%p2579_p8) }
 0x18d   : > { %1276 = sbr.rel (%p2579_p8) target bundleno = 564 (0x234), region = 48  ;;  %v4738_v26 = vstv (!%p2579_p8), %s2580_s27  ;;  %v5807_v28 = vld [vmem:[#allocation16_spill] sm:$0xff] (!%p2579_p8)  ;;  %v1541_v7 = vld [vmem:[#allocation2 + $0x28] sm:$0xff] (!%p2579_p8) }
 0x18e   : > { %v4740_v38 = vshrl.u32 (!%p2579_p8), %v1278_v23, 7 }
 0x18f   : > { %v1537_v34 = vld [vmem:[#allocation2 + $0x8] sm:$0xff] (!%p2579_p8) }
 0x190   : > { %v1408_v56 = vadd.s32 (!%p2579_p8), %v4738_v26, %v4740_v38  ;;  %v1280_v54 = vadd.s32 (!%p2579_p8), 8, %v4740_v38  ;;  %v1281_v13 = vadd.s32 (!%p2579_p8), 16, %v4740_v38  ;;  %v1282_v24 = vadd.s32 (!%p2579_p8), 24, %v4740_v38  ;;  %v1536_v3 = vld [vmem:[#allocation2] sm:$0xff] (!%p2579_p8)  ;;  %v1538_v40 = vld [vmem:[#allocation2 + $0x10] sm:$0xff] (!%p2579_p8) }
 0x191   : > { %v1283_v47 = vadd.s32 (!%p2579_p8), 32, %v4740_v38  ;;  %v1284_v59 = vadd.s32 (!%p2579_p8), 40, %v4740_v38  ;;  %v1285_v43 = vadd.s32 (!%p2579_p8), 48, %v4740_v38  ;;  %v1286_v55 = vadd.s32 (!%p2579_p8), 56, %v4740_v38  ;;  %v1540_v23 = vld [vmem:[#allocation2 + $0x20] sm:$0xff] (!%p2579_p8) }
 0x192   : > { %vm1664_vm0 = vcmp.lt.s32.totalorder (!%p2579_p8), %v1408_v56, 1024  ;;  %v1409_v41 = vadd.s32 (!%p2579_p8), %v4738_v26, %v1280_v54  ;;  %v1410_v33 = vadd.s32 (!%p2579_p8), %v4738_v26, %v1281_v13  ;;  %v1411_v2 = vadd.s32 (!%p2579_p8), %v4738_v26, %v1282_v24  ;;  %v1539_v51 = vld [vmem:[#allocation2 + $0x18] sm:$0xff] (!%p2579_p8)  ;;  %v5805_v13 = vld [vmem:[#allocation14_spill] sm:$0xff] (!%p2579_p8) }
 0x193   : > { %v1792_v58 = vsel (!%p2579_p8), %vm1664_vm0, %v5803_v30, 0.0  ;;  %v1412_v10 = vadd.s32 (!%p2579_p8), %v4738_v26, %v1283_v47  ;;  %v1413_v49 = vadd.s32 (!%p2579_p8), %v4738_v26, %v1284_v59  ;;  %v1414_v32 = vadd.s32 (!%p2579_p8), %v4738_v26, %v1285_v43  ;;  %v5804_v56 = vld [vmem:[#allocation13_spill] sm:$0xff] (!%p2579_p8)  ;;  %v1542_v43 = vld [vmem:[#allocation2 + $0x30] sm:$0xff] (!%p2579_p8) }
 0x194   : > { %v1920_v62 = vadd.f32 %v1792_v58, %v1536_v3  ;;  %vm1665_vm1 = vcmp.lt.s32.totalorder %v1409_v41, 1024  ;;  %vm1666_vm2 = vcmp.lt.s32.totalorder %v1410_v33, 1024  ;;  %vm1667_vm3 = vcmp.lt.s32.totalorder %v1411_v2, 1024  ;;  %v5808_v33 = vld [vmem:[#allocation17_spill] sm:$0xff] }
 0x195   : > { %v1793_v54 = vsel %vm1665_vm1, %v5804_v56, 0.0  ;;  %v1794_v24 = vsel %vm1666_vm2, %v5805_v13, 0.0  ;;  %v1795_v30 = vsel %vm1667_vm3, %v5806_v19, 0.0  ;;  %vm1668_vm4 = vcmp.lt.s32.totalorder %v1412_v10, 1024  ;;  %v5809_v19 = vld [vmem:[#allocation18_spill] sm:$0xff]  ;;  %v1543_v10 = vld [vmem:[#allocation2 + $0x38] sm:$0xff] }
 0x196   : > { %2048 = vst [vmem:[#allocation2] sm:$0xff] %v1920_v62  ;;  %v1921_v15 = vadd.f32 %v1793_v54, %v1537_v34  ;;  %v1922_v39 = vadd.f32 %v1794_v24, %v1538_v40  ;;  %v1923_v47 = vadd.f32 %v1795_v30, %v1539_v51  ;;  %v1796_v59 = vsel %vm1668_vm4, %v5807_v28, 0.0  ;;  %v1544_v56 = vld [vmem:[#allocation2 + $0x40] sm:$0xff]  ;;  %v1545_v54 = vld [vmem:[#allocation2 + $0x48] sm:$0xff]  ;;  %v1546_v30 = vld [vmem:[#allocation2 + $0x50] sm:$0xff] }
 0x197   : > { %v1924_v3 = vadd.f32 %v1796_v59, %v1540_v23  ;;  %vm1669_vm5 = vcmp.lt.s32.totalorder %v1413_v49, 1024  ;;  %vm1670_vm6 = vcmp.lt.s32.totalorder %v1414_v32, 1024  ;;  %v1415_v41 = vadd.s32 %v4738_v26, %v1286_v55  ;;  %v5810_v32 = vld [vmem:[#allocation19_spill] sm:$0xff] }
 0x198   : > { %2049 = vst [vmem:[#allocation2 + $0x8] sm:$0xff] %v1921_v15  ;;  %2050 = vst [vmem:[#allocation2 + $0x10] sm:$0xff] %v1922_v39  ;;  %v1797_v2 = vsel %vm1669_vm5, %v5808_v33, 0.0  ;;  %v1798_v58 = vsel %vm1670_vm6, %v5809_v19, 0.0  ;;  %v1287_v34 = vadd.s32 64, %v4740_v38  ;;  %v1288_v40 = vadd.s32 72, %v4740_v38 }
 0x199   : > { %2051 = vst [vmem:[#allocation2 + $0x18] sm:$0xff] %v1923_v47  ;;  %2052 = vst [vmem:[#allocation2 + $0x20] sm:$0xff] %v1924_v3  ;;  %v1925_v28 = vadd.f32 %v1797_v2, %v1541_v7  ;;  %v1926_v51 = vadd.f32 %v1798_v58, %v1542_v43  ;;  %vm1671_vm7 = vcmp.lt.s32.totalorder %v1415_v41, 1024  ;;  %v1289_v49 = vadd.s32 80, %v4740_v38  ;;  %v5811_v43 = vld [vmem:[#allocation20_spill] sm:$0xff]  ;;  %v5812_v41 = vld [vmem:[#allocation21_spill] sm:$0xff] }
 0x19a   : > { %v1799_v55 = vsel %vm1671_vm7, %v5810_v32, 0.0  ;;  %v1416_v39 = vadd.s32 %v4738_v26, %v1287_v34  ;;  %v1417_v15 = vadd.s32 %v4738_v26, %v1288_v40  ;;  %v1290_v62 = vadd.s32 88, %v4740_v38  ;;  %v1547_v2 = vld [vmem:[#allocation2 + $0x58] sm:$0xff]  ;;  %v5813_v34 = vld [vmem:[#allocation22_spill] sm:$0xff] }
 0x19b   : > { %2053 = vst [vmem:[#allocation2 + $0x28] sm:$0xff] %v1925_v28  ;;  %2054 = vst [vmem:[#allocation2 + $0x30] sm:$0xff] %v1926_v51  ;;  %v1927_v23 = vadd.f32 %v1799_v55, %v1543_v10  ;;  %v1418_v13 = vadd.s32 %v4738_v26, %v1289_v49  ;;  %v1291_v7 = vadd.s32 96, %v4740_v38  ;;  %v1292_v24 = vadd.s32 104, %v4740_v38  ;;  %v1548_v28 = vld [vmem:[#allocation2 + $0x60] sm:$0xff]  ;;  %v5814_v49 = vld [vmem:[#allocation23_spill] sm:$0xff] }
 0x19c   : > { %vm1672_vm8 = vcmp.lt.s32.totalorder %v1416_v39, 1024  ;;  %vm1673_vm9 = vcmp.lt.s32.totalorder %v1417_v15, 1024  ;;  %v1419_v47 = vadd.s32 %v4738_v26, %v1290_v62  ;;  %v1293_v59 = vadd.s32 112, %v4740_v38  ;;  %v5815_v15 = vld [vmem:[#allocation26_spill] sm:$0xff] }
 0x19d   : > { %2055 = vst [vmem:[#allocation2 + $0x38] sm:$0xff] %v1927_v23  ;;  %v1800_v3 = vsel %vm1672_vm8, %v5811_v43, 0.0  ;;  %v1801_v33 = vsel %vm1673_vm9, %v5812_v41, 0.0  ;;  %vm1674_vm10 = vcmp.lt.s32.totalorder %v1418_v13, 1024  ;;  %v1420_v19 = vadd.s32 %v4738_v26, %v1291_v7  ;;  %v1549_v23 = vld [vmem:[#allocation2 + $0x68] sm:$0xff]  ;;  %v1550_v7 = vld [vmem:[#allocation2 + $0x70] sm:$0xff] }
 0x19e   : > { %v1928_v58 = vadd.f32 %v1800_v3, %v1544_v56  ;;  %v1929_v10 = vadd.f32 %v1801_v33, %v1545_v54  ;;  %v1802_v40 = vsel %vm1674_vm10, %v5813_v34, 0.0  ;;  %vm1675_vm11 = vcmp.lt.s32.totalorder %v1419_v47, 1024  ;;  %v5817_v33 = vld [vmem:[#allocation34_spill] sm:$0xff] }
 0x19f   : > { %v1930_v51 = vadd.f32 %v1802_v40, %v1546_v30  ;;  %v1803_v32 = vsel %vm1675_vm11, %v5814_v49, 0.0  ;;  %vm1676_vm12 = vcmp.lt.s32.totalorder %v1420_v19, 1024  ;;  %v1421_v55 = vadd.s32 %v4738_v26, %v1292_v24  ;;  %v5816_v24 = vld [vmem:[#allocation29_spill] sm:$0xff]  ;;  %v1552_v40 = vld [vmem:[#allocation2 + $0x80] sm:$0xff] }
 0x1a0   : > { %2056 = vst [vmem:[#allocation2 + $0x40] sm:$0xff] %v1928_v58  ;;  %2057 = vst [vmem:[#allocation2 + $0x48] sm:$0xff] %v1929_v10  ;;  %v1931_v39 = vadd.f32 %v1803_v32, %v1547_v2  ;;  %v1804_v62 = vsel %vm1676_vm12, %v5815_v15, 0.0  ;;  %v1422_v13 = vadd.s32 %v4738_v26, %v1293_v59  ;;  %v1294_v56 = vadd.s32 120, %v4740_v38  ;;  %v1551_v19 = vld [vmem:[#allocation2 + $0x78] sm:$0xff]  ;;  %v5818_v32 = vld [vmem:[#allocation38_spill] sm:$0xff] }
 0x1a1   : > { %2058 = vst [vmem:[#allocation2 + $0x50] sm:$0xff] %v1930_v51  ;;  %v1932_v54 = vadd.f32 %v1804_v62, %v1548_v28  ;;  %vm1677_vm13 = vcmp.lt.s32.totalorder %v1421_v55, 1024  ;;  %v1295_v30 = vadd.s32 128, %v4740_v38  ;;  %v1296_v47 = vadd.s32 136, %v4740_v38  ;;  %v1553_v28 = vld [vmem:[#allocation2 + $0x88] sm:$0xff] }
 0x1a2   : > { %2059 = vst [vmem:[#allocation2 + $0x58] sm:$0xff] %v1931_v39  ;;  %v1805_v43 = vsel %vm1677_vm13, %v5816_v24, 0.0  ;;  %vm1678_vm14 = vcmp.lt.s32.totalorder %v1422_v13, 1024  ;;  %v1423_v3 = vadd.s32 %v4738_v26, %v1294_v56  ;;  %v1297_v41 = vadd.s32 144, %v4740_v38  ;;  %v1554_v39 = vld [vmem:[#allocation2 + $0x90] sm:$0xff] }
 0x1a3   : > { %2060 = vst [vmem:[#allocation2 + $0x60] sm:$0xff] %v1932_v54  ;;  %v1933_v59 = vadd.f32 %v1805_v43, %v1549_v23  ;;  %v1806_v2 = vsel %vm1678_vm14, %v5817_v33, 0.0  ;;  %v1424_v58 = vadd.s32 %v4738_v26, %v1295_v30  ;;  %v1425_v10 = vadd.s32 %v4738_v26, %v1296_v47  ;;  %v5819_v23 = vld [vmem:[#allocation43_spill] sm:$0xff]  ;;  %v5820_v56 = vld [vmem:[#allocation48_spill] sm:$0xff]  ;;  %v5821_v47 = vld [vmem:[#allocation53_spill] sm:$0xff] }
 0x1a4   : > { %v1934_v34 = vadd.f32 %v1806_v2, %v1550_v7  ;;  %vm1679_vm15 = vcmp.lt.s32.totalorder %v1423_v3, 1024  ;;  %v1426_v51 = vadd.s32 %v4738_v26, %v1297_v41  ;;  %v1298_v49 = vadd.s32 152, %v4740_v38  ;;  %v1555_v41 = vld [vmem:[#allocation2 + $0x98] sm:$0xff] }
 0x1a5   : > { %2061 = vst [vmem:[#allocation2 + $0x68] sm:$0xff] %v1933_v59  ;;  %v1807_v55 = vsel %vm1679_vm15, %v5818_v32, 0.0  ;;  %vm1680_vm0 = vcmp.lt.s32.totalorder %v1424_v58, 1024  ;;  %vm1681_vm1 = vcmp.lt.s32.totalorder %v1425_v10, 1024  ;;  %v1299_v15 = vadd.s32 160, %v4740_v38 }
 0x1a6   : > { %2062 = vst [vmem:[#allocation2 + $0x70] sm:$0xff] %v1934_v34  ;;  %v1935_v62 = vadd.f32 %v1807_v55, %v1551_v19  ;;  %v1808_v13 = vsel %vm1680_vm0, %v5819_v23, 0.0  ;;  %v1809_v54 = vsel %vm1681_vm1, %v5820_v56, 0.0  ;;  %vm1682_vm2 = vcmp.lt.s32.totalorder %v1426_v51, 1024  ;;  %v1556_v19 = vld [vmem:[#allocation2 + $0xa0] sm:$0xff]  ;;  %v5823_v55 = vld [vmem:[#allocation63_spill] sm:$0xff] }
 0x1a7   : > { %v1936_v7 = vadd.f32 %v1808_v13, %v1552_v40  ;;  %v1937_v30 = vadd.f32 %v1809_v54, %v1553_v28  ;;  %v1810_v24 = vsel %vm1682_vm2, %v5821_v47, 0.0  ;;  %v1427_v43 = vadd.s32 %v4738_v26, %v1298_v49  ;;  %v5822_v40 = vld [vmem:[#allocation58_spill] sm:$0xff]  ;;  %v1559_v54 = vld [vmem:[#allocation2 + $0xb8] sm:$0xff]  ;;  %v5824_v47 = vld [vmem:[#allocation68_spill] sm:$0xff] }
 0x1a8   : > { %2063 = vst [vmem:[#allocation2 + $0x78] sm:$0xff] %v1935_v62  ;;  %v1938_v3 = vadd.f32 %v1810_v24, %v1554_v39  ;;  %v1428_v59 = vadd.s32 %v4738_v26, %v1299_v15  ;;  %v1300_v33 = vadd.s32 168, %v4740_v38  ;;  %v1301_v2 = vadd.s32 176, %v4740_v38  ;;  %v1557_v15 = vld [vmem:[#allocation2 + $0xa8] sm:$0xff]  ;;  %v1558_v62 = vld [vmem:[#allocation2 + $0xb0] sm:$0xff] }
 0x1a9   : > { %2064 = vst [vmem:[#allocation2 + $0x80] sm:$0xff] %v1936_v7  ;;  %2065 = vst [vmem:[#allocation2 + $0x88] sm:$0xff] %v1937_v30  ;;  %vm1683_vm3 = vcmp.lt.s32.totalorder %v1427_v43, 1024  ;;  %v1302_v58 = vadd.s32 184, %v4740_v38  ;;  %v1303_v10 = vadd.s32 192, %v4740_v38  ;;  %v1304_v34 = vadd.s32 200, %v4740_v38 }
 0x1aa   : > { %2066 = vst [vmem:[#allocation2 + $0x90] sm:$0xff] %v1938_v3  ;;  %v1811_v28 = vsel %vm1683_vm3, %v5822_v40, 0.0  ;;  %vm1684_vm4 = vcmp.lt.s32.totalorder %v1428_v59, 1024  ;;  %v1429_v51 = vadd.s32 %v4738_v26, %v1300_v33  ;;  %v1430_v49 = vadd.s32 %v4738_v26, %v1301_v2  ;;  %v1560_v7 = vld [vmem:[#allocation2 + $0xc0] sm:$0xff]  ;;  %v5825_v43 = vld [vmem:[#allocation73_spill] sm:$0xff] }
 0x1ab   : > { %v1939_v32 = vadd.f32 %v1811_v28, %v1555_v41  ;;  %v1812_v39 = vsel %vm1684_vm4, %v5823_v55, 0.0  ;;  %v1431_v23 = vadd.s32 %v4738_v26, %v1302_v58  ;;  %v1432_v13 = vadd.s32 %v4738_v26, %v1303_v10  ;;  %v5826_v33 = vld [vmem:[#allocation78_spill] sm:$0xff]  ;;  %v5827_v58 = vld [vmem:[#allocation83_spill] sm:$0xff] }
 0x1ac   : > { %v1940_v56 = vadd.f32 %v1812_v39, %v1556_v19  ;;  %vm1685_vm5 = vcmp.lt.s32.totalorder %v1429_v51, 1024  ;;  %vm1686_vm6 = vcmp.lt.s32.totalorder %v1430_v49, 1024  ;;  %v1433_v30 = vadd.s32 %v4738_v26, %v1304_v34  ;;  %v1561_v10 = vld [vmem:[#allocation2 + $0xc8] sm:$0xff]  ;;  %v5828_v51 = vld [vmem:[#allocation89_spill] sm:$0xff] }
 0x1ad   : > { %2067 = vst [vmem:[#allocation2 + $0x98] sm:$0xff] %v1939_v32  ;;  %v1813_v24 = vsel %vm1685_vm5, %v5824_v47, 0.0  ;;  %v1814_v3 = vsel %vm1686_vm6, %v5825_v43, 0.0  ;;  %vm1687_vm7 = vcmp.lt.s32.totalorder %v1431_v23, 1024  ;;  %vm1688_vm8 = vcmp.lt.s32.totalorder %v1432_v13, 1024  ;;  %v1564_v43 = vld [vmem:[#allocation2 + $0xe0] sm:$0xff] }
 0x1ae   : > { %2068 = vst [vmem:[#allocation2 + $0xa0] sm:$0xff] %v1940_v56  ;;  %v1941_v41 = vadd.f32 %v1813_v24, %v1557_v15  ;;  %v1942_v59 = vadd.f32 %v1814_v3, %v1558_v62  ;;  %v1815_v2 = vsel %vm1687_vm7, %v5826_v33, 0.0  ;;  %v1816_v19 = vsel %vm1688_vm8, %v5827_v58, 0.0  ;;  %v1562_v56 = vld [vmem:[#allocation2 + $0xd0] sm:$0xff]  ;;  %v1563_v24 = vld [vmem:[#allocation2 + $0xd8] sm:$0xff]  ;;  %v1565_v3 = vld [vmem:[#allocation2 + $0xe8] sm:$0xff] }
 0x1af   : > { %v1943_v40 = vadd.f32 %v1815_v2, %v1559_v54  ;;  %v1944_v28 = vadd.f32 %v1816_v19, %v1560_v7  ;;  %vm1689_vm9 = vcmp.lt.s32.totalorder %v1433_v30, 1024  ;;  %v1305_v34 = vadd.s32 208, %v4740_v38  ;;  %v5829_v2 = vld [vmem:[#allocation96_spill] sm:$0xff] }
 0x1b0   : > { %2069 = vst [vmem:[#allocation2 + $0xa8] sm:$0xff] %v1941_v41  ;;  %2070 = vst [vmem:[#allocation2 + $0xb0] sm:$0xff] %v1942_v59  ;;  %v1817_v49 = vsel %vm1689_vm9, %v5828_v51, 0.0  ;;  %v1306_v32 = vadd.s32 216, %v4740_v38  ;;  %v1307_v55 = vadd.s32 224, %v4740_v38  ;;  %v1308_v39 = vadd.s32 232, %v4740_v38 }
 0x1b1   : > { %2071 = vst [vmem:[#allocation2 + $0xb8] sm:$0xff] %v1943_v40  ;;  %2072 = vst [vmem:[#allocation2 + $0xc0] sm:$0xff] %v1944_v28  ;;  %v1945_v15 = vadd.f32 %v1817_v49, %v1561_v10  ;;  %v1434_v62 = vadd.s32 %v4738_v26, %v1305_v34  ;;  %v1309_v23 = vadd.s32 240, %v4740_v38  ;;  %v1310_v13 = vadd.s32 248, %v4740_v38  ;;  %v5830_v10 = vld [vmem:[#allocation103_spill] sm:$0xff]  ;;  %v5831_v28 = vld [vmem:[#allocation109_spill] sm:$0xff] }
 0x1b2   : > { %v1435_v54 = vadd.s32 %v4738_v26, %v1306_v32  ;;  %v1436_v7 = vadd.s32 %v4738_v26, %v1307_v55  ;;  %v1437_v30 = vadd.s32 %v4738_v26, %v1308_v39  ;;  %v1311_v47 = vadd.s32 256, %v4740_v38  ;;  %v5832_v51 = vld [vmem:[#allocation116_spill] sm:$0xff] }
 0x1b3   : > { %2073 = vst [vmem:[#allocation2 + $0xc8] sm:$0xff] %v1945_v15  ;;  %vm1690_vm10 = vcmp.lt.s32.totalorder %v1434_v62, 1024  ;;  %v1438_v41 = vadd.s32 %v4738_v26, %v1309_v23  ;;  %v1439_v59 = vadd.s32 %v4738_v26, %v1310_v13  ;;  %v1312_v33 = vadd.s32 264, %v4740_v38  ;;  %v1566_v32 = vld [vmem:[#allocation2 + $0xf0] sm:$0xff]  ;;  %v1567_v62 = vld [vmem:[#allocation2 + $0xf8] sm:$0xff] }
 0x1b4   : > { %v1818_v58 = vsel %vm1690_vm10, %v5829_v2, 0.0  ;;  %vm1691_vm11 = vcmp.lt.s32.totalorder %v1435_v54, 1024  ;;  %vm1692_vm12 = vcmp.lt.s32.totalorder %v1436_v7, 1024  ;;  %vm1693_vm13 = vcmp.lt.s32.totalorder %v1437_v30, 1024  ;;  %v5833_v23 = vld [vmem:[#allocation121_spill] sm:$0xff]  ;;  %v5834_v30 = vld [vmem:[#allocation31_spill] sm:$0xff] }
 0x1b5   : > { %v1946_v19 = vadd.f32 %v1818_v58, %v1562_v56  ;;  %v1819_v40 = vsel %vm1691_vm11, %v5830_v10, 0.0  ;;  %v1820_v34 = vsel %vm1692_vm12, %v5831_v28, 0.0  ;;  %v1821_v49 = vsel %vm1693_vm13, %v5832_v51, 0.0  ;;  %v1568_v58 = vld [vmem:[#allocation2 + $0x100] sm:$0xff] }
 0x1b6   : > { %v1947_v55 = vadd.f32 %v1819_v40, %v1563_v24  ;;  %v1948_v39 = vadd.f32 %v1820_v34, %v1564_v43  ;;  %v1949_v15 = vadd.f32 %v1821_v49, %v1565_v3  ;;  %vm1694_vm14 = vcmp.lt.s32.totalorder %v1438_v41, 1024  ;;  %v1569_v24 = vld [vmem:[#allocation2 + $0x108] sm:$0xff]  ;;  %v1570_v49 = vld [vmem:[#allocation2 + $0x110] sm:$0xff] }
 0x1b7   : > { %2074 = vst [vmem:[#allocation2 + $0xd0] sm:$0xff] %v1946_v19  ;;  %v1822_v13 = vsel %vm1694_vm14, %v5833_v23, 0.0  ;;  %vm1695_vm15 = vcmp.lt.s32.totalorder %v1439_v59, 1024  ;;  %v1440_v54 = vadd.s32 %v4738_v26, %v1311_v47  ;;  %v1441_v56 = vadd.s32 %v4738_v26, %v1312_v33  ;;  %v5835_v47 = vld [vmem:[#allocation24_spill] sm:$0xff]  ;;  %v5836_v19 = vld [vmem:[#allocation25_spill] sm:$0xff] }
 0x1b8   : > { %2075 = vst [vmem:[#allocation2 + $0xd8] sm:$0xff] %v1947_v55  ;;  %2076 = vst [vmem:[#allocation2 + $0xe0] sm:$0xff] %v1948_v39  ;;  %v1950_v7 = vadd.f32 %v1822_v13, %v1566_v32  ;;  %v1823_v2 = vsel %vm1695_vm15, %v5834_v30, 0.0  ;;  %v1313_v43 = vadd.s32 272, %v4740_v38  ;;  %v1314_v3 = vadd.s32 280, %v4740_v38  ;;  %v1571_v32 = vld [vmem:[#allocation2 + $0x118] sm:$0xff] }
 0x1b9   : > { %2077 = vst [vmem:[#allocation2 + $0xe8] sm:$0xff] %v1949_v15  ;;  %v1951_v41 = vadd.f32 %v1823_v2, %v1567_v62  ;;  %vm1696_vm0 = vcmp.lt.s32.totalorder %v1440_v54, 1024  ;;  %vm1697_vm1 = vcmp.lt.s32.totalorder %v1441_v56, 1024  ;;  %v1315_v59 = vadd.s32 288, %v4740_v38  ;;  %v1572_v15 = vld [vmem:[#allocation2 + $0x120] sm:$0xff]  ;;  %v5837_v13 = vld [vmem:[#allocation131_spill] sm:$0xff] }
 0x1ba   : > { %2078 = vst [vmem:[#allocation2 + $0xf0] sm:$0xff] %v1950_v7  ;;  %v1824_v33 = vsel %vm1696_vm0, %v5835_v47, 0.0  ;;  %v1825_v10 = vsel %vm1697_vm1, %v5836_v19, 0.0  ;;  %v1442_v40 = vadd.s32 %v4738_v26, %v1313_v43  ;;  %v1443_v28 = vadd.s32 %v4738_v26, %v1314_v3  ;;  %v5838_v56 = vld [vmem:[#allocation27_spill] sm:$0xff]  ;;  %v1574_v47 = vld [vmem:[#allocation2 + $0x130] sm:$0xff] }
 0x1bb   : > { %2079 = vst [vmem:[#allocation2 + $0xf8] sm:$0xff] %v1951_v41  ;;  %v1952_v34 = vadd.f32 %v1824_v33, %v1568_v58  ;;  %v1953_v51 = vadd.f32 %v1825_v10, %v1569_v24  ;;  %v1444_v55 = vadd.s32 %v4738_v26, %v1315_v59  ;;  %v1316_v39 = vadd.s32 296, %v4740_v38  ;;  %v5839_v24 = vld [vmem:[#allocation28_spill] sm:$0xff]  ;;  %v1573_v3 = vld [vmem:[#allocation2 + $0x128] sm:$0xff] }
 0x1bc   : > { %vm1698_vm2 = vcmp.lt.s32.totalorder %v1442_v40, 1024  ;;  %vm1699_vm3 = vcmp.lt.s32.totalorder %v1443_v28, 1024  ;;  %v1317_v62 = vadd.s32 304, %v4740_v38  ;;  %v1318_v23 = vadd.s32 312, %v4740_v38  ;;  %v5840_v10 = vld [vmem:[#allocation40_spill] sm:$0xff]  ;;  %v1575_v28 = vld [vmem:[#allocation2 + $0x138] sm:$0xff] }
 0x1bd   : > { %2080 = vst [vmem:[#allocation2 + $0x100] sm:$0xff] %v1952_v34  ;;  %2081 = vst [vmem:[#allocation2 + $0x108] sm:$0xff] %v1953_v51  ;;  %v1826_v54 = vsel %vm1698_vm2, %v5837_v13, 0.0  ;;  %v1827_v7 = vsel %vm1699_vm3, %v5838_v56, 0.0  ;;  %vm1700_vm4 = vcmp.lt.s32.totalorder %v1444_v55, 1024  ;;  %v1445_v30 = vadd.s32 %v4738_v26, %v1316_v39  ;;  %v1576_v13 = vld [vmem:[#allocation2 + $0x140] sm:$0xff] }
 0x1be   : > { %v1954_v2 = vadd.f32 %v1826_v54, %v1570_v49  ;;  %v1955_v58 = vadd.f32 %v1827_v7, %v1571_v32  ;;  %v1828_v43 = vsel %vm1700_vm4, %v5839_v24, 0.0  ;;  %v1446_v41 = vadd.s32 %v4738_v26, %v1317_v62  ;;  %v5841_v32 = vld [vmem:[#allocation41_spill] sm:$0xff]  ;;  %v5842_v62 = vld [vmem:[#allocation30_spill] sm:$0xff] }
 0x1bf   : > { %v1956_v59 = vadd.f32 %v1828_v43, %v1572_v15  ;;  %vm1701_vm5 = vcmp.lt.s32.totalorder %v1445_v30, 1024  ;;  %v1447_v33 = vadd.s32 %v4738_v26, %v1318_v23  ;;  %v1319_v19 = vadd.s32 320, %v4740_v38  ;;  %v1577_v30 = vld [vmem:[#allocation2 + $0x148] sm:$0xff]  ;;  %v5843_v43 = vld [vmem:[#allocation42_spill] sm:$0xff] }
 0x1c0   : > { %2082 = vst [vmem:[#allocation2 + $0x110] sm:$0xff] %v1954_v2  ;;  %2083 = vst [vmem:[#allocation2 + $0x118] sm:$0xff] %v1955_v58  ;;  %v1829_v40 = vsel %vm1701_vm5, %v5840_v10, 0.0  ;;  %vm1702_vm6 = vcmp.lt.s32.totalorder %v1446_v41, 1024  ;;  %v1320_v34 = vadd.s32 328, %v4740_v38  ;;  %v1321_v51 = vadd.s32 336, %v4740_v38 }
 0x1c1   : > { %2084 = vst [vmem:[#allocation2 + $0x120] sm:$0xff] %v1956_v59  ;;  %v1957_v49 = vadd.f32 %v1829_v40, %v1573_v3  ;;  %v1830_v55 = vsel %vm1702_vm6, %v5841_v32, 0.0  ;;  %vm1703_vm7 = vcmp.lt.s32.totalorder %v1447_v33, 1024  ;;  %v1448_v39 = vadd.s32 %v4738_v26, %v1319_v19  ;;  %v1578_v2 = vld [vmem:[#allocation2 + $0x150] sm:$0xff]  ;;  %v5845_v19 = vld [vmem:[#allocation46_spill] sm:$0xff] }
 0x1c2   : > { %v1958_v15 = vadd.f32 %v1830_v55, %v1574_v47  ;;  %v1831_v23 = vsel %vm1703_vm7, %v5842_v62, 0.0  ;;  %v1449_v54 = vadd.s32 %v4738_v26, %v1320_v34  ;;  %v1450_v56 = vadd.s32 %v4738_v26, %v1321_v51  ;;  %v5844_v47 = vld [vmem:[#allocation45_spill] sm:$0xff]  ;;  %v1580_v55 = vld [vmem:[#allocation2 + $0x160] sm:$0xff] }
 0x1c3   : > { %2085 = vst [vmem:[#allocation2 + $0x128] sm:$0xff] %v1957_v49  ;;  %v1959_v7 = vadd.f32 %v1831_v23, %v1575_v28  ;;  %vm1704_vm8 = vcmp.lt.s32.totalorder %v1448_v39, 1024  ;;  %v1322_v58 = vadd.s32 344, %v4740_v38  ;;  %v1323_v24 = vadd.s32 352, %v4740_v38  ;;  %v1579_v51 = vld [vmem:[#allocation2 + $0x158] sm:$0xff]  ;;  %v1581_v39 = vld [vmem:[#allocation2 + $0x168] sm:$0xff] }
 0x1c4   : > { %2086 = vst [vmem:[#allocation2 + $0x130] sm:$0xff] %v1958_v15  ;;  %v1832_v3 = vsel %vm1704_vm8, %v5843_v43, 0.0  ;;  %vm1705_vm9 = vcmp.lt.s32.totalorder %v1449_v54, 1024  ;;  %vm1706_vm10 = vcmp.lt.s32.totalorder %v1450_v56, 1024  ;;  %v1324_v41 = vadd.s32 360, %v4740_v38 }
 0x1c5   : > { %2087 = vst [vmem:[#allocation2 + $0x138] sm:$0xff] %v1959_v7  ;;  %v1960_v59 = vadd.f32 %v1832_v3, %v1576_v13  ;;  %v1833_v33 = vsel %vm1705_vm9, %v5844_v47, 0.0  ;;  %v1834_v10 = vsel %vm1706_vm10, %v5845_v19, 0.0  ;;  %v1451_v40 = vadd.s32 %v4738_v26, %v1322_v58  ;;  %v5846_v13 = vld [vmem:[#allocation35_spill] sm:$0xff]  ;;  %v5848_v58 = vld [vmem:[#allocation50_spill] sm:$0xff]  ;;  %v1583_v19 = vld [vmem:[#allocation2 + $0x178] sm:$0xff] }
 0x1c6   : > { %v1961_v28 = vadd.f32 %v1833_v33, %v1577_v30  ;;  %v1962_v34 = vadd.f32 %v1834_v10, %v1578_v2  ;;  %v1452_v49 = vadd.s32 %v4738_v26, %v1323_v24  ;;  %v1453_v32 = vadd.s32 %v4738_v26, %v1324_v41  ;;  %v5847_v30 = vld [vmem:[#allocation47_spill] sm:$0xff]  ;;  %v1584_v10 = vld [vmem:[#allocation2 + $0x180] sm:$0xff] }
 0x1c7   : > { %2088 = vst [vmem:[#allocation2 + $0x140] sm:$0xff] %v1960_v59  ;;  %vm1707_vm11 = vcmp.lt.s32.totalorder %v1451_v40, 1024  ;;  %v1325_v15 = vadd.s32 368, %v4740_v38  ;;  %v1326_v62 = vadd.s32 376, %v4740_v38  ;;  %v1327_v23 = vadd.s32 384, %v4740_v38  ;;  %v1582_v59 = vld [vmem:[#allocation2 + $0x170] sm:$0xff] }
 0x1c8   : > { %2089 = vst [vmem:[#allocation2 + $0x148] sm:$0xff] %v1961_v28  ;;  %2090 = vst [vmem:[#allocation2 + $0x150] sm:$0xff] %v1962_v34  ;;  %v1835_v54 = vsel %vm1707_vm11, %v5846_v13, 0.0  ;;  %vm1708_vm12 = vcmp.lt.s32.totalorder %v1452_v49, 1024  ;;  %vm1709_vm13 = vcmp.lt.s32.totalorder %v1453_v32, 1024  ;;  %v1328_v56 = vadd.s32 392, %v4740_v38 }
 0x1c9   : > { %v1963_v7 = vadd.f32 %v1835_v54, %v1579_v51  ;;  %v1836_v2 = vsel %vm1708_vm12, %v5847_v30, 0.0  ;;  %v1837_v24 = vsel %vm1709_vm13, %v5848_v58, 0.0  ;;  %v1454_v43 = vadd.s32 %v4738_v26, %v1325_v15  ;;  %v5849_v51 = vld [vmem:[#allocation51_spill] sm:$0xff] }
 0x1ca   : > { %v1964_v3 = vadd.f32 %v1836_v2, %v1580_v55  ;;  %v1965_v41 = vadd.f32 %v1837_v24, %v1581_v39  ;;  %v1455_v47 = vadd.s32 %v4738_v26, %v1326_v62  ;;  %v1456_v33 = vadd.s32 %v4738_v26, %v1327_v23  ;;  %v1585_v32 = vld [vmem:[#allocation2 + $0x188] sm:$0xff]  ;;  %v5851_v23 = vld [vmem:[#allocation52_spill] sm:$0xff] }
 0x1cb   : > { %2091 = vst [vmem:[#allocation2 + $0x158] sm:$0xff] %v1963_v7  ;;  %vm1710_vm14 = vcmp.lt.s32.totalorder %v1454_v43, 1024  ;;  %v1457_v40 = vadd.s32 %v4738_v26, %v1328_v56  ;;  %v1329_v28 = vadd.s32 400, %v4740_v38  ;;  %v1330_v34 = vadd.s32 408, %v4740_v38  ;;  %v5850_v15 = vld [vmem:[#allocation39_spill] sm:$0xff]  ;;  %v1586_v24 = vld [vmem:[#allocation2 + $0x190] sm:$0xff] }
 0x1cc   : > { %2092 = vst [vmem:[#allocation2 + $0x160] sm:$0xff] %v1964_v3  ;;  %2093 = vst [vmem:[#allocation2 + $0x168] sm:$0xff] %v1965_v41  ;;  %v1838_v49 = vsel %vm1710_vm14, %v5849_v51, 0.0  ;;  %vm1711_vm15 = vcmp.lt.s32.totalorder %v1455_v47, 1024  ;;  %vm1712_vm0 = vcmp.lt.s32.totalorder %v1456_v33, 1024  ;;  %v1331_v55 = vadd.s32 416, %v4740_v38 }
 0x1cd   : > { %v1966_v39 = vadd.f32 %v1838_v49, %v1582_v59  ;;  %v1839_v62 = vsel %vm1711_vm15, %v5850_v15, 0.0  ;;  %v1840_v13 = vsel %vm1712_vm0, %v5851_v23, 0.0  ;;  %vm1713_vm1 = vcmp.lt.s32.totalorder %v1457_v40, 1024  ;;  %v5852_v7 = vld [vmem:[#allocation55_spill] sm:$0xff]  ;;  %v1587_v59 = vld [vmem:[#allocation2 + $0x198] sm:$0xff]  ;;  %v1588_v47 = vld [vmem:[#allocation2 + $0x1a0] sm:$0xff] }
 0x1ce   : > { %v1967_v54 = vadd.f32 %v1839_v62, %v1583_v19  ;;  %v1968_v56 = vadd.f32 %v1840_v13, %v1584_v10  ;;  %v1841_v30 = vsel %vm1713_vm1, %v5852_v7, 0.0  ;;  %v1458_v2 = vadd.s32 %v4738_v26, %v1329_v28  ;;  %v5853_v40 = vld [vmem:[#allocation56_spill] sm:$0xff]  ;;  %v1589_v15 = vld [vmem:[#allocation2 + $0x1a8] sm:$0xff]  ;;  %v5856_v7 = vld [vmem:[#allocation49_spill] sm:$0xff] }
 0x1cf   : > { %2094 = vst [vmem:[#allocation2 + $0x170] sm:$0xff] %v1966_v39  ;;  %v1969_v58 = vadd.f32 %v1841_v30, %v1585_v32  ;;  %v1459_v43 = vadd.s32 %v4738_v26, %v1330_v34  ;;  %v1460_v3 = vadd.s32 %v4738_v26, %v1331_v55  ;;  %v1332_v41 = vadd.s32 424, %v4740_v38  ;;  %v5854_v49 = vld [vmem:[#allocation44_spill] sm:$0xff]  ;;  %v5855_v55 = vld [vmem:[#allocation57_spill] sm:$0xff] }
 0x1d0   : > { %2095 = vst [vmem:[#allocation2 + $0x178] sm:$0xff] %v1967_v54  ;;  %2096 = vst [vmem:[#allocation2 + $0x180] sm:$0xff] %v1968_v56  ;;  %vm1714_vm2 = vcmp.lt.s32.totalorder %v1458_v2, 1024  ;;  %v1333_v33 = vadd.s32 432, %v4740_v38  ;;  %v1334_v19 = vadd.s32 440, %v4740_v38  ;;  %v1335_v10 = vadd.s32 448, %v4740_v38 }
 0x1d1   : > { %2097 = vst [vmem:[#allocation2 + $0x188] sm:$0xff] %v1969_v58  ;;  %v1842_v28 = vsel %vm1714_vm2, %v5853_v40, 0.0  ;;  %vm1715_vm3 = vcmp.lt.s32.totalorder %v1459_v43, 1024  ;;  %vm1716_vm4 = vcmp.lt.s32.totalorder %v1460_v3, 1024  ;;  %v1461_v34 = vadd.s32 %v4738_v26, %v1332_v41  ;;  %v1590_v54 = vld [vmem:[#allocation2 + $0x1b0] sm:$0xff]  ;;  %v1591_v2 = vld [vmem:[#allocation2 + $0x1b8] sm:$0xff] }
 0x1d2   : > { %v1970_v51 = vadd.f32 %v1842_v28, %v1586_v24  ;;  %v1843_v32 = vsel %vm1715_vm3, %v5854_v49, 0.0  ;;  %v1844_v39 = vsel %vm1716_vm4, %v5855_v55, 0.0  ;;  %v1462_v62 = vadd.s32 %v4738_v26, %v1333_v33  ;;  %v5857_v3 = vld [vmem:[#allocation62_spill] sm:$0xff]  ;;  %v1593_v49 = vld [vmem:[#allocation2 + $0x1c8] sm:$0xff] }
 0x1d3   : > { %v1971_v23 = vadd.f32 %v1843_v32, %v1587_v59  ;;  %v1972_v13 = vadd.f32 %v1844_v39, %v1588_v47  ;;  %vm1717_vm5 = vcmp.lt.s32.totalorder %v1461_v34, 1024  ;;  %v1463_v56 = vadd.s32 %v4738_v26, %v1334_v19  ;;  %v1592_v59 = vld [vmem:[#allocation2 + $0x1c0] sm:$0xff]  ;;  %v5858_v19 = vld [vmem:[#allocation65_spill] sm:$0xff] }
 0x1d4   : > { %2098 = vst [vmem:[#allocation2 + $0x190] sm:$0xff] %v1970_v51  ;;  %v1845_v30 = vsel %vm1717_vm5, %v5856_v7, 0.0  ;;  %vm1718_vm6 = vcmp.lt.s32.totalorder %v1462_v62, 1024  ;;  %v1464_v58 = vadd.s32 %v4738_v26, %v1335_v10  ;;  %v1336_v24 = vadd.s32 456, %v4740_v38  ;;  %v5859_v10 = vld [vmem:[#allocation67_spill] sm:$0xff] }
 0x1d5   : > { %2099 = vst [vmem:[#allocation2 + $0x198] sm:$0xff] %v1971_v23  ;;  %2100 = vst [vmem:[#allocation2 + $0x1a0] sm:$0xff] %v1972_v13  ;;  %v1973_v43 = vadd.f32 %v1845_v30, %v1589_v15  ;;  %v1846_v41 = vsel %vm1718_vm6, %v5857_v3, 0.0  ;;  %vm1719_vm7 = vcmp.lt.s32.totalorder %v1463_v56, 1024  ;;  %v1337_v47 = vadd.s32 464, %v4740_v38  ;;  %v1594_v15 = vld [vmem:[#allocation2 + $0x1d0] sm:$0xff] }
 0x1d6   : > { %v1974_v33 = vadd.f32 %v1846_v41, %v1590_v54  ;;  %v1847_v40 = vsel %vm1719_vm7, %v5858_v19, 0.0  ;;  %vm1720_vm8 = vcmp.lt.s32.totalorder %v1464_v58, 1024  ;;  %v1465_v28 = vadd.s32 %v4738_v26, %v1336_v24  ;;  %v5860_v13 = vld [vmem:[#allocation70_spill] sm:$0xff]  ;;  %v1595_v24 = vld [vmem:[#allocation2 + $0x1d8] sm:$0xff] }
 0x1d7   : > { %2101 = vst [vmem:[#allocation2 + $0x1a8] sm:$0xff] %v1973_v43  ;;  %v1975_v34 = vadd.f32 %v1847_v40, %v1591_v2  ;;  %v1848_v51 = vsel %vm1720_vm8, %v5859_v10, 0.0  ;;  %v1466_v32 = vadd.s32 %v4738_v26, %v1337_v47  ;;  %v1338_v55 = vadd.s32 472, %v4740_v38  ;;  %v5861_v2 = vld [vmem:[#allocation71_spill] sm:$0xff] }
 0x1d8   : > { %2102 = vst [vmem:[#allocation2 + $0x1b0] sm:$0xff] %v1974_v33  ;;  %v1976_v39 = vadd.f32 %v1848_v51, %v1592_v59  ;;  %vm1721_vm9 = vcmp.lt.s32.totalorder %v1465_v28, 1024  ;;  %v1339_v62 = vadd.s32 480, %v4740_v38  ;;  %v1340_v23 = vadd.s32 488, %v4740_v38  ;;  %v1596_v59 = vld [vmem:[#allocation2 + $0x1e0] sm:$0xff]  ;;  %v1597_v47 = vld [vmem:[#allocation2 + $0x1e8] sm:$0xff] }
 0x1d9   : > { %2103 = vst [vmem:[#allocation2 + $0x1b8] sm:$0xff] %v1975_v34  ;;  %v1849_v54 = vsel %vm1721_vm9, %v5860_v13, 0.0  ;;  %vm1722_vm10 = vcmp.lt.s32.totalorder %v1466_v32, 1024  ;;  %v1467_v56 = vadd.s32 %v4738_v26, %v1338_v55  ;;  %v1341_v7 = vadd.s32 496, %v4740_v38  ;;  %v5862_v40 = vld [vmem:[#allocation75_spill] sm:$0xff]  ;;  %v1598_v34 = vld [vmem:[#allocation2 + $0x1f0] sm:$0xff] }
 0x1da   : > { %2104 = vst [vmem:[#allocation2 + $0x1c0] sm:$0xff] %v1976_v39  ;;  %v1977_v30 = vadd.f32 %v1849_v54, %v1593_v49  ;;  %v1850_v58 = vsel %vm1722_vm10, %v5861_v2, 0.0  ;;  %v1468_v43 = vadd.s32 %v4738_v26, %v1339_v62  ;;  %v1469_v3 = vadd.s32 %v4738_v26, %v1340_v23  ;;  %v5863_v49 = vld [vmem:[#allocation76_spill] sm:$0xff]  ;;  %v5865_v23 = vld [vmem:[#allocation81_spill] sm:$0xff] }
 0x1db   : > { %v1978_v41 = vadd.f32 %v1850_v58, %v1594_v15  ;;  %vm1723_vm11 = vcmp.lt.s32.totalorder %v1467_v56, 1024  ;;  %v1470_v33 = vadd.s32 %v4738_v26, %v1341_v7  ;;  %v1342_v19 = vadd.s32 504, %v4740_v38  ;;  %v5864_v55 = vld [vmem:[#allocation64_spill] sm:$0xff]  ;;  %v1599_v7 = vld [vmem:[#allocation2 + $0x1f8] sm:$0xff] }
 0x1dc   : > { %2105 = vst [vmem:[#allocation2 + $0x1c8] sm:$0xff] %v1977_v30  ;;  %v1851_v28 = vsel %vm1723_vm11, %v5862_v40, 0.0  ;;  %vm1724_vm12 = vcmp.lt.s32.totalorder %v1468_v43, 1024  ;;  %vm1725_vm13 = vcmp.lt.s32.totalorder %v1469_v3, 1024  ;;  %v1343_v10 = vadd.s32 512, %v4740_v38 }
 0x1dd   : > { %2106 = vst [vmem:[#allocation2 + $0x1d0] sm:$0xff] %v1978_v41  ;;  %v1979_v51 = vadd.f32 %v1851_v28, %v1595_v24  ;;  %v1852_v32 = vsel %vm1724_vm12, %v5863_v49, 0.0  ;;  %v1853_v39 = vsel %vm1725_vm13, %v5864_v55, 0.0  ;;  %vm1726_vm14 = vcmp.lt.s32.totalorder %v1470_v33, 1024  ;;  %v1600_v24 = vld [vmem:[#allocation2 + $0x200] sm:$0xff] }
 0x1de   : > { %v1980_v15 = vadd.f32 %v1852_v32, %v1596_v59  ;;  %v1981_v62 = vadd.f32 %v1853_v39, %v1597_v47  ;;  %v1854_v13 = vsel %vm1726_vm14, %v5865_v23, 0.0  ;;  %v1471_v54 = vadd.s32 %v4738_v26, %v1342_v19  ;;  %v5866_v59 = vld [vmem:[#allocation69_spill] sm:$0xff]  ;;  %v5867_v28 = vld [vmem:[#allocation82_spill] sm:$0xff] }
 0x1df   : > { %2107 = vst [vmem:[#allocation2 + $0x1d8] sm:$0xff] %v1979_v51  ;;  %v1982_v56 = vadd.f32 %v1854_v13, %v1598_v34  ;;  %v1472_v30 = vadd.s32 %v4738_v26, %v1343_v10  ;;  %v1344_v2 = vadd.s32 520, %v4740_v38  ;;  %v1345_v58 = vadd.s32 528, %v4740_v38  ;;  %v1601_v10 = vld [vmem:[#allocation2 + $0x208] sm:$0xff]  ;;  %v1602_v51 = vld [vmem:[#allocation2 + $0x210] sm:$0xff]  ;;  %v1603_v39 = vld [vmem:[#allocation2 + $0x218] sm:$0xff] }
 0x1e0   : > { %2108 = vst [vmem:[#allocation2 + $0x1e0] sm:$0xff] %v1980_v15  ;;  %2109 = vst [vmem:[#allocation2 + $0x1e8] sm:$0xff] %v1981_v62  ;;  %vm1727_vm15 = vcmp.lt.s32.totalorder %v1471_v54, 1024  ;;  %v1346_v43 = vadd.s32 536, %v4740_v38  ;;  %v1347_v3 = vadd.s32 544, %v4740_v38  ;;  %v1348_v41 = vadd.s32 552, %v4740_v38 }
 0x1e1   : > { %2110 = vst [vmem:[#allocation2 + $0x1f0] sm:$0xff] %v1982_v56  ;;  %v1855_v47 = vsel %vm1727_vm15, %v5866_v59, 0.0  ;;  %vm1728_vm0 = vcmp.lt.s32.totalorder %v1472_v30, 1024  ;;  %v1473_v33 = vadd.s32 %v4738_v26, %v1344_v2  ;;  %v1474_v19 = vadd.s32 %v4738_v26, %v1345_v58  ;;  %v1604_v15 = vld [vmem:[#allocation2 + $0x220] sm:$0xff]  ;;  %v5869_v54 = vld [vmem:[#allocation87_spill] sm:$0xff] }
 0x1e2   : > { %v1983_v40 = vadd.f32 %v1855_v47, %v1599_v7  ;;  %v1856_v34 = vsel %vm1728_vm0, %v5867_v28, 0.0  ;;  %v1475_v49 = vadd.s32 %v4738_v26, %v1346_v43  ;;  %v1476_v32 = vadd.s32 %v4738_v26, %v1347_v3  ;;  %v5868_v23 = vld [vmem:[#allocation86_spill] sm:$0xff]  ;;  %v5871_v43 = vld [vmem:[#allocation88_spill] sm:$0xff]  ;;  %v1605_v3 = vld [vmem:[#allocation2 + $0x228] sm:$0xff] }
 0x1e3   : > { %v1984_v55 = vadd.f32 %v1856_v34, %v1600_v24  ;;  %vm1729_vm1 = vcmp.lt.s32.totalorder %v1473_v33, 1024  ;;  %vm1730_vm2 = vcmp.lt.s32.totalorder %v1474_v19, 1024  ;;  %v1477_v62 = vadd.s32 %v4738_v26, %v1348_v41  ;;  %v5870_v2 = vld [vmem:[#allocation74_spill] sm:$0xff]  ;;  %v5872_v33 = vld [vmem:[#allocation93_spill] sm:$0xff] }
 0x1e4   : > { %2111 = vst [vmem:[#allocation2 + $0x1f8] sm:$0xff] %v1983_v40  ;;  %v1857_v13 = vsel %vm1729_vm1, %v5868_v23, 0.0  ;;  %v1858_v56 = vsel %vm1730_vm2, %v5869_v54, 0.0  ;;  %vm1731_vm3 = vcmp.lt.s32.totalorder %v1475_v49, 1024  ;;  %vm1732_vm4 = vcmp.lt.s32.totalorder %v1476_v32, 1024  ;;  %v1608_v54 = vld [vmem:[#allocation2 + $0x240] sm:$0xff] }
 0x1e5   : > { %2112 = vst [vmem:[#allocation2 + $0x200] sm:$0xff] %v1984_v55  ;;  %v1985_v7 = vadd.f32 %v1857_v13, %v1601_v10  ;;  %v1986_v30 = vadd.f32 %v1858_v56, %v1602_v51  ;;  %v1859_v58 = vsel %vm1731_vm3, %v5870_v2, 0.0  ;;  %v1860_v24 = vsel %vm1732_vm4, %v5871_v43, 0.0  ;;  %v1606_v55 = vld [vmem:[#allocation2 + $0x230] sm:$0xff]  ;;  %v1607_v13 = vld [vmem:[#allocation2 + $0x238] sm:$0xff]  ;;  %v1609_v56 = vld [vmem:[#allocation2 + $0x248] sm:$0xff] }
 0x1e6   : > { %v1987_v59 = vadd.f32 %v1859_v58, %v1603_v39  ;;  %v1988_v47 = vadd.f32 %v1860_v24, %v1604_v15  ;;  %vm1733_vm5 = vcmp.lt.s32.totalorder %v1477_v62, 1024  ;;  %v1349_v41 = vadd.s32 560, %v4740_v38  ;;  %v5873_v58 = vld [vmem:[#allocation94_spill] sm:$0xff] }
 0x1e7   : > { %2113 = vst [vmem:[#allocation2 + $0x208] sm:$0xff] %v1985_v7  ;;  %2114 = vst [vmem:[#allocation2 + $0x210] sm:$0xff] %v1986_v30  ;;  %v1861_v19 = vsel %vm1733_vm5, %v5872_v33, 0.0  ;;  %v1350_v40 = vadd.s32 568, %v4740_v38  ;;  %v1351_v28 = vadd.s32 576, %v4740_v38  ;;  %v1352_v34 = vadd.s32 584, %v4740_v38 }
 0x1e8   : > { %2115 = vst [vmem:[#allocation2 + $0x218] sm:$0xff] %v1987_v59  ;;  %2116 = vst [vmem:[#allocation2 + $0x220] sm:$0xff] %v1988_v47  ;;  %v1989_v10 = vadd.f32 %v1861_v19, %v1605_v3  ;;  %v1478_v51 = vadd.s32 %v4738_v26, %v1349_v41  ;;  %v1353_v49 = vadd.s32 592, %v4740_v38  ;;  %v1354_v32 = vadd.s32 600, %v4740_v38  ;;  %v5874_v3 = vld [vmem:[#allocation79_spill] sm:$0xff]  ;;  %v5876_v33 = vld [vmem:[#allocation100_spill] sm:$0xff] }
 0x1e9   : > { %v1479_v39 = vadd.s32 %v4738_v26, %v1350_v40  ;;  %v1480_v15 = vadd.s32 %v4738_v26, %v1351_v28  ;;  %v1481_v62 = vadd.s32 %v4738_v26, %v1352_v34  ;;  %v1355_v23 = vadd.s32 608, %v4740_v38  ;;  %v5875_v47 = vld [vmem:[#allocation95_spill] sm:$0xff]  ;;  %v1610_v40 = vld [vmem:[#allocation2 + $0x250] sm:$0xff] }
 0x1ea   : > { %2117 = vst [vmem:[#allocation2 + $0x228] sm:$0xff] %v1989_v10  ;;  %vm1734_vm6 = vcmp.lt.s32.totalorder %v1478_v51, 1024  ;;  %v1482_v7 = vadd.s32 %v4738_v26, %v1353_v49  ;;  %v1483_v30 = vadd.s32 %v4738_v26, %v1354_v32  ;;  %v1356_v2 = vadd.s32 616, %v4740_v38  ;;  %v1611_v51 = vld [vmem:[#allocation2 + $0x258] sm:$0xff]  ;;  %v5877_v49 = vld [vmem:[#allocation84_spill] sm:$0xff] }
 0x1eb   : > { %v1862_v43 = vsel %vm1734_vm6, %v5873_v58, 0.0  ;;  %vm1735_vm7 = vcmp.lt.s32.totalorder %v1479_v39, 1024  ;;  %vm1736_vm8 = vcmp.lt.s32.totalorder %v1480_v15, 1024  ;;  %vm1737_vm9 = vcmp.lt.s32.totalorder %v1481_v62, 1024  ;;  %v5878_v62 = vld [vmem:[#allocation101_spill] sm:$0xff] }
 0x1ec   : > { %v1990_v24 = vadd.f32 %v1862_v43, %v1606_v55  ;;  %v1863_v59 = vsel %vm1735_vm7, %v5874_v3, 0.0  ;;  %v1864_v41 = vsel %vm1736_vm8, %v5875_v47, 0.0  ;;  %v1865_v19 = vsel %vm1737_vm9, %v5876_v33, 0.0  ;;  %v1612_v43 = vld [vmem:[#allocation2 + $0x260] sm:$0xff] }
 0x1ed   : > { %v1991_v28 = vadd.f32 %v1863_v59, %v1607_v13  ;;  %v1992_v34 = vadd.f32 %v1864_v41, %v1608_v54  ;;  %v1993_v10 = vadd.f32 %v1865_v19, %v1609_v56  ;;  %vm1738_vm10 = vcmp.lt.s32.totalorder %v1482_v7, 1024  ;;  %v1613_v13 = vld [vmem:[#allocation2 + $0x268] sm:$0xff]  ;;  %v1614_v19 = vld [vmem:[#allocation2 + $0x270] sm:$0xff] }
 0x1ee   : > { %2118 = vst [vmem:[#allocation2 + $0x230] sm:$0xff] %v1990_v24  ;;  %v1866_v32 = vsel %vm1738_vm10, %v5877_v49, 0.0  ;;  %vm1739_vm11 = vcmp.lt.s32.totalorder %v1483_v30, 1024  ;;  %v1484_v39 = vadd.s32 %v4738_v26, %v1355_v23  ;;  %v1485_v55 = vadd.s32 %v4738_v26, %v1356_v2  ;;  %v5879_v23 = vld [vmem:[#allocation85_spill] sm:$0xff]  ;;  %v5880_v24 = vld [vmem:[#allocation102_spill] sm:$0xff] }
 0x1ef   : > { %2119 = vst [vmem:[#allocation2 + $0x238] sm:$0xff] %v1991_v28  ;;  %2120 = vst [vmem:[#allocation2 + $0x240] sm:$0xff] %v1992_v34  ;;  %v1994_v15 = vadd.f32 %v1866_v32, %v1610_v40  ;;  %v1867_v58 = vsel %vm1739_vm11, %v5878_v62, 0.0  ;;  %v1357_v54 = vadd.s32 624, %v4740_v38  ;;  %v1358_v56 = vadd.s32 632, %v4740_v38  ;;  %v1615_v40 = vld [vmem:[#allocation2 + $0x278] sm:$0xff] }
 0x1f0   : > { %2121 = vst [vmem:[#allocation2 + $0x248] sm:$0xff] %v1993_v10  ;;  %v1995_v7 = vadd.f32 %v1867_v58, %v1611_v51  ;;  %vm1740_vm12 = vcmp.lt.s32.totalorder %v1484_v39, 1024  ;;  %vm1741_vm13 = vcmp.lt.s32.totalorder %v1485_v55, 1024  ;;  %v1359_v30 = vadd.s32 640, %v4740_v38  ;;  %v1616_v10 = vld [vmem:[#allocation2 + $0x280] sm:$0xff] }
 0x1f1   : > { %2122 = vst [vmem:[#allocation2 + $0x250] sm:$0xff] %v1994_v15  ;;  %v1868_v2 = vsel %vm1740_vm12, %v5879_v23, 0.0  ;;  %v1869_v3 = vsel %vm1741_vm13, %v5880_v24, 0.0  ;;  %v1486_v59 = vadd.s32 %v4738_v26, %v1357_v54  ;;  %v1487_v47 = vadd.s32 %v4738_v26, %v1358_v56  ;;  %v5881_v32 = vld [vmem:[#allocation90_spill] sm:$0xff]  ;;  %v1617_v54 = vld [vmem:[#allocation2 + $0x288] sm:$0xff] }
 0x1f2   : > { %2123 = vst [vmem:[#allocation2 + $0x258] sm:$0xff] %v1995_v7  ;;  %v1996_v41 = vadd.f32 %v1868_v2, %v1612_v43  ;;  %v1997_v33 = vadd.f32 %v1869_v3, %v1613_v13  ;;  %v1488_v28 = vadd.s32 %v4738_v26, %v1359_v30  ;;  %v1360_v34 = vadd.s32 648, %v4740_v38  ;;  %v5882_v55 = vld [vmem:[#allocation106_spill] sm:$0xff]  ;;  %v1618_v30 = vld [vmem:[#allocation2 + $0x290] sm:$0xff]  ;;  %v5883_v24 = vld [vmem:[#allocation91_spill] sm:$0xff] }
 0x1f3   : > { %vm1742_vm14 = vcmp.lt.s32.totalorder %v1486_v59, 1024  ;;  %vm1743_vm15 = vcmp.lt.s32.totalorder %v1487_v47, 1024  ;;  %v1361_v51 = vadd.s32 656, %v4740_v38  ;;  %v1362_v49 = vadd.s32 664, %v4740_v38  ;;  %v1619_v59 = vld [vmem:[#allocation2 + $0x298] sm:$0xff] }
 0x1f4   : > { %2124 = vst [vmem:[#allocation2 + $0x260] sm:$0xff] %v1996_v41  ;;  %2125 = vst [vmem:[#allocation2 + $0x268] sm:$0xff] %v1997_v33  ;;  %v1870_v39 = vsel %vm1742_vm14, %v5881_v32, 0.0  ;;  %v1871_v15 = vsel %vm1743_vm15, %v5882_v55, 0.0  ;;  %vm1744_vm0 = vcmp.lt.s32.totalorder %v1488_v28, 1024  ;;  %v1489_v62 = vadd.s32 %v4738_v26, %v1360_v34  ;;  %v5884_v33 = vld [vmem:[#allocation107_spill] sm:$0xff] }
 0x1f5   : > { %v1998_v58 = vadd.f32 %v1870_v39, %v1614_v19  ;;  %v1999_v43 = vadd.f32 %v1871_v15, %v1615_v40  ;;  %v1872_v13 = vsel %vm1744_vm0, %v4383_v0, 0.0  ;;  %v1490_v56 = vadd.s32 %v4738_v26, %v1361_v51  ;;  %v1621_v39 = vld [vmem:[#allocation2 + $0x2a8] sm:$0xff]  ;;  %v1622_v55 = vld [vmem:[#allocation2 + $0x2b0] sm:$0xff] }
 0x1f6   : > { %v2000_v7 = vadd.f32 %v1872_v13, %v1616_v10  ;;  %vm1745_vm1 = vcmp.lt.s32.totalorder %v1489_v62, 1024  ;;  %v1491_v23 = vadd.s32 %v4738_v26, %v1362_v49  ;;  %v1363_v2 = vadd.s32 672, %v4740_v38  ;;  %v1620_v10 = vld [vmem:[#allocation2 + $0x2a0] sm:$0xff]  ;;  %v5885_v13 = vld [vmem:[#allocation92_spill] sm:$0xff] }
 0x1f7   : > { %2126 = vst [vmem:[#allocation2 + $0x270] sm:$0xff] %v1998_v58  ;;  %2127 = vst [vmem:[#allocation2 + $0x278] sm:$0xff] %v1999_v43  ;;  %v1873_v3 = vsel %vm1745_vm1, %v5883_v24, 0.0  ;;  %vm1746_vm2 = vcmp.lt.s32.totalorder %v1490_v56, 1024  ;;  %v1364_v47 = vadd.s32 680, %v4740_v38  ;;  %v1365_v0 = vadd.s32 688, %v4740_v38 }
 0x1f8   : > { %2128 = vst [vmem:[#allocation2 + $0x280] sm:$0xff] %v2000_v7  ;;  %v2001_v41 = vadd.f32 %v1873_v3, %v1617_v54  ;;  %v1874_v19 = vsel %vm1746_vm2, %v5884_v33, 0.0  ;;  %vm1747_vm3 = vcmp.lt.s32.totalorder %v1491_v23, 1024  ;;  %v1492_v40 = vadd.s32 %v4738_v26, %v1363_v2  ;;  %v1623_v2 = vld [vmem:[#allocation2 + $0x2b8] sm:$0xff] }
 0x1f9   : > { %v2002_v28 = vadd.f32 %v1874_v19, %v1618_v30  ;;  %v1875_v34 = vsel %vm1747_vm3, %v4402_v27, 0.0  ;;  %v1493_v51 = vadd.s32 %v4738_v26, %v1364_v47  ;;  %v1494_v49 = vadd.s32 %v4738_v26, %v1365_v0 }
 0x1fa   : > { %2129 = vst [vmem:[#allocation2 + $0x288] sm:$0xff] %v2001_v41  ;;  %v2003_v32 = vadd.f32 %v1875_v34, %v1619_v59  ;;  %vm1748_vm4 = vcmp.lt.s32.totalorder %v1492_v40, 1024  ;;  %v1366_v15 = vadd.s32 696, %v4740_v38  ;;  %v1367_v62 = vadd.s32 704, %v4740_v38  ;;  %v1625_v59 = vld [vmem:[#allocation2 + $0x2c8] sm:$0xff] }
 0x1fb   : > { %2130 = vst [vmem:[#allocation2 + $0x290] sm:$0xff] %v2002_v28  ;;  %v1876_v58 = vsel %vm1748_vm4, %v4407_v4, 0.0  ;;  %vm1749_vm5 = vcmp.lt.s32.totalorder %v1493_v51, 1024  ;;  %vm1750_vm6 = vcmp.lt.s32.totalorder %v1494_v49, 1024  ;;  %v1368_v27 = vadd.s32 712, %v4740_v38  ;;  %v1624_v4 = vld [vmem:[#allocation2 + $0x2c0] sm:$0xff] }
 0x1fc   : > { %2131 = vst [vmem:[#allocation2 + $0x298] sm:$0xff] %v2003_v32  ;;  %v2004_v43 = vadd.f32 %v1876_v58, %v1620_v10  ;;  %v1877_v54 = vsel %vm1749_vm5, %v5885_v13, 0.0  ;;  %v1878_v56 = vsel %vm1750_vm6, %v4421_v29, 0.0  ;;  %v1495_v7 = vadd.s32 %v4738_v26, %v1366_v15  ;;  %v1626_v49 = vld [vmem:[#allocation2 + $0x2d0] sm:$0xff]  ;;  %v1629_v58 = vld [vmem:[#allocation2 + $0x2e8] sm:$0xff] }
 0x1fd   : > { %v2005_v30 = vadd.f32 %v1877_v54, %v1621_v39  ;;  %v2006_v23 = vadd.f32 %v1878_v56, %v1622_v55  ;;  %v1496_v24 = vadd.s32 %v4738_v26, %v1367_v62  ;;  %v1497_v3 = vadd.s32 %v4738_v26, %v1368_v27  ;;  %v1628_v55 = vld [vmem:[#allocation2 + $0x2e0] sm:$0xff]  ;;  %v5886_v54 = vld [vmem:[#allocation108_spill] sm:$0xff] }
 0x1fe   : > { %2132 = vst [vmem:[#allocation2 + $0x2a0] sm:$0xff] %v2004_v43  ;;  %vm1751_vm7 = vcmp.lt.s32.totalorder %v1495_v7, 1024  ;;  %v1369_v47 = vadd.s32 720, %v4740_v38  ;;  %v1370_v0 = vadd.s32 728, %v4740_v38  ;;  %v1371_v41 = vadd.s32 736, %v4740_v38 }
 0x1ff   : > { %2133 = vst [vmem:[#allocation2 + $0x2a8] sm:$0xff] %v2005_v30  ;;  %2134 = vst [vmem:[#allocation2 + $0x2b0] sm:$0xff] %v2006_v23  ;;  %v1879_v29 = vsel %vm1751_vm7, %v4426_v44, 0.0  ;;  %vm1752_vm8 = vcmp.lt.s32.totalorder %v1496_v24, 1024  ;;  %vm1753_vm9 = vcmp.lt.s32.totalorder %v1497_v3, 1024  ;;  %v1372_v33 = vadd.s32 744, %v4740_v38 }
 0x200   : > { %v2007_v19 = vadd.f32 %v1879_v29, %v1623_v2  ;;  %v1880_v40 = vsel %vm1752_vm8, %v4431_v8, 0.0  ;;  %v1881_v28 = vsel %vm1753_vm9, %v4440_v20, 0.0  ;;  %v1498_v34 = vadd.s32 %v4738_v26, %v1369_v47  ;;  %v1627_v44 = vld [vmem:[#allocation2 + $0x2d8] sm:$0xff]  ;;  %v1632_v47 = vld [vmem:[#allocation2 + $0x300] sm:$0xff] }
 0x201   : > { %v2008_v10 = vadd.f32 %v1880_v40, %v1624_v4  ;;  %v2009_v51 = vadd.f32 %v1881_v28, %v1625_v59  ;;  %v1499_v32 = vadd.s32 %v4738_v26, %v1370_v0  ;;  %v1500_v39 = vadd.s32 %v4738_v26, %v1371_v41  ;;  %v5887_v29 = vld [vmem:[#allocation97_spill] sm:$0xff] }
 0x202   : > { %2135 = vst [vmem:[#allocation2 + $0x2b8] sm:$0xff] %v2007_v19  ;;  %vm1754_vm10 = vcmp.lt.s32.totalorder %v1498_v34, 1024  ;;  %v1501_v15 = vadd.s32 %v4738_v26, %v1372_v33  ;;  %v1373_v62 = vadd.s32 752, %v4740_v38  ;;  %v1374_v8 = vadd.s32 760, %v4740_v38  ;;  %v5888_v28 = vld [vmem:[#allocation113_spill] sm:$0xff] }
 0x203   : > { %2136 = vst [vmem:[#allocation2 + $0x2c0] sm:$0xff] %v2008_v10  ;;  %2137 = vst [vmem:[#allocation2 + $0x2c8] sm:$0xff] %v2009_v51  ;;  %v1882_v20 = vsel %vm1754_vm10, %v4445_v31, 0.0  ;;  %vm1755_vm11 = vcmp.lt.s32.totalorder %v1499_v32, 1024  ;;  %vm1756_vm12 = vcmp.lt.s32.totalorder %v1500_v39, 1024  ;;  %v1375_v27 = vadd.s32 768, %v4740_v38 }
 0x204   : > { %v2010_v43 = vadd.f32 %v1882_v20, %v1626_v49  ;;  %v1883_v13 = vsel %vm1755_vm11, %v4450_v9, 0.0  ;;  %v1884_v56 = vsel %vm1756_vm12, %v5886_v54, 0.0  ;;  %vm1757_vm13 = vcmp.lt.s32.totalorder %v1501_v15, 1024  ;;  %v1630_v31 = vld [vmem:[#allocation2 + $0x2f0] sm:$0xff]  ;;  %v1631_v9 = vld [vmem:[#allocation2 + $0x2f8] sm:$0xff]  ;;  %v5889_v10 = vld [vmem:[#allocation98_spill] sm:$0xff] }
 0x205   : > { %v2011_v7 = vadd.f32 %v1883_v13, %v1627_v44  ;;  %v2012_v30 = vadd.f32 %v1884_v56, %v1628_v55  ;;  %v1885_v23 = vsel %vm1757_vm13, %v4464_v45, 0.0  ;;  %v1502_v2 = vadd.s32 %v4738_v26, %v1373_v62  ;;  %v1633_v49 = vld [vmem:[#allocation2 + $0x308] sm:$0xff]  ;;  %v1634_v55 = vld [vmem:[#allocation2 + $0x310] sm:$0xff]  ;;  %v1636_v13 = vld [vmem:[#allocation2 + $0x320] sm:$0xff] }
 0x206   : > { %2138 = vst [vmem:[#allocation2 + $0x2d0] sm:$0xff] %v2010_v43  ;;  %v2013_v24 = vadd.f32 %v1885_v23, %v1629_v58  ;;  %v1503_v3 = vadd.s32 %v4738_v26, %v1374_v8  ;;  %v1504_v4 = vadd.s32 %v4738_v26, %v1375_v27  ;;  %v1376_v59 = vadd.s32 776, %v4740_v38  ;;  %v1635_v8 = vld [vmem:[#allocation2 + $0x318] sm:$0xff] }
 0x207   : > { %2139 = vst [vmem:[#allocation2 + $0x2d8] sm:$0xff] %v2011_v7  ;;  %2140 = vst [vmem:[#allocation2 + $0x2e0] sm:$0xff] %v2012_v30  ;;  %vm1758_vm14 = vcmp.lt.s32.totalorder %v1502_v2, 1024  ;;  %v1377_v0 = vadd.s32 784, %v4740_v38  ;;  %v1378_v45 = vadd.s32 792, %v4740_v38  ;;  %v1379_v41 = vadd.s32 800, %v4740_v38 }
 0x208   : > { %2141 = vst [vmem:[#allocation2 + $0x2e8] sm:$0xff] %v2013_v24  ;;  %v1886_v33 = vsel %vm1758_vm14, %v5887_v29, 0.0  ;;  %vm1759_vm15 = vcmp.lt.s32.totalorder %v1503_v3, 1024  ;;  %vm1760_vm0 = vcmp.lt.s32.totalorder %v1504_v4, 1024  ;;  %v1505_v19 = vadd.s32 %v4738_v26, %v1376_v59  ;;  %v1637_v2 = vld [vmem:[#allocation2 + $0x328] sm:$0xff]  ;;  %v1638_v3 = vld [vmem:[#allocation2 + $0x330] sm:$0xff] }
 0x209   : > { %v2014_v40 = vadd.f32 %v1886_v33, %v1630_v31  ;;  %v1887_v34 = vsel %vm1759_vm15, %v5888_v28, 0.0  ;;  %v1888_v51 = vsel %vm1760_vm0, %v5889_v10, 0.0  ;;  %v1506_v32 = vadd.s32 %v4738_v26, %v1377_v0  ;;  %v1642_v10 = vld [vmem:[#allocation2 + $0x350] sm:$0xff] }
 0x20a   : > { %v2015_v39 = vadd.f32 %v1887_v34, %v1631_v9  ;;  %v2016_v44 = vadd.f32 %v1888_v51, %v1632_v47  ;;  %vm1761_vm1 = vcmp.lt.s32.totalorder %v1505_v19, 1024  ;;  %v1507_v15 = vadd.s32 %v4738_v26, %v1378_v45  ;;  %v1639_v45 = vld [vmem:[#allocation2 + $0x338] sm:$0xff]  ;;  %v1640_v19 = vld [vmem:[#allocation2 + $0x340] sm:$0xff] }
 0x20b   : > { %2142 = vst [vmem:[#allocation2 + $0x2f0] sm:$0xff] %v2014_v40  ;;  %v1889_v62 = vsel %vm1761_vm1, %v4488_v63, 0.0  ;;  %vm1762_vm2 = vcmp.lt.s32.totalorder %v1506_v32, 1024  ;;  %v1508_v20 = vadd.s32 %v4738_v26, %v1379_v41  ;;  %v1380_v58 = vadd.s32 808, %v4740_v38  ;;  %v1641_v40 = vld [vmem:[#allocation2 + $0x348] sm:$0xff] }
 0x20c   : > { %2143 = vst [vmem:[#allocation2 + $0x2f8] sm:$0xff] %v2015_v39  ;;  %2144 = vst [vmem:[#allocation2 + $0x300] sm:$0xff] %v2016_v44  ;;  %v2017_v27 = vadd.f32 %v1889_v62, %v1633_v49  ;;  %v1890_v43 = vsel %vm1762_vm2, %v4495_v11, 0.0  ;;  %vm1763_vm3 = vcmp.lt.s32.totalorder %v1507_v15, 1024  ;;  %v1381_v54 = vadd.s32 816, %v4740_v38  ;;  %v1643_v62 = vld [vmem:[#allocation2 + $0x358] sm:$0xff] }
 0x20d   : > { %v2018_v56 = vadd.f32 %v1890_v43, %v1634_v55  ;;  %v1891_v7 = vsel %vm1763_vm3, %v4500_v61, 0.0  ;;  %vm1764_vm4 = vcmp.lt.s32.totalorder %v1508_v20, 1024  ;;  %v1509_v63 = vadd.s32 %v4738_v26, %v1380_v58 }
 0x20e   : > { %2145 = vst [vmem:[#allocation2 + $0x308] sm:$0xff] %v2017_v27  ;;  %v2019_v30 = vadd.f32 %v1891_v7, %v1635_v8  ;;  %v1892_v23 = vsel %vm1764_vm4, %v4505_v14, 0.0  ;;  %v1510_v24 = vadd.s32 %v4738_v26, %v1381_v54  ;;  %v1382_v31 = vadd.s32 824, %v4740_v38 }
 0x20f   : > { %2146 = vst [vmem:[#allocation2 + $0x310] sm:$0xff] %v2018_v56  ;;  %v2020_v11 = vadd.f32 %v1892_v23, %v1636_v13  ;;  %vm1765_vm5 = vcmp.lt.s32.totalorder %v1509_v63, 1024  ;;  %v1383_v4 = vadd.s32 832, %v4740_v38  ;;  %v1384_v61 = vadd.s32 840, %v4740_v38  ;;  %v1645_v63 = vld [vmem:[#allocation2 + $0x368] sm:$0xff] }
 0x210   : > { %2147 = vst [vmem:[#allocation2 + $0x318] sm:$0xff] %v2019_v30  ;;  %v1893_v59 = vsel %vm1765_vm5, %v4510_v46, 0.0  ;;  %vm1766_vm6 = vcmp.lt.s32.totalorder %v1510_v24, 1024  ;;  %v1511_v9 = vadd.s32 %v4738_v26, %v1382_v31  ;;  %v1385_v14 = vadd.s32 848, %v4740_v38  ;;  %v1646_v30 = vld [vmem:[#allocation2 + $0x370] sm:$0xff]  ;;  %v1647_v31 = vld [vmem:[#allocation2 + $0x378] sm:$0xff] }
 0x211   : > { %2148 = vst [vmem:[#allocation2 + $0x320] sm:$0xff] %v2020_v11  ;;  %v2021_v47 = vadd.f32 %v1893_v59, %v1637_v2  ;;  %v1894_v0 = vsel %vm1766_vm6, %v4515_v52, 0.0  ;;  %v1512_v41 = vadd.s32 %v4738_v26, %v1383_v4  ;;  %v1513_v29 = vadd.s32 %v4738_v26, %v1384_v61  ;;  %v1648_v11 = vld [vmem:[#allocation2 + $0x380] sm:$0xff] }
 0x212   : > { %v2022_v33 = vadd.f32 %v1894_v0, %v1638_v3  ;;  %vm1767_vm7 = vcmp.lt.s32.totalorder %v1511_v9, 1024  ;;  %v1514_v46 = vadd.s32 %v4738_v26, %v1385_v14  ;;  %v1386_v28 = vadd.s32 856, %v4740_v38  ;;  %v1649_v14 = vld [vmem:[#allocation2 + $0x388] sm:$0xff] }
 0x213   : > { %2149 = vst [vmem:[#allocation2 + $0x328] sm:$0xff] %v2021_v47  ;;  %v1895_v34 = vsel %vm1767_vm7, %v4520_v18, 0.0  ;;  %vm1768_vm8 = vcmp.lt.s32.totalorder %v1512_v41, 1024  ;;  %vm1769_vm9 = vcmp.lt.s32.totalorder %v1513_v29, 1024  ;;  %v1387_v52 = vadd.s32 864, %v4740_v38 }
 0x214   : > { %2150 = vst [vmem:[#allocation2 + $0x330] sm:$0xff] %v2022_v33  ;;  %v2023_v51 = vadd.f32 %v1895_v34, %v1639_v45  ;;  %v1896_v49 = vsel %vm1768_vm8, %v4525_v36, 0.0  ;;  %v1897_v32 = vsel %vm1769_vm9, %v4530_v25, 0.0  ;;  %vm1770_vm10 = vcmp.lt.s32.totalorder %v1514_v46, 1024  ;;  %v1644_v36 = vld [vmem:[#allocation2 + $0x360] sm:$0xff] }
 0x215   : > { %v2024_v39 = vadd.f32 %v1896_v49, %v1640_v19  ;;  %v2025_v44 = vadd.f32 %v1897_v32, %v1641_v40  ;;  %v1898_v55 = vsel %vm1770_vm10, %v4535_v12, 0.0  ;;  %v1515_v15 = vadd.s32 %v4738_v26, %v1386_v28  ;;  %v1650_v40 = vld [vmem:[#allocation2 + $0x390] sm:$0xff] }
 0x216   : > { %2151 = vst [vmem:[#allocation2 + $0x338] sm:$0xff] %v2023_v51  ;;  %v2026_v18 = vadd.f32 %v1898_v55, %v1642_v10  ;;  %v1516_v8 = vadd.s32 %v4738_v26, %v1387_v52  ;;  %v1388_v20 = vadd.s32 872, %v4740_v38  ;;  %v1389_v58 = vadd.s32 880, %v4740_v38  ;;  %v1651_v10 = vld [vmem:[#allocation2 + $0x398] sm:$0xff]  ;;  %v1652_v52 = vld [vmem:[#allocation2 + $0x3a0] sm:$0xff]  ;;  %v1653_v51 = vld [vmem:[#allocation2 + $0x3a8] sm:$0xff] }
 0x217   : > { %2152 = vst [vmem:[#allocation2 + $0x340] sm:$0xff] %v2024_v39  ;;  %2153 = vst [vmem:[#allocation2 + $0x348] sm:$0xff] %v2025_v44  ;;  %vm1771_vm11 = vcmp.lt.s32.totalorder %v1515_v15, 1024  ;;  %v1390_v25 = vadd.s32 888, %v4740_v38  ;;  %v1391_v27 = vadd.s32 896, %v4740_v38  ;;  %v1392_v12 = vadd.s32 904, %v4740_v38 }
 0x218   : > { %2154 = vst [vmem:[#allocation2 + $0x350] sm:$0xff] %v2026_v18  ;;  %v1899_v43 = vsel %vm1771_vm11, %v4540_v53, 0.0  ;;  %vm1772_vm12 = vcmp.lt.s32.totalorder %v1516_v8, 1024  ;;  %v1517_v13 = vadd.s32 %v4738_v26, %v1388_v20  ;;  %v1518_v54 = vadd.s32 %v4738_v26, %v1389_v58  ;;  %v1654_v8 = vld [vmem:[#allocation2 + $0x3b0] sm:$0xff] }
 0x219   : > { %v2027_v56 = vadd.f32 %v1899_v43, %v1643_v62  ;;  %v1900_v7 = vsel %vm1772_vm12, %v4545_v16, 0.0  ;;  %v1519_v23 = vadd.s32 %v4738_v26, %v1390_v25  ;;  %v1520_v2 = vadd.s32 %v4738_v26, %v1391_v27  ;;  %v1655_v25 = vld [vmem:[#allocation2 + $0x3b8] sm:$0xff]  ;;  %v1657_v43 = vld [vmem:[#allocation2 + $0x3c8] sm:$0xff] }
 0x21a   : > { %v2028_v24 = vadd.f32 %v1900_v7, %v1644_v36  ;;  %vm1773_vm13 = vcmp.lt.s32.totalorder %v1517_v13, 1024  ;;  %vm1774_vm14 = vcmp.lt.s32.totalorder %v1518_v54, 1024  ;;  %v1521_v53 = vadd.s32 %v4738_v26, %v1392_v12 }
 0x21b   : > { %2155 = vst [vmem:[#allocation2 + $0x358] sm:$0xff] %v2027_v56  ;;  %v1901_v3 = vsel %vm1773_vm13, %v4550_v21, 0.0  ;;  %v1902_v4 = vsel %vm1774_vm14, %v4555_v17, 0.0  ;;  %vm1775_vm15 = vcmp.lt.s32.totalorder %v1519_v23, 1024  ;;  %vm1776_vm0 = vcmp.lt.s32.totalorder %v1520_v2, 1024 }
 0x21c   : > { %2156 = vst [vmem:[#allocation2 + $0x360] sm:$0xff] %v2028_v24  ;;  %v2029_v16 = vadd.f32 %v1901_v3, %v1645_v63  ;;  %v2030_v61 = vadd.f32 %v1902_v4, %v1646_v30  ;;  %v1903_v59 = vsel %vm1775_vm15, %v4560_v5, 0.0  ;;  %v1904_v9 = vsel %vm1776_vm0, %v4565_v35, 0.0  ;;  %v1658_v24 = vld [vmem:[#allocation2 + $0x3d0] sm:$0xff]  ;;  %v1660_v3 = vld [vmem:[#allocation2 + $0x3e0] sm:$0xff] }
 0x21d   : > { %v2031_v47 = vadd.f32 %v1903_v59, %v1647_v31  ;;  %v2032_v0 = vadd.f32 %v1904_v9, %v1648_v11  ;;  %vm1777_vm1 = vcmp.lt.s32.totalorder %v1521_v53, 1024  ;;  %v1393_v45 = vadd.s32 912, %v4740_v38  ;;  %v1659_v31 = vld [vmem:[#allocation2 + $0x3d8] sm:$0xff]  ;;  %v5890_v4 = vld [vmem:[#allocation114_spill] sm:$0xff] }
 0x21e   : > { %2157 = vst [vmem:[#allocation2 + $0x368] sm:$0xff] %v2029_v16  ;;  %2158 = vst [vmem:[#allocation2 + $0x370] sm:$0xff] %v2030_v61  ;;  %v1905_v21 = vsel %vm1777_vm1, %v4570_v50, 0.0  ;;  %v1394_v17 = vadd.s32 920, %v4740_v38  ;;  %v1395_v41 = vadd.s32 928, %v4740_v38  ;;  %v1396_v29 = vadd.s32 936, %v4740_v38 }
 0x21f   : > { %2159 = vst [vmem:[#allocation2 + $0x378] sm:$0xff] %v2031_v47  ;;  %2160 = vst [vmem:[#allocation2 + $0x380] sm:$0xff] %v2032_v0  ;;  %v2033_v5 = vadd.f32 %v1905_v21, %v1649_v14  ;;  %v1522_v35 = vadd.s32 %v4738_v26, %v1393_v45  ;;  %v1397_v33 = vadd.s32 944, %v4740_v38  ;;  %v1398_v19 = vadd.s32 952, %v4740_v38  ;;  %v5891_v61 = vld [vmem:[#allocation99_spill] sm:$0xff] }
 0x220   : > { %v1523_v46 = vadd.s32 %v4738_v26, %v1394_v17  ;;  %v1524_v50 = vadd.s32 %v4738_v26, %v1395_v41  ;;  %v1525_v28 = vadd.s32 %v4738_v26, %v1396_v29  ;;  %v1399_v34 = vadd.s32 960, %v4740_v38  ;;  %v5892_v0 = vld [vmem:[#allocation115_spill] sm:$0xff]  ;;  %v1662_v29 = vld [vmem:[#allocation2 + $0x3f0] sm:$0xff] }
 0x221   : > { %2161 = vst [vmem:[#allocation2 + $0x388] sm:$0xff] %v2033_v5  ;;  %vm1778_vm2 = vcmp.lt.s32.totalorder %v1522_v35, 1024  ;;  %v1526_v49 = vadd.s32 %v4738_v26, %v1397_v33  ;;  %v1527_v32 = vadd.s32 %v4738_v26, %v1398_v19  ;;  %v1400_v39 = vadd.s32 968, %v4740_v38  ;;  %v1661_v21 = vld [vmem:[#allocation2 + $0x3e8] sm:$0xff]  ;;  %v5893_v5 = vld [vmem:[#allocation118_spill] sm:$0xff]  ;;  %v1663_v33 = vld [vmem:[#allocation2 + $0x3f8] sm:$0xff] }
 0x222   : > { %v1906_v44 = vsel %vm1778_vm2, %v4575_v60, 0.0  ;;  %vm1779_vm3 = vcmp.lt.s32.totalorder %v1523_v46, 1024  ;;  %vm1780_vm4 = vcmp.lt.s32.totalorder %v1524_v50, 1024  ;;  %vm1781_vm5 = vcmp.lt.s32.totalorder %v1525_v28, 1024  ;;  %v5895_v28 = vld [vmem:[#allocation119_spill] sm:$0xff] }
 0x223   : > { %v2034_v55 = vadd.f32 %v1906_v44, %v1650_v40  ;;  %v1907_v15 = vsel %vm1779_vm3, %v4580_v1, 0.0  ;;  %v1908_v18 = vsel %vm1780_vm4, %v4582_v42, 0.0  ;;  %v1909_v62 = vsel %vm1781_vm5, %v4584_v48, 0.0  ;;  %v1656_v48 = vld [vmem:[#allocation2 + $0x3c0] sm:$0xff]  ;;  %v5894_v40 = vld [vmem:[#allocation104_spill] sm:$0xff] }
 0x224   : > { %v2035_v20 = vadd.f32 %v1907_v15, %v1651_v10  ;;  %v2036_v58 = vadd.f32 %v1908_v18, %v1652_v52  ;;  %v2037_v36 = vadd.f32 %v1909_v62, %v1653_v51  ;;  %vm1782_vm6 = vcmp.lt.s32.totalorder %v1526_v49, 1024 }
 0x225   : > { %2162 = vst [vmem:[#allocation2 + $0x390] sm:$0xff] %v2034_v55  ;;  %v1910_v27 = vsel %vm1782_vm6, %v4586_v57, 0.0  ;;  %vm1783_vm7 = vcmp.lt.s32.totalorder %v1527_v32, 1024  ;;  %v1528_v60 = vadd.s32 %v4738_v26, %v1399_v34  ;;  %v1529_v12 = vadd.s32 %v4738_v26, %v1400_v39 }
 0x226   : > { %2163 = vst [vmem:[#allocation2 + $0x398] sm:$0xff] %v2035_v20  ;;  %2164 = vst [vmem:[#allocation2 + $0x3a0] sm:$0xff] %v2036_v58  ;;  %v2038_v1 = vadd.f32 %v1910_v27, %v1654_v8  ;;  %v1911_v42 = vsel %vm1783_vm7, %v4588_v22, 0.0  ;;  %v1401_v13 = vadd.s32 976, %v4740_v38  ;;  %v1402_v54 = vadd.s32 984, %v4740_v38 }
 0x227   : > { %2165 = vst [vmem:[#allocation2 + $0x3a8] sm:$0xff] %v2037_v36  ;;  %v2039_v56 = vadd.f32 %v1911_v42, %v1655_v25  ;;  %vm1784_vm8 = vcmp.lt.s32.totalorder %v1528_v60, 1024  ;;  %vm1785_vm9 = vcmp.lt.s32.totalorder %v1529_v12, 1024  ;;  %v1403_v57 = vadd.s32 992, %v4740_v38 }
 0x228   : > { %2166 = vst [vmem:[#allocation2 + $0x3b0] sm:$0xff] %v2038_v1  ;;  %v1912_v7 = vsel %vm1784_vm8, %v4590_v6, 0.0  ;;  %v1913_v63 = vsel %vm1785_vm9, %v4592_v37, 0.0  ;;  %v1530_v30 = vadd.s32 %v4738_v26, %v1401_v13  ;;  %v1531_v22 = vadd.s32 %v4738_v26, %v1402_v54 }
 0x229   : > { %2167 = vst [vmem:[#allocation2 + $0x3b8] sm:$0xff] %v2039_v56  ;;  %v2040_v23 = vadd.f32 %v1912_v7, %v1656_v48  ;;  %v2041_v2 = vadd.f32 %v1913_v63, %v1657_v43  ;;  %v1532_v11 = vadd.s32 %v4738_v26, %v1403_v57  ;;  %v1404_v53 = vadd.s32 1000, %v4740_v38 }
 0x22a   : > { %vm1786_vm10 = vcmp.lt.s32.totalorder %v1530_v30, 1024  ;;  %vm1787_vm11 = vcmp.lt.s32.totalorder %v1531_v22, 1024  ;;  %v1405_v6 = vadd.s32 1008, %v4740_v38  ;;  %v1406_v37 = vadd.s32 1016, %v4740_v38 }
 0x22b   : > { %2168 = vst [vmem:[#allocation2 + $0x3c0] sm:$0xff] %v2040_v23  ;;  %2169 = vst [vmem:[#allocation2 + $0x3c8] sm:$0xff] %v2041_v2  ;;  %v1914_v16 = vsel %vm1786_vm10, %v5890_v4, 0.0  ;;  %v1915_v59 = vsel %vm1787_vm11, %v5891_v61, 0.0  ;;  %vm1788_vm12 = vcmp.lt.s32.totalorder %v1532_v11, 1024  ;;  %v1533_v9 = vadd.s32 %v4738_v26, %v1404_v53 }
 0x22c   : > { %v2042_v14 = vadd.f32 %v1914_v16, %v1658_v24  ;;  %v2043_v47 = vadd.f32 %v1915_v59, %v1659_v31  ;;  %v1916_v45 = vsel %vm1788_vm12, %v5892_v0, 0.0  ;;  %v1534_v17 = vadd.s32 %v4738_v26, %v1405_v6 }
 0x22d   : > { %v2044_v41 = vadd.f32 %v1916_v45, %v1660_v3  ;;  %vm1789_vm13 = vcmp.lt.s32.totalorder %v1533_v9, 1024  ;;  %v1535_v38 = vadd.s32 %v4738_v26, %v1406_v37 }
 0x22e   : > { %2170 = vst [vmem:[#allocation2 + $0x3d0] sm:$0xff] %v2042_v14  ;;  %2171 = vst [vmem:[#allocation2 + $0x3d8] sm:$0xff] %v2043_v47  ;;  %v1917_v35 = vsel %vm1789_vm13, %v5893_v5, 0.0  ;;  %vm1790_vm14 = vcmp.lt.s32.totalorder %v1534_v17, 1024 }
 0x22f   : > { %2172 = vst [vmem:[#allocation2 + $0x3e0] sm:$0xff] %v2044_v41  ;;  %v2045_v19 = vadd.f32 %v1917_v35, %v1661_v21  ;;  %v1918_v46 = vsel %vm1790_vm14, %v5894_v40, 0.0  ;;  %vm1791_vm15 = vcmp.lt.s32.totalorder %v1535_v38, 1024 }
 0x230   : > { %v2046_v50 = vadd.f32 %v1918_v46, %v1662_v29  ;;  %v1919_v34 = vsel %vm1791_vm15, %v5895_v28, 0.0 }
 0x231   : > { %2173 = vst [vmem:[#allocation2 + $0x3e8] sm:$0xff] %v2045_v19  ;;  %v2047_v10 = vadd.f32 %v1919_v34, %v1663_v33 }
 0x232   : > { %2174 = vst [vmem:[#allocation2 + $0x3f0] sm:$0xff] %v2046_v50 }
 0x233   : > { %2175 = vst [vmem:[#allocation2 + $0x3f8] sm:$0xff] %v2047_v10 }
 0x234 PF: > { %v2179_v26 = vld [vmem:[#allocation2] sm:$0xff]  ;;  %v2180_v52 = vld [vmem:[#allocation2 + $0x8] sm:$0xff]  ;;  %v2181_v51 = vld [vmem:[#allocation2 + $0x10] sm:$0xff]  ;;  %s2582_s3 = sshll.u32 %s2842_s14, 7  ;;  %s2463_s28 = sshll.u32 %s231_s21, 4  ;;  %s5134_s28 = int_to_ptr.vmem [resolvable:$true] %s2463_s28 }
 0x235   : > { %v2307_v49 = vadd.f32 %v2180_v52, %v2179_v26  ;;  %v2182_v32 = vld [vmem:[#allocation2 + $0x18] sm:$0xff]  ;;  %v2183_v44 = vld [vmem:[#allocation2 + $0x20] sm:$0xff]  ;;  %v2184_v15 = vld [vmem:[#allocation2 + $0x28] sm:$0xff]  ;;  %s5132_s30 = scalar_lea.hbm %s5191_s2, %s2582_s3  ;;  %s2450_s4 = scalar_lea.sflag [#allocation5], %s229_s18 }
 0x236   : > { %v2185_v62 = vld [vmem:[#allocation2 + $0x30] sm:$0xff]  ;;  %v2186_v20 = vld [vmem:[#allocation2 + $0x38] sm:$0xff]  ;;  %v2187_v36 = vld [vmem:[#allocation2 + $0x40] sm:$0xff]  ;;  %s2743_s14 = scalar_lea.vmem %s5134_s28, 128  ;;  %p5896_p10 = scmp.ne.s32.totalorder %s5307_s25, 0 }
 0x237   : > { %v2308_v39 = vadd.f32 %v2307_v49, %v2181_v51  ;;  %v2188_v27 = vld [vmem:[#allocation2 + $0x48] sm:$0xff]  ;;  %v2189_v12 = vld [vmem:[#allocation2 + $0x50] sm:$0xff]  ;;  %v2190_v42 = vld [vmem:[#allocation2 + $0x58] sm:$0xff]  ;;  %p2744_p9 = scmp.ne.s32.totalorder %s5134_s28, %s2743_s14  ;;  %s2857_s5 = smov [#allocation8]  }
 0x238   : > { %v2191_v43 = vld [vmem:[#allocation2 + $0x60] sm:$0xff]  ;;  %v2192_v54 = vld [vmem:[#allocation2 + $0x68] sm:$0xff]  ;;  %v2193_v57 = vld [vmem:[#allocation2 + $0x70] sm:$0xff]  ;;  %s2747_s6 = sshll.u32 %s2857_s5, 4  ;;  %s2748_s6 = int_to_ptr.vmem [resolvable:$false] %s2747_s6 }
 0x239   : > { %v2309_v55 = vadd.f32 %v2308_v39, %v2182_v32  ;;  %v2194_v63 = vld [vmem:[#allocation2 + $0x78] sm:$0xff]  ;;  %v2195_v22 = vld [vmem:[#allocation2 + $0x80] sm:$0xff]  ;;  %v2196_v2 = vld [vmem:[#allocation2 + $0x88] sm:$0xff]  ;;  %p2745_p11 = pnand %p2744_p9, %p5896_p10  ;;  %s2749_s7 = scalar_lea.vmem %s2748_s6, 256 }
 0x23a   : > { %v2197_v31 = vld [vmem:[#allocation2 + $0x90] sm:$0xff]  ;;  %v2198_v53 = vld [vmem:[#allocation2 + $0x98] sm:$0xff]  ;;  %v2199_v6 = vld [vmem:[#allocation2 + $0xa0] sm:$0xff]  ;;  %p2750_p3 = scmp.lt.s32.totalorder %s5134_s28, %s2748_s6  ;;  %p2751_p7 = scmp.lt.s32.totalorder %s2749_s7, %s2743_s14 }
 0x23b   : > { %v2310_v18 = vadd.f32 %v2309_v55, %v2183_v44  ;;  %v2200_v4 = vld [vmem:[#allocation2 + $0xa8] sm:$0xff]  ;;  %v2201_v61 = vld [vmem:[#allocation2 + $0xb0] sm:$0xff]  ;;  %v2202_v9 = vld [vmem:[#allocation2 + $0xb8] sm:$0xff]  ;;  %p2746_p1 = pneg %p2745_p11 }
 0x23c   : > { %v2203_v47 = vld [vmem:[#allocation2 + $0xc0] sm:$0xff]  ;;  %v2204_v45 = vld [vmem:[#allocation2 + $0xc8] sm:$0xff]  ;;  %v2205_v17 = vld [vmem:[#allocation2 + $0xd0] sm:$0xff]  ;;  %p2752_p13 = por %p2751_p7, %p2750_p3 }
 0x23d   : > { %v2311_v8 = vadd.f32 %v2310_v18, %v2184_v15  ;;  %v2206_v29 = vld [vmem:[#allocation2 + $0xd8] sm:$0xff]  ;;  %v2207_v5 = vld [vmem:[#allocation2 + $0xe0] sm:$0xff]  ;;  %v2208_v33 = vld [vmem:[#allocation2 + $0xe8] sm:$0xff] }
 0x23e   : > { %v2209_v40 = vld [vmem:[#allocation2 + $0xf0] sm:$0xff]  ;;  %v2210_v50 = vld [vmem:[#allocation2 + $0xf8] sm:$0xff]  ;;  %v2211_v34 = vld [vmem:[#allocation2 + $0x100] sm:$0xff]  ;;  %p2753_p4 = pnand %p2752_p13, %p2746_p1 }
 0x23f   : > { %v2312_v58 = vadd.f32 %v2311_v8, %v2185_v62  ;;  %v2212_v26 = vld [vmem:[#allocation2 + $0x108] sm:$0xff]  ;;  %v2213_v51 = vld [vmem:[#allocation2 + $0x110] sm:$0xff]  ;;  %v2214_v32 = vld [vmem:[#allocation2 + $0x118] sm:$0xff] }
 0x240   : > { %v2215_v44 = vld [vmem:[#allocation2 + $0x120] sm:$0xff]  ;;  %v2216_v15 = vld [vmem:[#allocation2 + $0x128] sm:$0xff]  ;;  %v2217_v62 = vld [vmem:[#allocation2 + $0x130] sm:$0xff] }
 0x241   : > { %v2313_v25 = vadd.f32 %v2312_v58, %v2186_v20  ;;  %v2218_v20 = vld [vmem:[#allocation2 + $0x138] sm:$0xff] }
 0x243   : > { %v2314_v60 = vadd.f32 %v2313_v25, %v2187_v36  ;;  %v2219_v36 = vld [vmem:[#allocation2 + $0x140] sm:$0xff] }
 0x245   : > { %v2315_v1 = vadd.f32 %v2314_v60, %v2188_v27  ;;  %v2220_v27 = vld [vmem:[#allocation2 + $0x148] sm:$0xff] }
 0x247   : > { %v2316_v48 = vadd.f32 %v2315_v1, %v2189_v12  ;;  %v2221_v12 = vld [vmem:[#allocation2 + $0x150] sm:$0xff] }
 0x249   : > { %v2317_v13 = vadd.f32 %v2316_v48, %v2190_v42  ;;  %v2222_v42 = vld [vmem:[#allocation2 + $0x158] sm:$0xff] }
 0x24b   : > { %v2318_v56 = vadd.f32 %v2317_v13, %v2191_v43  ;;  %v2223_v43 = vld [vmem:[#allocation2 + $0x160] sm:$0xff] }
 0x24d   : > { %v2319_v7 = vadd.f32 %v2318_v56, %v2192_v54  ;;  %v2224_v54 = vld [vmem:[#allocation2 + $0x168] sm:$0xff] }
 0x24f   : > { %v2320_v30 = vadd.f32 %v2319_v7, %v2193_v57  ;;  %v2225_v57 = vld [vmem:[#allocation2 + $0x170] sm:$0xff] }
 0x251   : > { %v2321_v23 = vadd.f32 %v2320_v30, %v2194_v63  ;;  %v2226_v63 = vld [vmem:[#allocation2 + $0x178] sm:$0xff] }
 0x253   : > { %v2322_v24 = vadd.f32 %v2321_v23, %v2195_v22  ;;  %v2227_v22 = vld [vmem:[#allocation2 + $0x180] sm:$0xff] }
 0x255   : > { %v2323_v11 = vadd.f32 %v2322_v24, %v2196_v2  ;;  %v2228_v2 = vld [vmem:[#allocation2 + $0x188] sm:$0xff] }
 0x257   : > { %v2324_v3 = vadd.f32 %v2323_v11, %v2197_v31  ;;  %v2229_v31 = vld [vmem:[#allocation2 + $0x190] sm:$0xff] }
 0x259   : > { %v2325_v37 = vadd.f32 %v2324_v3, %v2198_v53  ;;  %v2230_v53 = vld [vmem:[#allocation2 + $0x198] sm:$0xff] }
 0x25b   : > { %v2326_v16 = vadd.f32 %v2325_v37, %v2199_v6  ;;  %v2231_v6 = vld [vmem:[#allocation2 + $0x1a0] sm:$0xff] }
 0x25d   : > { %v2327_v59 = vadd.f32 %v2326_v16, %v2200_v4  ;;  %v2232_v4 = vld [vmem:[#allocation2 + $0x1a8] sm:$0xff] }
 0x25f   : > { %v2328_v14 = vadd.f32 %v2327_v59, %v2201_v61  ;;  %v2233_v61 = vld [vmem:[#allocation2 + $0x1b0] sm:$0xff] }
 0x261   : > { %v2329_v0 = vadd.f32 %v2328_v14, %v2202_v9  ;;  %v2234_v9 = vld [vmem:[#allocation2 + $0x1b8] sm:$0xff] }
 0x263   : > { %v2330_v21 = vadd.f32 %v2329_v0, %v2203_v47  ;;  %v2235_v47 = vld [vmem:[#allocation2 + $0x1c0] sm:$0xff] }
 0x265   : > { %v2331_v41 = vadd.f32 %v2330_v21, %v2204_v45  ;;  %v2236_v45 = vld [vmem:[#allocation2 + $0x1c8] sm:$0xff] }
 0x267   : > { %v2332_v38 = vadd.f32 %v2331_v41, %v2205_v17  ;;  %v2237_v17 = vld [vmem:[#allocation2 + $0x1d0] sm:$0xff] }
 0x269   : > { %v2333_v35 = vadd.f32 %v2332_v38, %v2206_v29  ;;  %v2238_v29 = vld [vmem:[#allocation2 + $0x1d8] sm:$0xff] }
 0x26b   : > { %v2334_v19 = vadd.f32 %v2333_v35, %v2207_v5  ;;  %v2239_v5 = vld [vmem:[#allocation2 + $0x1e0] sm:$0xff] }
 0x26d   : > { %v2335_v46 = vadd.f32 %v2334_v19, %v2208_v33  ;;  %v2240_v33 = vld [vmem:[#allocation2 + $0x1e8] sm:$0xff] }
 0x26f   : > { %v2336_v28 = vadd.f32 %v2335_v46, %v2209_v40  ;;  %v2241_v40 = vld [vmem:[#allocation2 + $0x1f0] sm:$0xff] }
 0x271   : > { %v2337_v10 = vadd.f32 %v2336_v28, %v2210_v50  ;;  %v2242_v50 = vld [vmem:[#allocation2 + $0x1f8] sm:$0xff] }
 0x273   : > { %v2338_v52 = vadd.f32 %v2337_v10, %v2211_v34  ;;  %v2243_v34 = vld [vmem:[#allocation2 + $0x200] sm:$0xff] }
 0x275   : > { %v2339_v49 = vadd.f32 %v2338_v52, %v2212_v26  ;;  %v2244_v26 = vld [vmem:[#allocation2 + $0x208] sm:$0xff] }
 0x277   : > { %v2340_v39 = vadd.f32 %v2339_v49, %v2213_v51  ;;  %v2245_v51 = vld [vmem:[#allocation2 + $0x210] sm:$0xff] }
 0x279   : > { %v2341_v55 = vadd.f32 %v2340_v39, %v2214_v32  ;;  %v2246_v32 = vld [vmem:[#allocation2 + $0x218] sm:$0xff] }
 0x27b   : > { %v2342_v18 = vadd.f32 %v2341_v55, %v2215_v44  ;;  %v2247_v44 = vld [vmem:[#allocation2 + $0x220] sm:$0xff] }
 0x27d   : > { %v2343_v8 = vadd.f32 %v2342_v18, %v2216_v15  ;;  %v2248_v15 = vld [vmem:[#allocation2 + $0x228] sm:$0xff] }
 0x27f   : > { %v2344_v58 = vadd.f32 %v2343_v8, %v2217_v62  ;;  %v2249_v62 = vld [vmem:[#allocation2 + $0x230] sm:$0xff] }
 0x281   : > { %v2345_v25 = vadd.f32 %v2344_v58, %v2218_v20  ;;  %v2250_v20 = vld [vmem:[#allocation2 + $0x238] sm:$0xff] }
 0x283   : > { %v2346_v60 = vadd.f32 %v2345_v25, %v2219_v36  ;;  %v2251_v36 = vld [vmem:[#allocation2 + $0x240] sm:$0xff] }
 0x285   : > { %v2347_v1 = vadd.f32 %v2346_v60, %v2220_v27  ;;  %v2252_v27 = vld [vmem:[#allocation2 + $0x248] sm:$0xff] }
 0x287   : > { %v2348_v48 = vadd.f32 %v2347_v1, %v2221_v12  ;;  %v2253_v12 = vld [vmem:[#allocation2 + $0x250] sm:$0xff] }
 0x289   : > { %v2349_v13 = vadd.f32 %v2348_v48, %v2222_v42  ;;  %v2254_v42 = vld [vmem:[#allocation2 + $0x258] sm:$0xff] }
 0x28b   : > { %v2350_v56 = vadd.f32 %v2349_v13, %v2223_v43  ;;  %v2255_v43 = vld [vmem:[#allocation2 + $0x260] sm:$0xff] }
 0x28d   : > { %v2351_v7 = vadd.f32 %v2350_v56, %v2224_v54  ;;  %v2256_v54 = vld [vmem:[#allocation2 + $0x268] sm:$0xff] }
 0x28f   : > { %v2352_v30 = vadd.f32 %v2351_v7, %v2225_v57  ;;  %v2257_v57 = vld [vmem:[#allocation2 + $0x270] sm:$0xff] }
 0x291   : > { %v2353_v23 = vadd.f32 %v2352_v30, %v2226_v63  ;;  %v2258_v63 = vld [vmem:[#allocation2 + $0x278] sm:$0xff] }
 0x293   : > { %v2354_v24 = vadd.f32 %v2353_v23, %v2227_v22  ;;  %v2259_v22 = vld [vmem:[#allocation2 + $0x280] sm:$0xff] }
 0x295   : > { %v2355_v11 = vadd.f32 %v2354_v24, %v2228_v2  ;;  %v2260_v2 = vld [vmem:[#allocation2 + $0x288] sm:$0xff] }
 0x297   : > { %v2356_v3 = vadd.f32 %v2355_v11, %v2229_v31  ;;  %v2261_v31 = vld [vmem:[#allocation2 + $0x290] sm:$0xff] }
 0x299   : > { %v2357_v37 = vadd.f32 %v2356_v3, %v2230_v53  ;;  %v2262_v53 = vld [vmem:[#allocation2 + $0x298] sm:$0xff] }
 0x29b   : > { %v2358_v16 = vadd.f32 %v2357_v37, %v2231_v6  ;;  %v2263_v6 = vld [vmem:[#allocation2 + $0x2a0] sm:$0xff] }
 0x29d   : > { %v2359_v59 = vadd.f32 %v2358_v16, %v2232_v4  ;;  %v2264_v4 = vld [vmem:[#allocation2 + $0x2a8] sm:$0xff] }
 0x29f   : > { %v2360_v14 = vadd.f32 %v2359_v59, %v2233_v61  ;;  %v2265_v61 = vld [vmem:[#allocation2 + $0x2b0] sm:$0xff] }
 0x2a1   : > { %v2361_v0 = vadd.f32 %v2360_v14, %v2234_v9  ;;  %v2266_v9 = vld [vmem:[#allocation2 + $0x2b8] sm:$0xff] }
 0x2a3   : > { %v2362_v21 = vadd.f32 %v2361_v0, %v2235_v47  ;;  %v2267_v47 = vld [vmem:[#allocation2 + $0x2c0] sm:$0xff] }
 0x2a5   : > { %v2363_v41 = vadd.f32 %v2362_v21, %v2236_v45  ;;  %v2268_v45 = vld [vmem:[#allocation2 + $0x2c8] sm:$0xff] }
 0x2a7   : > { %v2364_v38 = vadd.f32 %v2363_v41, %v2237_v17  ;;  %v2269_v17 = vld [vmem:[#allocation2 + $0x2d0] sm:$0xff] }
 0x2a9   : > { %v2365_v35 = vadd.f32 %v2364_v38, %v2238_v29  ;;  %v2270_v29 = vld [vmem:[#allocation2 + $0x2d8] sm:$0xff] }
 0x2ab   : > { %v2366_v19 = vadd.f32 %v2365_v35, %v2239_v5  ;;  %v2271_v5 = vld [vmem:[#allocation2 + $0x2e0] sm:$0xff] }
 0x2ad   : > { %v2367_v46 = vadd.f32 %v2366_v19, %v2240_v33  ;;  %v2272_v33 = vld [vmem:[#allocation2 + $0x2e8] sm:$0xff] }
 0x2af   : > { %v2368_v28 = vadd.f32 %v2367_v46, %v2241_v40  ;;  %v2273_v40 = vld [vmem:[#allocation2 + $0x2f0] sm:$0xff] }
 0x2b1   : > { %v2369_v10 = vadd.f32 %v2368_v28, %v2242_v50  ;;  %v2274_v50 = vld [vmem:[#allocation2 + $0x2f8] sm:$0xff] }
 0x2b3   : > { %v2370_v52 = vadd.f32 %v2369_v10, %v2243_v34  ;;  %v2275_v34 = vld [vmem:[#allocation2 + $0x300] sm:$0xff] }
 0x2b5   : > { %v2371_v49 = vadd.f32 %v2370_v52, %v2244_v26  ;;  %v2276_v26 = vld [vmem:[#allocation2 + $0x308] sm:$0xff] }
 0x2b7   : > { %v2372_v39 = vadd.f32 %v2371_v49, %v2245_v51  ;;  %v2277_v51 = vld [vmem:[#allocation2 + $0x310] sm:$0xff] }
 0x2b9   : > { %v2373_v55 = vadd.f32 %v2372_v39, %v2246_v32  ;;  %v2278_v32 = vld [vmem:[#allocation2 + $0x318] sm:$0xff] }
 0x2bb   : > { %v2374_v18 = vadd.f32 %v2373_v55, %v2247_v44  ;;  %v2279_v44 = vld [vmem:[#allocation2 + $0x320] sm:$0xff] }
 0x2bd   : > { %v2375_v8 = vadd.f32 %v2374_v18, %v2248_v15  ;;  %v2280_v15 = vld [vmem:[#allocation2 + $0x328] sm:$0xff] }
 0x2bf   : > { %v2376_v58 = vadd.f32 %v2375_v8, %v2249_v62  ;;  %v2281_v62 = vld [vmem:[#allocation2 + $0x330] sm:$0xff] }
 0x2c1   : > { %v2377_v25 = vadd.f32 %v2376_v58, %v2250_v20  ;;  %v2282_v20 = vld [vmem:[#allocation2 + $0x338] sm:$0xff] }
 0x2c3   : > { %v2378_v60 = vadd.f32 %v2377_v25, %v2251_v36  ;;  %v2283_v36 = vld [vmem:[#allocation2 + $0x340] sm:$0xff] }
 0x2c5   : > { %v2379_v1 = vadd.f32 %v2378_v60, %v2252_v27  ;;  %v2284_v27 = vld [vmem:[#allocation2 + $0x348] sm:$0xff] }
 0x2c7   : > { %v2380_v48 = vadd.f32 %v2379_v1, %v2253_v12  ;;  %v2285_v12 = vld [vmem:[#allocation2 + $0x350] sm:$0xff] }
 0x2c9   : > { %v2381_v13 = vadd.f32 %v2380_v48, %v2254_v42  ;;  %v2286_v42 = vld [vmem:[#allocation2 + $0x358] sm:$0xff] }
 0x2cb   : > { %v2382_v56 = vadd.f32 %v2381_v13, %v2255_v43  ;;  %v2287_v43 = vld [vmem:[#allocation2 + $0x360] sm:$0xff] }
 0x2cd   : > { %v2383_v7 = vadd.f32 %v2382_v56, %v2256_v54  ;;  %v2288_v54 = vld [vmem:[#allocation2 + $0x368] sm:$0xff] }
 0x2cf   : > { %v2384_v30 = vadd.f32 %v2383_v7, %v2257_v57  ;;  %v2289_v57 = vld [vmem:[#allocation2 + $0x370] sm:$0xff] }
 0x2d1   : > { %v2385_v23 = vadd.f32 %v2384_v30, %v2258_v63  ;;  %v2290_v63 = vld [vmem:[#allocation2 + $0x378] sm:$0xff] }
 0x2d3   : > { %v2386_v24 = vadd.f32 %v2385_v23, %v2259_v22  ;;  %v2291_v22 = vld [vmem:[#allocation2 + $0x380] sm:$0xff] }
 0x2d5   : > { %v2387_v11 = vadd.f32 %v2386_v24, %v2260_v2  ;;  %v2292_v2 = vld [vmem:[#allocation2 + $0x388] sm:$0xff] }
 0x2d7   : > { %v2388_v3 = vadd.f32 %v2387_v11, %v2261_v31  ;;  %v2293_v31 = vld [vmem:[#allocation2 + $0x390] sm:$0xff] }
 0x2d9   : > { %v2389_v37 = vadd.f32 %v2388_v3, %v2262_v53  ;;  %v2294_v53 = vld [vmem:[#allocation2 + $0x398] sm:$0xff] }
 0x2db   : > { %v2390_v16 = vadd.f32 %v2389_v37, %v2263_v6  ;;  %v2295_v6 = vld [vmem:[#allocation2 + $0x3a0] sm:$0xff] }
 0x2dd   : > { %v2391_v59 = vadd.f32 %v2390_v16, %v2264_v4  ;;  %v2296_v4 = vld [vmem:[#allocation2 + $0x3a8] sm:$0xff] }
 0x2df   : > { %v2392_v14 = vadd.f32 %v2391_v59, %v2265_v61  ;;  %v2297_v61 = vld [vmem:[#allocation2 + $0x3b0] sm:$0xff] }
 0x2e1   : > { %v2393_v0 = vadd.f32 %v2392_v14, %v2266_v9  ;;  %v2298_v9 = vld [vmem:[#allocation2 + $0x3b8] sm:$0xff] }
 0x2e3   : > { %v2394_v21 = vadd.f32 %v2393_v0, %v2267_v47  ;;  %v2299_v47 = vld [vmem:[#allocation2 + $0x3c0] sm:$0xff] }
 0x2e5   : > { %v2395_v41 = vadd.f32 %v2394_v21, %v2268_v45  ;;  %v2300_v45 = vld [vmem:[#allocation2 + $0x3c8] sm:$0xff] }
 0x2e7   : > { %v2396_v38 = vadd.f32 %v2395_v41, %v2269_v17  ;;  %v2301_v17 = vld [vmem:[#allocation2 + $0x3d0] sm:$0xff] }
 0x2e9   : > { %v2397_v35 = vadd.f32 %v2396_v38, %v2270_v29  ;;  %v2302_v29 = vld [vmem:[#allocation2 + $0x3d8] sm:$0xff] }
 0x2eb   : > { %v2398_v19 = vadd.f32 %v2397_v35, %v2271_v5  ;;  %v2303_v5 = vld [vmem:[#allocation2 + $0x3e0] sm:$0xff] }
 0x2ed   : > { %v2399_v46 = vadd.f32 %v2398_v19, %v2272_v33  ;;  %v2304_v33 = vld [vmem:[#allocation2 + $0x3e8] sm:$0xff] }
 0x2ef   : > { %v2400_v28 = vadd.f32 %v2399_v46, %v2273_v40  ;;  %v2305_v40 = vld [vmem:[#allocation2 + $0x3f0] sm:$0xff] }
 0x2f1   : > { %v2401_v10 = vadd.f32 %v2400_v28, %v2274_v50  ;;  %v2306_v50 = vld [vmem:[#allocation2 + $0x3f8] sm:$0xff] }
 0x2f3   : > { %v2402_v52 = vadd.f32 %v2401_v10, %v2275_v34 }
 0x2f5   : > { %v2403_v49 = vadd.f32 %v2402_v52, %v2276_v26 }
 0x2f7   : > { %v2404_v39 = vadd.f32 %v2403_v49, %v2277_v51 }
 0x2f9   : > { %v2405_v55 = vadd.f32 %v2404_v39, %v2278_v32 }
 0x2fb   : > { %v2406_v18 = vadd.f32 %v2405_v55, %v2279_v44 }
 0x2fd   : > { %v2407_v8 = vadd.f32 %v2406_v18, %v2280_v15 }
 0x2ff   : > { %v2408_v58 = vadd.f32 %v2407_v8, %v2281_v62 }
 0x301   : > { %v2409_v25 = vadd.f32 %v2408_v58, %v2282_v20 }
 0x303   : > { %v2410_v60 = vadd.f32 %v2409_v25, %v2283_v36 }
 0x305   : > { %v2411_v1 = vadd.f32 %v2410_v60, %v2284_v27 }
 0x307   : > { %v2412_v48 = vadd.f32 %v2411_v1, %v2285_v12 }
 0x309   : > { %v2413_v13 = vadd.f32 %v2412_v48, %v2286_v42 }
 0x30b   : > { %v2414_v56 = vadd.f32 %v2413_v13, %v2287_v43 }
 0x30d   : > { %v2415_v7 = vadd.f32 %v2414_v56, %v2288_v54 }
 0x30f   : > { %v2416_v30 = vadd.f32 %v2415_v7, %v2289_v57 }
 0x311   : > { %v2417_v23 = vadd.f32 %v2416_v30, %v2290_v63 }
 0x313   : > { %v2418_v24 = vadd.f32 %v2417_v23, %v2291_v22 }
 0x315   : > { %v2419_v11 = vadd.f32 %v2418_v24, %v2292_v2 }
 0x317   : > { %v2420_v3 = vadd.f32 %v2419_v11, %v2293_v31 }
 0x319   : > { %v2421_v37 = vadd.f32 %v2420_v3, %v2294_v53 }
 0x31b   : > { %v2422_v16 = vadd.f32 %v2421_v37, %v2295_v6 }
 0x31d   : > { %v2423_v59 = vadd.f32 %v2422_v16, %v2296_v4 }
 0x31f   : > { %v2424_v14 = vadd.f32 %v2423_v59, %v2297_v61 }
 0x321   : > { %v2425_v0 = vadd.f32 %v2424_v14, %v2298_v9 }
 0x323   : > { %v2426_v21 = vadd.f32 %v2425_v0, %v2299_v47 }
 0x325   : > { %v2427_v41 = vadd.f32 %v2426_v21, %v2300_v45 }
 0x327   : > { %v2428_v38 = vadd.f32 %v2427_v41, %v2301_v17 }
 0x329   : > { %v2429_v35 = vadd.f32 %v2428_v38, %v2302_v29 }
 0x32b   : > { %v2430_v19 = vadd.f32 %v2429_v35, %v2303_v5 }
 0x32d   : > { %v2431_v46 = vadd.f32 %v2430_v19, %v2304_v33 }
 0x32f   : > { %v2432_v28 = vadd.f32 %v2431_v46, %v2305_v40 }
 0x331   : > { %v2433_v34 = vadd.f32 %v2432_v28, %v2306_v50 }
 0x333   : > { %2434 = vadd.xlane.f32.xlu0 %v2433_v34 }
 0x3c0   : > { %v2435_v10 = vpop.xlane.xlu0 %2434 }
 0x3c1   : > { %v2436_v26 = vrot.slane %v2435_v10, 4 }
 0x3c3   : > { %v2437_v52 = vadd.f32 %v2436_v26, %v2435_v10 }
 0x3c5   : > { %v2438_v51 = vrot.slane %v2437_v52, 2 }
 0x3c7   : > { %v2439_v49 = vadd.f32 %v2438_v51, %v2437_v52 }
 0x3c9   : > { %v2440_v32 = vrot.slane %v2439_v49, 1 }
 0x3cb   : > { %v2441_v39 = vadd.f32 %v2440_v32, %v2439_v49 }
 0x3cd   : > { %2587 = vpush %v2441_v39 }
 0x3fe   : > { %s2588_s12 = spop %2587 }
 0x3ff   : > { %s2445_s17 = smul.f32 7.6293945e-06, %s2588_s12 }
 0x401   : > { %v2446_v44 = vstv %s2445_s17 }
 0x402   : > { %2448 = vst [vmem:[%s231_s21] sm:$0xff] %v2446_v44 }
 0x403   : > { %2756 = shalt.err (!%p2753_p4)
}
 0x404   : > { %s2757_s29 = scalar_lea.hbm %s5132_s30, 128  ;;  %s2761_s20 = scalar_lea.hbm %s5191_s2, 256 }
 0x405   : > { %p2758_p6 = scmp.ne.s32.totalorder %s5132_s30, %s2757_s29  ;;  %p2762_p5 = scmp.lt.u32.totalorder %s5132_s30, %s5191_s2 }
 0x406   : > { %p2763_p2 = scmp.lt.u32.totalorder %s2761_s20, %s2757_s29  ;;  %p2765_p9 = scmp.lt.u32.totalorder %s2757_s29, %s5132_s30 }
 0x407   : > { %p2759_p12 = pnand %p2758_p6, %p5896_p10 }
 0x408   : > { %p2764_p8 = por %p2763_p2, %p2762_p5 }
 0x409   : > { %p2760_p0 = pneg %p2759_p12 }
 0x40a   : > { %p2766_p11 = por %p2765_p9, %p2764_p8 }
 0x40c   : > { %p2767_p1 = pnand %p2766_p11, %p2760_p0 }
 0x40e   : > { %2770 = shalt.err (!%p2767_p1)
}
 0x40f   : > { %2593 = dma.vmem_to_hbm [thread:$0]  (%p5896_p10), %s5134_s28, 128, %s5132_s30, %s2450_s4  }
 0x410 PF: > { %s2475_s3 = sand.u32 1, %s2822_s9   ;;  %p5897_p3 = scmp.ne.s32.totalorder %s5308_s26, 0 }
 0x411   : > { %p5898_p7 = scmp.ge.s32.totalorder %s2850_s16, 2  ;;  %s2476_s12 = scalar_lea.sflag [#allocation5], %s2475_s3 }
 0x413   : > { %p2603_p13 = pnand %p5898_p7, %p5897_p3 }
 0x415   : > { %2816 = dma.done.wait (!%p2603_p13), %s2476_s12, 128  }
 0x416   : > { %2818 = vsyncadd (!%p2603_p13), %s2476_s12, 4294967168  ;;  %s21_s16 = sadd.s32 1, %s2850_s16   ;;  %s5899_s9 = smov %s2826_s10 }
 0x417   : > { %p18_p4 = scmp.ge.s32.totalorder %s21_s16, 4   ;;  %s5900_s10 = smov %s2830_s11 }
 0x418   : > { %s5901_s11 = smov %s2931_s24  ;;  %s5902_s12 = smov %s2838_s13 }
 0x419   : > { %s5179_s13 = smov 0   ;;  %s5903_s14 = smov %s2846_s15 }
 0x41a   : > { %s5904_s15 = smov %s5906_s19  ;;  %20 = sbr.rel (!%p18_p4) target bundleno = 9 (0x9), region = 102 }
 0x421   :  { %2481 = vsyncpa [#allocation4], 1 }
 0x422   :  { %2483 = vsyncpa [#allocation4 + $0x1], 1 }
 0x423   :  { %2484 = vsyncpa [#allocation7], 1 }
 0x424   :  { %2486 = vsyncpa [#allocation7 + $0x1], 1 }
 0x425   :  { %2487 = vsyncpa [#allocation5], 1 }
 0x426   :  { %2489 = vsyncpa [#allocation5 + $0x1], 1 }

</bundles_post_ra>
